<compile_context>
chip_gen: v6e
topology: v6e:2x2x1
jax: 0.10.0
libtpu: 0.0.40
codegen_flags: <defaults>
</compile_context>

<pallas_src>
import functools

import jax
import jax.numpy as jnp
from jax.experimental import pallas as pl
from jax.experimental.pallas import tpu as pltpu


def _round_up(x, m):
    return (x + m - 1) // m * m


def _itemsize(dt):
    return jnp.dtype(dt).itemsize


def _vmem_limit(estimate_bytes):
    est = int(estimate_bytes * 1.3) + (2 << 20)
    return int(min(max(est, 32 << 20), 100 << 20))


def _num_tensorcores():
    """Best-effort TensorCore count of the local device (1 if unknown)."""
    try:
        dev = jax.devices()[0]
        for attr in ("num_cores", "core_count"):
            v = getattr(dev, attr, None)
            if v:
                return max(1, int(v))
    except Exception:
        pass
    return 1


# Gate pre-scale for the one-tanh sigmoid trick: sigmoid(x) = .5 + .5*tanh(x/2).
# i/f/o columns of W_ih, W_hh and the bias are scaled by 0.5 (exact in fp).
_GATE_PRESCALE = (0.5, 0.5, 1.0, 0.5)            # i, f, g, o


# ----------------------------------------------------------------------------
# Kernel 1: layer-0 input projection  gx = X @ W_ih^T + (b_ih + b_hh)
# One big matmul over all timesteps, tiled over rows and (if large) gates.
# ----------------------------------------------------------------------------
def _proj_kernel(x_ref, w_ref, b_ref, o_ref, *, mxu_dtype):
    acc = jnp.dot(x_ref[...].astype(mxu_dtype), w_ref[...],
                  preferred_element_type=jnp.float32)
    o_ref[...] = (acc + b_ref[...]).astype(o_ref.dtype)


def _proj(x2d, w_t, b_row, mxu_dtype, out_dtype):
    """x2d: (rows, K) f32, w_t: (K, N) mxu dtype, b_row: (1, N) f32 -> (rows, N)."""
    rows, K = x2d.shape
    N = w_t.shape[1]
    # N-tiling keeps double-buffered weight/output blocks inside a v7x-sized
    # VMEM budget when 4*Hp is large; full-N blocks otherwise.
    TN = N
    if N > 2048:
        for cand in (2048, 1024, 512):
            if N % cand == 0:
                TN = cand
                break
    TM = rows if rows < 512 else (256 if N > 2048 else 512)
    rows_p = _round_up(rows, TM)
    if rows_p != rows:
        x2d = jnp.pad(x2d, ((0, rows_p - rows), (0, 0)))

    est = (2 * TM * K * _itemsize(x2d.dtype)
           + 2 * K * TN * _itemsize(w_t.dtype)
           + 2 * TN * 4
           + 2 * TM * TN * _itemsize(out_dtype))

    out = pl.pallas_call(
        functools.partial(_proj_kernel, mxu_dtype=mxu_dtype),
        grid_spec=pltpu.PrefetchScalarGridSpec(
            num_scalar_prefetch=0,
            grid=(rows_p // TM, N // TN),
            in_specs=[
                pl.BlockSpec((TM, K), lambda i, j: (i, 0)),
                pl.BlockSpec((K, TN), lambda i, j: (0, j)),
                pl.BlockSpec((1, TN), lambda i, j: (0, j)),
            ],
            out_specs=pl.BlockSpec((TM, TN), lambda i, j: (i, j)),
        ),
        out_shape=jax.ShapeDtypeStruct((rows_p, N), out_dtype),
        compiler_params=pltpu.CompilerParams(
            dimension_semantics=("parallel", "parallel"),
            vmem_limit_bytes=_vmem_limit(est)),
    )(x2d, w_t, b_row)
    return out[:rows]


# ----------------------------------------------------------------------------
# Kernel 2: LSTM recurrence over a chunk of timesteps + fused chunk epilogue.
# The epilogue matmul is either the NEXT layer's input projection (emits
# gx_{l+1} directly) or the fc head (last layer).
# ----------------------------------------------------------------------------
def _lstm_rec_kernel(gx_ref, h0_ref, c0_ref, whh_ref, ew_ref, eb_ref,
                     out_ref, hn_ref, cn_ref,
                     h_sc, c_sc, y_sc,
                     *, t_chunk, hidden_pad, seq_len, mask_tail, unroll):
    Hp = hidden_pad
    t = pl.program_id(1)

    @pl.when(t == 0)
    def _():
        h_sc[...] = h0_ref[...].astype(jnp.float32)
        c_sc[...] = c0_ref[...].astype(jnp.float32)

    w_hh = whh_ref[...]            # resident recurrent weight (Hp, 4Hp)

    def one_step(i):
        h_prev = h_sc[...]
        c_prev = c_sc[...]
        # Gate pre-activations; i/f/o columns were pre-scaled by 0.5 so a
        # single tanh over the whole 4Hp block implements all sigmoids.
        gates = (gx_ref[i].astype(jnp.float32)
                 + jnp.dot(h_prev.astype(w_hh.dtype), w_hh,
                           preferred_element_type=jnp.float32))
        t_all = jnp.tanh(gates)
        i_g = 0.5 + 0.5 * t_all[:, 0 * Hp:1 * Hp]
        f_g = 0.5 + 0.5 * t_all[:, 1 * Hp:2 * Hp]
        g_g = t_all[:, 2 * Hp:3 * Hp]
        o_g = 0.5 + 0.5 * t_all[:, 3 * Hp:4 * Hp]
        c_new = f_g * c_prev + i_g * g_g
        h_new = o_g * jnp.tanh(c_new)
        y_sc[i] = h_new
        if mask_tail:
            keep = (t * t_chunk + i) < seq_len
            c_sc[...] = jnp.where(keep, c_new, c_prev)
            h_sc[...] = jnp.where(keep, h_new, h_prev)
        else:
            c_sc[...] = c_new
            h_sc[...] = h_new

    # Bounded unroll: sequential outer loop, `unroll`-step static inner body
    # (full unroll of a long chunk would overflow the 64-vreg file).
    def group(j, carry):
        for u in range(unroll):
            one_step(j * unroll + u)
        return carry

    jax.lax.fori_loop(0, t_chunk // unroll, group, 0)

    # Chunk epilogue: one MXU matmul with M = t_chunk*TB rows.  For middle
    # layers this emits the next layer's gx (hidden states never hit HBM);
    # for the last layer it is the fc head.
    tb = h_sc.shape[0]
    y2 = y_sc[...].reshape(t_chunk * tb, Hp)
    epi = jnp.dot(y2.astype(ew_ref.dtype), ew_ref[...],
                  preferred_element_type=jnp.float32) + eb_ref[...]
    out_ref[...] = epi.reshape(t_chunk, tb, -1).astype(out_ref.dtype)

    @pl.when(t == pl.num_programs(1) - 1)
    def _():
        hn_ref[...] = h_sc[...].astype(hn_ref.dtype)
        cn_ref[...] = c_sc[...].astype(cn_ref.dtype)


def _lstm_layer_rec(gx, h0, c0, whh_t, epi_w, epi_b, *,
                    t_chunk, seq_len, out_dtype, num_cores):
    """One LSTM layer recurrence + fused epilogue.

    gx     : (S_pad, Bp, 4Hp) precomputed x@W_ih + bias (gate-major, padded)
    h0, c0 : (Bp, Hp) f32
    whh_t  : (Hp, 4Hp) mxu dtype
    epi_w  : (Hp, Ne) epilogue weight (next layer W_ih^T or fc_w^T)
    epi_b  : (1, Ne)  epilogue bias (f32)
    """
    S_pad, Bp, G = gx.shape
    Hp = h0.shape[1]
    Ne = epi_w.shape[1]
    nt = S_pad // t_chunk
    mask_tail = (S_pad != seq_len)
    unroll = 4 if t_chunk % 4 == 0 else 1

    # Batch split across TensorCores only when a second core exists AND the
    # per-core tile stays large; on single-core chips splitting just doubles
    # the number of sequential time-chunk grid steps.
    nb = 2 if (num_cores >= 2 and Bp % 16 == 0 and Bp // 2 >= 64) else 1
    TB = Bp // nb

    kernel = functools.partial(
        _lstm_rec_kernel, t_chunk=t_chunk, hidden_pad=Hp,
        seq_len=seq_len, mask_tail=mask_tail, unroll=unroll)

    hn_spec = pl.BlockSpec((TB, Hp), lambda b, t: (b, 0))
    in_specs = [
        pl.BlockSpec((t_chunk, TB, G), lambda b, t: (t, b, 0)),   # gx chunk
        pl.BlockSpec((TB, Hp), lambda b, t: (b, 0)),              # h0
        pl.BlockSpec((TB, Hp), lambda b, t: (b, 0)),              # c0
        pl.BlockSpec((Hp, G), lambda b, t: (0, 0)),               # W_hh^T (resident)
        pl.BlockSpec((Hp, Ne), lambda b, t: (0, 0)),              # epilogue weight
        pl.BlockSpec((1, Ne), lambda b, t: (0, 0)),               # epilogue bias
    ]
    out_specs = (
        pl.BlockSpec((t_chunk, TB, Ne), lambda b, t: (t, b, 0)),  # gx_{l+1} / fc out
        hn_spec, hn_spec,
    )
    out_shape = (jax.ShapeDtypeStruct((S_pad, Bp, Ne), out_dtype),
                 jax.ShapeDtypeStruct((Bp, Hp), jnp.float32),
                 jax.ShapeDtypeStruct((Bp, Hp), jnp.float32))
    scratch = [pltpu.VMEM((TB, Hp), jnp.float32),                 # h state
               pltpu.VMEM((TB, Hp), jnp.float32),                 # c state
               pltpu.VMEM((t_chunk, TB, Hp), jnp.float32)]        # chunk hiddens

    w_b = _itemsize(whh_t.dtype)
    est = (2 * t_chunk * TB * G * _itemsize(gx.dtype)
           + 2 * t_chunk * TB * Ne * _itemsize(out_dtype)
           + 2 * Hp * G * w_b + 2 * Hp * Ne * w_b + 2 * Ne * 4
           + 8 * TB * Hp * 4
           + (2 + t_chunk) * TB * Hp * 4)

    return pl.pallas_call(
        kernel,
        grid_spec=pltpu.PrefetchScalarGridSpec(
            num_scalar_prefetch=0,
            grid=(nb, nt),
            in_specs=in_specs,
            out_specs=out_specs,
            scratch_shapes=scratch),
        out_shape=out_shape,
        compiler_params=pltpu.CompilerParams(
            dimension_semantics=("parallel", "arbitrary"),   # batch ∥, time sequential
            vmem_limit_bytes=_vmem_limit(est)),
    )(gx, h0, c0, whh_t, epi_w, epi_b)


# ----------------------------------------------------------------------------
# Parameter padding: hidden -> multiple of 128 (lane), per-gate layout kept,
# i/f/o gate columns pre-scaled by 0.5 (one-tanh sigmoid).  Padded units have
# zero weights/bias, so padded h/c stay exactly 0.
# ----------------------------------------------------------------------------
def _pad_gates(w, H, Hp, in_dim, in_pad):
    """w: (4H, in_dim) PyTorch layout -> (in_pad, 4Hp) gate-major transpose."""
    w4 = w.reshape(4, H, in_dim)
    w4 = w4 * jnp.asarray(_GATE_PRESCALE, w.dtype)[:, None, None]
    w4 = jnp.pad(w4, ((0, 0), (0, Hp - H), (0, in_pad - in_dim)))
    return w4.reshape(4 * Hp, in_pad).T


def _pad_bias(b_ih, b_hh, H, Hp):
    b = (b_ih + b_hh).reshape(4, H)
    b = b * jnp.asarray(_GATE_PRESCALE, jnp.float32)[:, None]
    b = jnp.pad(b, ((0, 0), (0, Hp - H)))
    return b.reshape(1, 4 * Hp).astype(jnp.float32)


def _prepare_padded_params(p, In, H, Hp, O, Op, mxu_dtype):
    out = {"lstm": []}
    for l, (w_ih, w_hh, b_ih, b_hh) in enumerate(p["lstm"]):
        in_dim = In if l == 0 else H
        in_pad = In if l == 0 else Hp
        w_ih_t = _pad_gates(w_ih, H, Hp, in_dim, in_pad).astype(mxu_dtype)
        w_hh_t = _pad_gates(w_hh, H, Hp, H, Hp).astype(mxu_dtype)
        bias = _pad_bias(b_ih, b_hh, H, Hp)
        out["lstm"].append((w_ih_t, w_hh_t, bias))
    fc_w = jnp.pad(p["fc_w"], ((0, Op - O), (0, Hp - H)))         # (Op, Hp)
    out["fc_w_t"] = fc_w.T.astype(mxu_dtype)                      # (Hp, Op)
    out["fc_b"] = jnp.pad(p["fc_b"], (0, Op - O))[None, :].astype(jnp.float32)
    return out


def _pick_t_chunk(S, Bp, Hp, ne_max, gx_bytes):
    """Largest multiple-of-4 time chunk whose VMEM working set fits ~40 MiB
    (leaves headroom for the resident weights inside v7x's 64 MiB)."""
    budget = 40 << 20
    cap = _round_up(max(S, 1), 4)
    tc_max = 4
    for cand in (64, 32, 16, 8, 4):
        if cand > cap:
            continue
        per = (2 * cand * Bp * 4 * Hp * gx_bytes      # gx blocks, double buffered
               + 2 * cand * Bp * ne_max * 4           # epilogue output blocks
               + cand * Bp * Hp * 4)                  # y scratch
        if per <= budget:
            tc_max = cand
            break
    tc_max = min(tc_max, cap)
    nt = -(-S // tc_max)
    return _round_up(-(-S // nt), 4)


# ----------------------------------------------------------------------------
# Full forward: mirrors GenerativeLSTM.forward(x, hidden)
# ----------------------------------------------------------------------------
def generative_lstm_forward(x, hidden, params, *, mxu_dtype=jnp.bfloat16,
                            t_chunk=None):
    """x: (B, S, input_size) batch_first; hidden = (h0, c0), each (L, B, H)."""
    h0, c0 = hidden
    L, B, H = h0.shape
    S, In = x.shape[1], x.shape[2]
    O = params["fc_b"].shape[0]

    Bp = _round_up(B, 8)       # sublane alignment
    Hp = _round_up(H, 128)     # lane-dense hidden
    Op = _round_up(O, 128)     # lane-dense fc output

    f32_mxu = jnp.dtype(mxu_dtype) == jnp.dtype(jnp.float32)
    # gx / intermediate activations stored in the MXU dtype (bf16 halves the
    # largest HBM tensor); gate math and h/c state are always f32.
    gx_dtype = jnp.float32 if f32_mxu else jnp.dtype(mxu_dtype)

    if t_chunk is None:
        t_chunk = _pick_t_chunk(S, Bp, Hp, max(4 * Hp, Op), _itemsize(gx_dtype))
    nt = -(-S // t_chunk)
    S_pad = nt * t_chunk

    num_cores = _num_tensorcores()
    pp = _prepare_padded_params(params, In, H, Hp, O, Op, mxu_dtype)

    xs = jnp.transpose(x, (1, 0, 2))                              # (S, B, In)
    xs = jnp.pad(xs, ((0, S_pad - S), (0, Bp - B), (0, 0)))       # (S_pad, Bp, In)
    h0p = jnp.pad(h0, ((0, 0), (0, Bp - B), (0, Hp - H)))
    c0p = jnp.pad(c0, ((0, 0), (0, Bp - B), (0, Hp - H)))

    # Layer 0 input projection, hoisted over all timesteps (one big matmul).
    w_ih0_t, _, bias0 = pp["lstm"][0]
    gx = _proj(xs.reshape(S_pad * Bp, In), w_ih0_t, bias0,
               mxu_dtype, gx_dtype).reshape(S_pad, Bp, 4 * Hp)

    hn_list, cn_list = [], []
    for l in range(L):
        w_hh_t = pp["lstm"][l][1]
        if l == L - 1:
            epi_w, epi_b = pp["fc_w_t"], pp["fc_b"]               # fused fc head
            out_dtype = jnp.float32
        else:
            epi_w, _, epi_b = pp["lstm"][l + 1]                   # next layer W_ih^T
            out_dtype = gx_dtype
        gx, h_n, c_n = _lstm_layer_rec(
            gx, h0p[l], c0p[l], w_hh_t, epi_w, epi_b,
            t_chunk=t_chunk, seq_len=S, out_dtype=out_dtype,
            num_cores=num_cores)
        hn_list.append(h_n)
        cn_list.append(c_n)

    out = jnp.transpose(gx[:S, :B, :O], (1, 0, 2))                # (B, S, O)
    h_n = jnp.stack(hn_list, 0)[:, :B, :H]
    c_n = jnp.stack(cn_list, 0)[:, :B, :H]
    return out, (h_n, c_n)


# ----------------------------------------------------------------------------
# Pure-JAX reference (raw PyTorch-layout params, highest-precision matmuls).
# ----------------------------------------------------------------------------
def reference_forward(x, hidden, params):
    h0, c0 = hidden
    L = h0.shape[0]
    H = h0.shape[2]
    prec = jax.lax.Precision.HIGHEST
    layer_in = jnp.transpose(x, (1, 0, 2))
    hn_list, cn_list = [], []
    for l in range(L):
        w_ih, w_hh, b_ih, b_hh = params["lstm"][l]

        def step(carry, x_t, w_ih=w_ih, w_hh=w_hh, b_ih=b_ih, b_hh=b_hh):
            h, c = carry
            g = (jnp.dot(x_t, w_ih.T, precision=prec)
                 + jnp.dot(h, w_hh.T, precision=prec) + b_ih + b_hh)
            i = jax.nn.sigmoid(g[:, 0 * H:1 * H])
            f = jax.nn.sigmoid(g[:, 1 * H:2 * H])
            gg = jnp.tanh(g[:, 2 * H:3 * H])
            o = jax.nn.sigmoid(g[:, 3 * H:4 * H])
            c_new = f * c + i * gg
            h_new = o * jnp.tanh(c_new)
            return (h_new, c_new), h_new

        (h_n, c_n), ys = jax.lax.scan(step, (h0[l], c0[l]), layer_in)
        layer_in = ys
        hn_list.append(h_n)
        cn_list.append(c_n)
    out = jnp.dot(layer_in, params["fc_w"].T, precision=prec) + params["fc_b"]
    return jnp.transpose(out, (1, 0, 2)), (jnp.stack(hn_list, 0),
                                           jnp.stack(cn_list, 0))


# ----------------------------------------------------------------------------
# Deterministic parameter init (PyTorch-style uniform(-1/sqrt(H), 1/sqrt(H))),
# raw PyTorch layout: w_ih (4H, In), w_hh (4H, H), fc_w (O, H).
# ----------------------------------------------------------------------------
def init_params(key, input_size, hidden_size, num_layers, output_size):
    bound = 1.0 / (hidden_size ** 0.5)
    params = {"lstm": []}
    for _ in range(num_layers):
        in_sz = input_size if not params["lstm"] else hidden_size
        key, k1, k2, k3, k4 = jax.random.split(key, 5)
        w_ih = jax.random.uniform(k1, (4 * hidden_size, in_sz),
                                  minval=-bound, maxval=bound, dtype=jnp.float32)
        w_hh = jax.random.uniform(k2, (4 * hidden_size, hidden_size),
                                  minval=-bound, maxval=bound, dtype=jnp.float32)
        b_ih = jax.random.uniform(k3, (4 * hidden_size,),
                                  minval=-bound, maxval=bound, dtype=jnp.float32)
        b_hh = jax.random.uniform(k4, (4 * hidden_size,),
                                  minval=-bound, maxval=bound, dtype=jnp.float32)
        params["lstm"].append((w_ih, w_hh, b_ih, b_hh))
    key, k5, k6 = jax.random.split(key, 3)
    params["fc_w"] = jax.random.uniform(k5, (output_size, hidden_size),
                                        minval=-bound, maxval=bound,
                                        dtype=jnp.float32)
    params["fc_b"] = jax.random.uniform(k6, (output_size,),
                                        minval=-bound, maxval=bound,
                                        dtype=jnp.float32)
    return params


if __name__ == "__main__":
    input_size, hidden_size, num_layers, output_size = 16, 32, 2, 16
    batch, seq = 2, 8

    key = jax.random.PRNGKey(0)
    key, kx, kh, kc = jax.random.split(key, 4)
    x = jax.random.normal(kx, (batch, seq, input_size), dtype=jnp.float32)
    # Non-zero initial state exercises the h0/c0 plumbing.
    h0 = 0.1 * jax.random.normal(kh, (num_layers, batch, hidden_size),
                                 dtype=jnp.float32)
    c0 = 0.1 * jax.random.normal(kc, (num_layers, batch, hidden_size),
                                 dtype=jnp.float32)
    params = init_params(key, input_size, hidden_size, num_layers, output_size)

    ref_out, (ref_h, ref_c) = reference_forward(x, (h0, c0), params)

    # Strict-precision path: f32 MXU operands everywhere.
    fwd_f32 = jax.jit(functools.partial(generative_lstm_forward,
                                        mxu_dtype=jnp.float32))
    out, (h_n, c_n) = fwd_f32(x, (h0, c0), params)
    jax.block_until_ready((out, h_n, c_n))
    assert out.shape == (batch, seq, output_size)
    assert h_n.shape == (num_layers, batch, hidden_size)
    assert c_n.shape == (num_layers, batch, hidden_size)
    assert jnp.allclose(out, ref_out, atol=1e-4, rtol=1e-4)
    assert jnp.allclose(h_n, ref_h, atol=1e-4, rtol=1e-4)
    assert jnp.allclose(c_n, ref_c, atol=1e-4, rtol=1e-4)

    # Default fast path: bf16 MXU operands / bf16 gx; gate math & state in f32.
    fwd_bf16 = jax.jit(generative_lstm_forward)
    out_bf, (h_bf, c_bf) = fwd_bf16(x, (h0, c0), params)
    jax.block_until_ready((out_bf, h_bf, c_bf))
    assert jnp.allclose(out_bf, ref_out, atol=5e-2, rtol=5e-2)
    assert jnp.allclose(h_bf, ref_h, atol=5e-2, rtol=5e-2)
    assert jnp.allclose(c_bf, ref_c, atol=5e-2, rtol=5e-2)

    print("KERNEL_OK")
</pallas_src>

<mosaic_0001>
module attributes {stable_mosaic.version = 11 : i64} {
  func.func @_proj_kernel(%arg0: i32, %arg1: i32, %arg2: memref<64x16xf32, #tpu.memory_space<vmem>>, %arg3: memref<16x512xf32, #tpu.memory_space<vmem>>, %arg4: memref<1x512xf32, #tpu.memory_space<vmem>>, %arg5: memref<64x512xf32, #tpu.memory_space<vmem>>) attributes {dimension_semantics = [#tpu.dimension_semantics<parallel>, #tpu.dimension_semantics<parallel>], iteration_bounds = array<i64: 1, 1>, scalar_prefetch = 0 : i64, scratch_operands = 0 : i64, tpu.core_type = #tpu.core_type<tc>, window_params = [{transform_indices = @transform_0, window_bounds = array<i64: 64, 16>}, {transform_indices = @transform_1, window_bounds = array<i64: 16, 512>}, {transform_indices = @transform_2, window_bounds = array<i64: 1, 512>}, {transform_indices = @transform_3, window_bounds = array<i64: 64, 512>}]} {
    %c0 = arith.constant 0 : index
    %c0_0 = arith.constant 0 : index
    %0 = vector.load %arg2[%c0, %c0_0] : memref<64x16xf32, #tpu.memory_space<vmem>>, vector<64x16xf32>
    %c0_1 = arith.constant 0 : index
    %c0_2 = arith.constant 0 : index
    %1 = vector.load %arg3[%c0_1, %c0_2] : memref<16x512xf32, #tpu.memory_space<vmem>>, vector<16x512xf32>
    %cst = arith.constant dense<0.000000e+00> : vector<64x512xf32>
    %2 = tpu.matmul %0, %1, %cst {dimension_numbers = #tpu.dot_dimension_numbers<[1], [0], [0], [1], [0, 0, 1, 1], [], []>} : vector<64x16xf32>, vector<16x512xf32>, vector<64x512xf32> -> vector<64x512xf32>
    %c0_3 = arith.constant 0 : index
    %c0_4 = arith.constant 0 : index
    %3 = vector.load %arg4[%c0_3, %c0_4] : memref<1x512xf32, #tpu.memory_space<vmem>>, vector<1x512xf32>
    %4 = vector.broadcast %3 : vector<1x512xf32> to vector<64x512xf32>
    %5 = arith.addf %2, %4 : vector<64x512xf32>
    %c0_5 = arith.constant 0 : index
    %c0_6 = arith.constant 0 : index
    %6 = vector.load %arg5[%c0_5, %c0_6] : memref<64x512xf32, #tpu.memory_space<vmem>>, vector<64x512xf32>
    tpu.vector_store %arg5[%c0_5, %c0_6], %5 {strides = array<i32>} : memref<64x512xf32, #tpu.memory_space<vmem>>, vector<64x512xf32>,
    return
  }
  func.func @transform_0(%arg0: i32, %arg1: i32) -> (i32, i32) {
    %c0_i32 = arith.constant 0 : i32
    %c0_i32_0 = arith.constant 0 : i32
    return %arg0, %c0_i32 : i32, i32
  }
  func.func @transform_1(%arg0: i32, %arg1: i32) -> (i32, i32) {
    %c0_i32 = arith.constant 0 : i32
    %c0_i32_0 = arith.constant 0 : i32
    return %c0_i32, %arg1 : i32, i32
  }
  func.func @transform_2(%arg0: i32, %arg1: i32) -> (i32, i32) {
    %c0_i32 = arith.constant 0 : i32
    %c0_i32_0 = arith.constant 0 : i32
    return %c0_i32, %arg1 : i32, i32
  }
  func.func @transform_3(%arg0: i32, %arg1: i32) -> (i32, i32) {
    %c0_i32 = arith.constant 0 : i32
    return %arg0, %arg1 : i32, i32
  }
}

module attributes {stable_mosaic.version = 11 : i64} {
  func.func @_lstm_rec_kernel(%arg0: i32, %arg1: i32, %arg2: memref<8x8x512xf32, #tpu.memory_space<vmem>>, %arg3: memref<8x128xf32, #tpu.memory_space<vmem>>, %arg4: memref<8x128xf32, #tpu.memory_space<vmem>>, %arg5: memref<128x512xf32, #tpu.memory_space<vmem>>, %arg6: memref<128x512xf32, #tpu.memory_space<vmem>>, %arg7: memref<1x512xf32, #tpu.memory_space<vmem>>, %arg8: memref<8x8x512xf32, #tpu.memory_space<vmem>>, %arg9: memref<8x128xf32, #tpu.memory_space<vmem>>, %arg10: memref<8x128xf32, #tpu.memory_space<vmem>>, %arg11: memref<8x128xf32, #tpu.memory_space<vmem>>, %arg12: memref<8x128xf32, #tpu.memory_space<vmem>>, %arg13: memref<8x8x128xf32, #tpu.memory_space<vmem>>) attributes {dimension_semantics = [#tpu.dimension_semantics<parallel>, #tpu.dimension_semantics<arbitrary>], iteration_bounds = array<i64: 1, 1>, scalar_prefetch = 0 : i64, scratch_operands = 3 : i64, tpu.core_type = #tpu.core_type<tc>, window_params = [{transform_indices = @transform_0, window_bounds = array<i64: 8, 8, 512>}, {transform_indices = @transform_1, window_bounds = array<i64: 8, 128>}, {transform_indices = @transform_2, window_bounds = array<i64: 8, 128>}, {pipeline_mode = #tpu.pipeline_mode<synchronous>, transform_indices = @transform_3, window_bounds = array<i64: 128, 512>}, {pipeline_mode = #tpu.pipeline_mode<synchronous>, transform_indices = @transform_4, window_bounds = array<i64: 128, 512>}, {pipeline_mode = #tpu.pipeline_mode<synchronous>, transform_indices = @transform_5, window_bounds = array<i64: 1, 512>}, {transform_indices = @transform_6, window_bounds = array<i64: 8, 8, 512>}, {transform_indices = @transform_7, window_bounds = array<i64: 8, 128>}, {transform_indices = @transform_8, window_bounds = array<i64: 8, 128>}]} {
    %c0_i32 = arith.constant 0 : i32
    %0 = arith.cmpi eq, %arg1, %c0_i32 : i32
    %1 = arith.extui %0 : i1 to i32
    %c0_i32_0 = arith.constant 0 : i32
    %2 = arith.cmpi ne, %1, %c0_i32_0 : i32
    scf.if %2 {
      %c0_16 = arith.constant 0 : index
      %c0_17 = arith.constant 0 : index
      %17 = vector.load %arg3[%c0_16, %c0_17] : memref<8x128xf32, #tpu.memory_space<vmem>>, vector<8x128xf32>
      %c0_18 = arith.constant 0 : index
      %c0_19 = arith.constant 0 : index
      %18 = vector.load %arg11[%c0_18, %c0_19] : memref<8x128xf32, #tpu.memory_space<vmem>>, vector<8x128xf32>
      tpu.vector_store %arg11[%c0_18, %c0_19], %17 {strides = array<i32>} : memref<8x128xf32, #tpu.memory_space<vmem>>, vector<8x128xf32>,
      %c0_20 = arith.constant 0 : index
      %c0_21 = arith.constant 0 : index
      %19 = vector.load %arg4[%c0_20, %c0_21] : memref<8x128xf32, #tpu.memory_space<vmem>>, vector<8x128xf32>
      %c0_22 = arith.constant 0 : index
      %c0_23 = arith.constant 0 : index
      %20 = vector.load %arg12[%c0_22, %c0_23] : memref<8x128xf32, #tpu.memory_space<vmem>>, vector<8x128xf32>
      tpu.vector_store %arg12[%c0_22, %c0_23], %19 {strides = array<i32>} : memref<8x128xf32, #tpu.memory_space<vmem>>, vector<8x128xf32>,
    } else {
    }
    %c0 = arith.constant 0 : index
    %c0_1 = arith.constant 0 : index
    %3 = vector.load %arg5[%c0, %c0_1] : memref<128x512xf32, #tpu.memory_space<vmem>>, vector<128x512xf32>
    %c0_i32_2 = arith.constant 0 : i32
    %c2_i32 = arith.constant 2 : i32
    %4 = arith.addi %c0_i32_2, %c2_i32 : i32
    %c1_i32 = arith.constant 1 : i32
    scf.for %arg14 = %c0_i32_2 to %4 step %c1_i32  : i32 {
      %c4_i32 = arith.constant 4 : i32
      %17 = arith.muli %arg14, %c4_i32 : i32
      %c0_i32_16 = arith.constant 0 : i32
      %18 = arith.addi %17, %c0_i32_16 : i32
      %c0_17 = arith.constant 0 : index
      %c0_18 = arith.constant 0 : index
      %19 = vector.load %arg11[%c0_17, %c0_18] : memref<8x128xf32, #tpu.memory_space<vmem>>, vector<8x128xf32>
      %c0_19 = arith.constant 0 : index
      %c0_20 = arith.constant 0 : index
      %20 = vector.load %arg12[%c0_19, %c0_20] : memref<8x128xf32, #tpu.memory_space<vmem>>, vector<8x128xf32>
      %21 = arith.index_cast %18 : i32 to index
      %c0_21 = arith.constant 0 : index
      %c0_22 = arith.constant 0 : index
      %22 = vector.load %arg2[%21, %c0_21, %c0_22] : memref<8x8x512xf32, #tpu.memory_space<vmem>>, vector<1x8x512xf32>
      %23 = vector.shape_cast %22 : vector<1x8x512xf32> to vector<8x512xf32>
      %cst_23 = arith.constant dense<0.000000e+00> : vector<8x512xf32>
      %24 = tpu.matmul %19, %3, %cst_23 {dimension_numbers = #tpu.dot_dimension_numbers<[1], [0], [0], [1], [0, 0, 1, 1], [], []>} : vector<8x128xf32>, vector<128x512xf32>, vector<8x512xf32> -> vector<8x512xf32>
      %25 = arith.addf %23, %24 : vector<8x512xf32>
      %26 = math.tanh %25 : vector<8x512xf32>
      %27 = vector.extract_strided_slice %26 {offsets = [0, 0], sizes = [8, 128], strides = [1, 1]} : vector<8x512xf32> to vector<8x128xf32>
      %cst_24 = arith.constant 5.000000e-01 : f32
      %28 = vector.broadcast %cst_24 : f32 to vector<8x128xf32>
      %29 = arith.mulf %28, %27 : vector<8x128xf32>
      %cst_25 = arith.constant 5.000000e-01 : f32
      %30 = vector.broadcast %cst_25 : f32 to vector<8x128xf32>
      %31 = arith.addf %30, %29 : vector<8x128xf32>
      %32 = vector.extract_strided_slice %26 {offsets = [0, 128], sizes = [8, 128], strides = [1, 1]} : vector<8x512xf32> to vector<8x128xf32>
      %cst_26 = arith.constant 5.000000e-01 : f32
      %33 = vector.broadcast %cst_26 : f32 to vector<8x128xf32>
      %34 = arith.mulf %33, %32 : vector<8x128xf32>
      %cst_27 = arith.constant 5.000000e-01 : f32
      %35 = vector.broadcast %cst_27 : f32 to vector<8x128xf32>
      %36 = arith.addf %35, %34 : vector<8x128xf32>
      %37 = vector.extract_strided_slice %26 {offsets = [0, 256], sizes = [8, 128], strides = [1, 1]} : vector<8x512xf32> to vector<8x128xf32>
      %38 = vector.extract_strided_slice %26 {offsets = [0, 384], sizes = [8, 128], strides = [1, 1]} : vector<8x512xf32> to vector<8x128xf32>
      %cst_28 = arith.constant 5.000000e-01 : f32
      %39 = vector.broadcast %cst_28 : f32 to vector<8x128xf32>
      %40 = arith.mulf %39, %38 : vector<8x128xf32>
      %cst_29 = arith.constant 5.000000e-01 : f32
      %41 = vector.broadcast %cst_29 : f32 to vector<8x128xf32>
      %42 = arith.addf %41, %40 : vector<8x128xf32>
      %43 = arith.mulf %36, %20 : vector<8x128xf32>
      %44 = arith.mulf %31, %37 : vector<8x128xf32>
      %45 = arith.addf %43, %44 : vector<8x128xf32>
      %46 = math.tanh %45 : vector<8x128xf32>
      %47 = arith.mulf %42, %46 : vector<8x128xf32>
      %48 = arith.index_cast %18 : i32 to index
      %c0_30 = arith.constant 0 : index
      %c0_31 = arith.constant 0 : index
      %49 = vector.load %arg13[%48, %c0_30, %c0_31] : memref<8x8x128xf32, #tpu.memory_space<vmem>>, vector<1x8x128xf32>
      %50 = vector.shape_cast %49 : vector<1x8x128xf32> to vector<8x128xf32>
      %51 = vector.shape_cast %47 : vector<8x128xf32> to vector<1x8x128xf32>
      tpu.vector_store %arg13[%48, %c0_30, %c0_31], %51 {strides = array<i32>} : memref<8x8x128xf32, #tpu.memory_space<vmem>>, vector<1x8x128xf32>,
      %c0_32 = arith.constant 0 : index
      %c0_33 = arith.constant 0 : index
      %52 = vector.load %arg12[%c0_32, %c0_33] : memref<8x128xf32, #tpu.memory_space<vmem>>, vector<8x128xf32>
      tpu.vector_store %arg12[%c0_32, %c0_33], %45 {strides = array<i32>} : memref<8x128xf32, #tpu.memory_space<vmem>>, vector<8x128xf32>,
      %c0_34 = arith.constant 0 : index
      %c0_35 = arith.constant 0 : index
      %53 = vector.load %arg11[%c0_34, %c0_35] : memref<8x128xf32, #tpu.memory_space<vmem>>, vector<8x128xf32>
      tpu.vector_store %arg11[%c0_34, %c0_35], %47 {strides = array<i32>} : memref<8x128xf32, #tpu.memory_space<vmem>>, vector<8x128xf32>,
      %c4_i32_36 = arith.constant 4 : i32
      %54 = arith.muli %arg14, %c4_i32_36 : i32
      %c1_i32_37 = arith.constant 1 : i32
      %55 = arith.addi %54, %c1_i32_37 : i32
      %c0_38 = arith.constant 0 : index
      %c0_39 = arith.constant 0 : index
      %56 = vector.load %arg11[%c0_38, %c0_39] : memref<8x128xf32, #tpu.memory_space<vmem>>, vector<8x128xf32>
      %c0_40 = arith.constant 0 : index
      %c0_41 = arith.constant 0 : index
      %57 = vector.load %arg12[%c0_40, %c0_41] : memref<8x128xf32, #tpu.memory_space<vmem>>, vector<8x128xf32>
      %58 = arith.index_cast %55 : i32 to index
      %c0_42 = arith.constant 0 : index
      %c0_43 = arith.constant 0 : index
      %59 = vector.load %arg2[%58, %c0_42, %c0_43] : memref<8x8x512xf32, #tpu.memory_space<vmem>>, vector<1x8x512xf32>
      %60 = vector.shape_cast %59 : vector<1x8x512xf32> to vector<8x512xf32>
      %cst_44 = arith.constant dense<0.000000e+00> : vector<8x512xf32>
      %61 = tpu.matmul %56, %3, %cst_44 {dimension_numbers = #tpu.dot_dimension_numbers<[1], [0], [0], [1], [0, 0, 1, 1], [], []>} : vector<8x128xf32>, vector<128x512xf32>, vector<8x512xf32> -> vector<8x512xf32>
      %62 = arith.addf %60, %61 : vector<8x512xf32>
      %63 = math.tanh %62 : vector<8x512xf32>
      %64 = vector.extract_strided_slice %63 {offsets = [0, 0], sizes = [8, 128], strides = [1, 1]} : vector<8x512xf32> to vector<8x128xf32>
      %cst_45 = arith.constant 5.000000e-01 : f32
      %65 = vector.broadcast %cst_45 : f32 to vector<8x128xf32>
      %66 = arith.mulf %65, %64 : vector<8x128xf32>
      %cst_46 = arith.constant 5.000000e-01 : f32
      %67 = vector.broadcast %cst_46 : f32 to vector<8x128xf32>
      %68 = arith.addf %67, %66 : vector<8x128xf32>
      %69 = vector.extract_strided_slice %63 {offsets = [0, 128], sizes = [8, 128], strides = [1, 1]} : vector<8x512xf32> to vector<8x128xf32>
      %cst_47 = arith.constant 5.000000e-01 : f32
      %70 = vector.broadcast %cst_47 : f32 to vector<8x128xf32>
      %71 = arith.mulf %70, %69 : vector<8x128xf32>
      %cst_48 = arith.constant 5.000000e-01 : f32
      %72 = vector.broadcast %cst_48 : f32 to vector<8x128xf32>
      %73 = arith.addf %72, %71 : vector<8x128xf32>
      %74 = vector.extract_strided_slice %63 {offsets = [0, 256], sizes = [8, 128], strides = [1, 1]} : vector<8x512xf32> to vector<8x128xf32>
      %75 = vector.extract_strided_slice %63 {offsets = [0, 384], sizes = [8, 128], strides = [1, 1]} : vector<8x512xf32> to vector<8x128xf32>
      %cst_49 = arith.constant 5.000000e-01 : f32
      %76 = vector.broadcast %cst_49 : f32 to vector<8x128xf32>
      %77 = arith.mulf %76, %75 : vector<8x128xf32>
      %cst_50 = arith.constant 5.000000e-01 : f32
      %78 = vector.broadcast %cst_50 : f32 to vector<8x128xf32>
      %79 = arith.addf %78, %77 : vector<8x128xf32>
      %80 = arith.mulf %73, %57 : vector<8x128xf32>
      %81 = arith.mulf %68, %74 : vector<8x128xf32>
      %82 = arith.addf %80, %81 : vector<8x128xf32>
      %83 = math.tanh %82 : vector<8x128xf32>
      %84 = arith.mulf %79, %83 : vector<8x128xf32>
      %85 = arith.index_cast %55 : i32 to index
      %c0_51 = arith.constant 0 : index
      %c0_52 = arith.constant 0 : index
      %86 = vector.load %arg13[%85, %c0_51, %c0_52] : memref<8x8x128xf32, #tpu.memory_space<vmem>>, vector<1x8x128xf32>
      %87 = vector.shape_cast %86 : vector<1x8x128xf32> to vector<8x128xf32>
      %88 = vector.shape_cast %84 : vector<8x128xf32> to vector<1x8x128xf32>
      tpu.vector_store %arg13[%85, %c0_51, %c0_52], %88 {strides = array<i32>} : memref<8x8x128xf32, #tpu.memory_space<vmem>>, vector<1x8x128xf32>,
      %c0_53 = arith.constant 0 : index
      %c0_54 = arith.constant 0 : index
      %89 = vector.load %arg12[%c0_53, %c0_54] : memref<8x128xf32, #tpu.memory_space<vmem>>, vector<8x128xf32>
      tpu.vector_store %arg12[%c0_53, %c0_54], %82 {strides = array<i32>} : memref<8x128xf32, #tpu.memory_space<vmem>>, vector<8x128xf32>,
      %c0_55 = arith.constant 0 : index
      %c0_56 = arith.constant 0 : index
      %90 = vector.load %arg11[%c0_55, %c0_56] : memref<8x128xf32, #tpu.memory_space<vmem>>, vector<8x128xf32>
      tpu.vector_store %arg11[%c0_55, %c0_56], %84 {strides = array<i32>} : memref<8x128xf32, #tpu.memory_space<vmem>>, vector<8x128xf32>,
      %c4_i32_57 = arith.constant 4 : i32
      %91 = arith.muli %arg14, %c4_i32_57 : i32
      %c2_i32_58 = arith.constant 2 : i32
      %92 = arith.addi %91, %c2_i32_58 : i32
      %c0_59 = arith.constant 0 : index
      %c0_60 = arith.constant 0 : index
      %93 = vector.load %arg11[%c0_59, %c0_60] : memref<8x128xf32, #tpu.memory_space<vmem>>, vector<8x128xf32>
      %c0_61 = arith.constant 0 : index
      %c0_62 = arith.constant 0 : index
      %94 = vector.load %arg12[%c0_61, %c0_62] : memref<8x128xf32, #tpu.memory_space<vmem>>, vector<8x128xf32>
      %95 = arith.index_cast %92 : i32 to index
      %c0_63 = arith.constant 0 : index
      %c0_64 = arith.constant 0 : index
      %96 = vector.load %arg2[%95, %c0_63, %c0_64] : memref<8x8x512xf32, #tpu.memory_space<vmem>>, vector<1x8x512xf32>
      %97 = vector.shape_cast %96 : vector<1x8x512xf32> to vector<8x512xf32>
      %cst_65 = arith.constant dense<0.000000e+00> : vector<8x512xf32>
      %98 = tpu.matmul %93, %3, %cst_65 {dimension_numbers = #tpu.dot_dimension_numbers<[1], [0], [0], [1], [0, 0, 1, 1], [], []>} : vector<8x128xf32>, vector<128x512xf32>, vector<8x512xf32> -> vector<8x512xf32>
      %99 = arith.addf %97, %98 : vector<8x512xf32>
      %100 = math.tanh %99 : vector<8x512xf32>
      %101 = vector.extract_strided_slice %100 {offsets = [0, 0], sizes = [8, 128], strides = [1, 1]} : vector<8x512xf32> to vector<8x128xf32>
      %cst_66 = arith.constant 5.000000e-01 : f32
      %102 = vector.broadcast %cst_66 : f32 to vector<8x128xf32>
      %103 = arith.mulf %102, %101 : vector<8x128xf32>
      %cst_67 = arith.constant 5.000000e-01 : f32
      %104 = vector.broadcast %cst_67 : f32 to vector<8x128xf32>
      %105 = arith.addf %104, %103 : vector<8x128xf32>
      %106 = vector.extract_strided_slice %100 {offsets = [0, 128], sizes = [8, 128], strides = [1, 1]} : vector<8x512xf32> to vector<8x128xf32>
      %cst_68 = arith.constant 5.000000e-01 : f32
      %107 = vector.broadcast %cst_68 : f32 to vector<8x128xf32>
      %108 = arith.mulf %107, %106 : vector<8x128xf32>
      %cst_69 = arith.constant 5.000000e-01 : f32
      %109 = vector.broadcast %cst_69 : f32 to vector<8x128xf32>
      %110 = arith.addf %109, %108 : vector<8x128xf32>
      %111 = vector.extract_strided_slice %100 {offsets = [0, 256], sizes = [8, 128], strides = [1, 1]} : vector<8x512xf32> to vector<8x128xf32>
      %112 = vector.extract_strided_slice %100 {offsets = [0, 384], sizes = [8, 128], strides = [1, 1]} : vector<8x512xf32> to vector<8x128xf32>
      %cst_70 = arith.constant 5.000000e-01 : f32
      %113 = vector.broadcast %cst_70 : f32 to vector<8x128xf32>
      %114 = arith.mulf %113, %112 : vector<8x128xf32>
      %cst_71 = arith.constant 5.000000e-01 : f32
      %115 = vector.broadcast %cst_71 : f32 to vector<8x128xf32>
      %116 = arith.addf %115, %114 : vector<8x128xf32>
      %117 = arith.mulf %110, %94 : vector<8x128xf32>
      %118 = arith.mulf %105, %111 : vector<8x128xf32>
      %119 = arith.addf %117, %118 : vector<8x128xf32>
      %120 = math.tanh %119 : vector<8x128xf32>
      %121 = arith.mulf %116, %120 : vector<8x128xf32>
      %122 = arith.index_cast %92 : i32 to index
      %c0_72 = arith.constant 0 : index
      %c0_73 = arith.constant 0 : index
      %123 = vector.load %arg13[%122, %c0_72, %c0_73] : memref<8x8x128xf32, #tpu.memory_space<vmem>>, vector<1x8x128xf32>
      %124 = vector.shape_cast %123 : vector<1x8x128xf32> to vector<8x128xf32>
      %125 = vector.shape_cast %121 : vector<8x128xf32> to vector<1x8x128xf32>
      tpu.vector_store %arg13[%122, %c0_72, %c0_73], %125 {strides = array<i32>} : memref<8x8x128xf32, #tpu.memory_space<vmem>>, vector<1x8x128xf32>,
      %c0_74 = arith.constant 0 : index
      %c0_75 = arith.constant 0 : index
      %126 = vector.load %arg12[%c0_74, %c0_75] : memref<8x128xf32, #tpu.memory_space<vmem>>, vector<8x128xf32>
      tpu.vector_store %arg12[%c0_74, %c0_75], %119 {strides = array<i32>} : memref<8x128xf32, #tpu.memory_space<vmem>>, vector<8x128xf32>,
      %c0_76 = arith.constant 0 : index
      %c0_77 = arith.constant 0 : index
      %127 = vector.load %arg11[%c0_76, %c0_77] : memref<8x128xf32, #tpu.memory_space<vmem>>, vector<8x128xf32>
      tpu.vector_store %arg11[%c0_76, %c0_77], %121 {strides = array<i32>} : memref<8x128xf32, #tpu.memory_space<vmem>>, vector<8x128xf32>,
      %c4_i32_78 = arith.constant 4 : i32
      %128 = arith.muli %arg14, %c4_i32_78 : i32
      %c3_i32 = arith.constant 3 : i32
      %129 = arith.addi %128, %c3_i32 : i32
      %c0_79 = arith.constant 0 : index
      %c0_80 = arith.constant 0 : index
      %130 = vector.load %arg11[%c0_79, %c0_80] : memref<8x128xf32, #tpu.memory_space<vmem>>, vector<8x128xf32>
      %c0_81 = arith.constant 0 : index
      %c0_82 = arith.constant 0 : index
      %131 = vector.load %arg12[%c0_81, %c0_82] : memref<8x128xf32, #tpu.memory_space<vmem>>, vector<8x128xf32>
      %132 = arith.index_cast %129 : i32 to index
      %c0_83 = arith.constant 0 : index
      %c0_84 = arith.constant 0 : index
      %133 = vector.load %arg2[%132, %c0_83, %c0_84] : memref<8x8x512xf32, #tpu.memory_space<vmem>>, vector<1x8x512xf32>
      %134 = vector.shape_cast %133 : vector<1x8x512xf32> to vector<8x512xf32>
      %cst_85 = arith.constant dense<0.000000e+00> : vector<8x512xf32>
      %135 = tpu.matmul %130, %3, %cst_85 {dimension_numbers = #tpu.dot_dimension_numbers<[1], [0], [0], [1], [0, 0, 1, 1], [], []>} : vector<8x128xf32>, vector<128x512xf32>, vector<8x512xf32> -> vector<8x512xf32>
      %136 = arith.addf %134, %135 : vector<8x512xf32>
      %137 = math.tanh %136 : vector<8x512xf32>
      %138 = vector.extract_strided_slice %137 {offsets = [0, 0], sizes = [8, 128], strides = [1, 1]} : vector<8x512xf32> to vector<8x128xf32>
      %cst_86 = arith.constant 5.000000e-01 : f32
      %139 = vector.broadcast %cst_86 : f32 to vector<8x128xf32>
      %140 = arith.mulf %139, %138 : vector<8x128xf32>
      %cst_87 = arith.constant 5.000000e-01 : f32
      %141 = vector.broadcast %cst_87 : f32 to vector<8x128xf32>
      %142 = arith.addf %141, %140 : vector<8x128xf32>
      %143 = vector.extract_strided_slice %137 {offsets = [0, 128], sizes = [8, 128], strides = [1, 1]} : vector<8x512xf32> to vector<8x128xf32>
      %cst_88 = arith.constant 5.000000e-01 : f32
      %144 = vector.broadcast %cst_88 : f32 to vector<8x128xf32>
      %145 = arith.mulf %144, %143 : vector<8x128xf32>
      %cst_89 = arith.constant 5.000000e-01 : f32
      %146 = vector.broadcast %cst_89 : f32 to vector<8x128xf32>
      %147 = arith.addf %146, %145 : vector<8x128xf32>
      %148 = vector.extract_strided_slice %137 {offsets = [0, 256], sizes = [8, 128], strides = [1, 1]} : vector<8x512xf32> to vector<8x128xf32>
      %149 = vector.extract_strided_slice %137 {offsets = [0, 384], sizes = [8, 128], strides = [1, 1]} : vector<8x512xf32> to vector<8x128xf32>
      %cst_90 = arith.constant 5.000000e-01 : f32
      %150 = vector.broadcast %cst_90 : f32 to vector<8x128xf32>
      %151 = arith.mulf %150, %149 : vector<8x128xf32>
      %cst_91 = arith.constant 5.000000e-01 : f32
      %152 = vector.broadcast %cst_91 : f32 to vector<8x128xf32>
      %153 = arith.addf %152, %151 : vector<8x128xf32>
      %154 = arith.mulf %147, %131 : vector<8x128xf32>
      %155 = arith.mulf %142, %148 : vector<8x128xf32>
      %156 = arith.addf %154, %155 : vector<8x128xf32>
      %157 = math.tanh %156 : vector<8x128xf32>
      %158 = arith.mulf %153, %157 : vector<8x128xf32>
      %159 = arith.index_cast %129 : i32 to index
      %c0_92 = arith.constant 0 : index
      %c0_93 = arith.constant 0 : index
      %160 = vector.load %arg13[%159, %c0_92, %c0_93] : memref<8x8x128xf32, #tpu.memory_space<vmem>>, vector<1x8x128xf32>
      %161 = vector.shape_cast %160 : vector<1x8x128xf32> to vector<8x128xf32>
      %162 = vector.shape_cast %158 : vector<8x128xf32> to vector<1x8x128xf32>
      tpu.vector_store %arg13[%159, %c0_92, %c0_93], %162 {strides = array<i32>} : memref<8x8x128xf32, #tpu.memory_space<vmem>>, vector<1x8x128xf32>,
      %c0_94 = arith.constant 0 : index
      %c0_95 = arith.constant 0 : index
      %163 = vector.load %arg12[%c0_94, %c0_95] : memref<8x128xf32, #tpu.memory_space<vmem>>, vector<8x128xf32>
      tpu.vector_store %arg12[%c0_94, %c0_95], %156 {strides = array<i32>} : memref<8x128xf32, #tpu.memory_space<vmem>>, vector<8x128xf32>,
      %c0_96 = arith.constant 0 : index
      %c0_97 = arith.constant 0 : index
      %164 = vector.load %arg11[%c0_96, %c0_97] : memref<8x128xf32, #tpu.memory_space<vmem>>, vector<8x128xf32>
      tpu.vector_store %arg11[%c0_96, %c0_97], %158 {strides = array<i32>} : memref<8x128xf32, #tpu.memory_space<vmem>>, vector<8x128xf32>,
    }
    %c2_i32_3 = arith.constant 2 : i32
    %c0_4 = arith.constant 0 : index
    %c0_5 = arith.constant 0 : index
    %c0_6 = arith.constant 0 : index
    %5 = vector.load %arg13[%c0_4, %c0_5, %c0_6] : memref<8x8x128xf32, #tpu.memory_space<vmem>>, vector<8x8x128xf32>
    %6 = vector.shape_cast %5 : vector<8x8x128xf32> to vector<64x128xf32>
    %c0_7 = arith.constant 0 : index
    %c0_8 = arith.constant 0 : index
    %7 = vector.load %arg6[%c0_7, %c0_8] : memref<128x512xf32, #tpu.memory_space<vmem>>, vector<128x512xf32>
    %cst = arith.constant dense<0.000000e+00> : vector<64x512xf32>
    %8 = tpu.matmul %6, %7, %cst {dimension_numbers = #tpu.dot_dimension_numbers<[1], [0], [0], [1], [0, 0, 1, 1], [], []>} : vector<64x128xf32>, vector<128x512xf32>, vector<64x512xf32> -> vector<64x512xf32>
    %c0_9 = arith.constant 0 : index
    %c0_10 = arith.constant 0 : index
    %9 = vector.load %arg7[%c0_9, %c0_10] : memref<1x512xf32, #tpu.memory_space<vmem>>, vector<1x512xf32>
    %10 = vector.broadcast %9 : vector<1x512xf32> to vector<64x512xf32>
    %11 = arith.addf %8, %10 : vector<64x512xf32>
    %12 = vector.shape_cast %11 : vector<64x512xf32> to vector<8x8x512xf32>
    %c0_11 = arith.constant 0 : index
    %c0_12 = arith.constant 0 : index
    %c0_13 = arith.constant 0 : index
    %13 = vector.load %arg8[%c0_11, %c0_12, %c0_13] : memref<8x8x512xf32, #tpu.memory_space<vmem>>, vector<8x8x512xf32>
    tpu.vector_store %arg8[%c0_11, %c0_12, %c0_13], %12 {strides = array<i32>} : memref<8x8x512xf32, #tpu.memory_space<vmem>>, vector<8x8x512xf32>,
    %c0_i32_14 = arith.constant 0 : i32
    %14 = arith.cmpi eq, %arg1, %c0_i32_14 : i32
    %15 = arith.extui %14 : i1 to i32
    %c0_i32_15 = arith.constant 0 : i32
    %16 = arith.cmpi ne, %15, %c0_i32_15 : i32
    scf.if %16 {
      %c0_16 = arith.constant 0 : index
      %c0_17 = arith.constant 0 : index
      %17 = vector.load %arg11[%c0_16, %c0_17] : memref<8x128xf32, #tpu.memory_space<vmem>>, vector<8x128xf32>
      %c0_18 = arith.constant 0 : index
      %c0_19 = arith.constant 0 : index
      %18 = vector.load %arg9[%c0_18, %c0_19] : memref<8x128xf32, #tpu.memory_space<vmem>>, vector<8x128xf32>
      tpu.vector_store %arg9[%c0_18, %c0_19], %17 {strides = array<i32>} : memref<8x128xf32, #tpu.memory_space<vmem>>, vector<8x128xf32>,
      %c0_20 = arith.constant 0 : index
      %c0_21 = arith.constant 0 : index
      %19 = vector.load %arg12[%c0_20, %c0_21] : memref<8x128xf32, #tpu.memory_space<vmem>>, vector<8x128xf32>
      %c0_22 = arith.constant 0 : index
      %c0_23 = arith.constant 0 : index
      %20 = vector.load %arg10[%c0_22, %c0_23] : memref<8x128xf32, #tpu.memory_space<vmem>>, vector<8x128xf32>
      tpu.vector_store %arg10[%c0_22, %c0_23], %19 {strides = array<i32>} : memref<8x128xf32, #tpu.memory_space<vmem>>, vector<8x128xf32>,
    } else {
    }
    return
  }
  func.func @transform_0(%arg0: i32, %arg1: i32) -> (i32, i32, i32) {
    %c0_i32 = arith.constant 0 : i32
    %c0_i32_0 = arith.constant 0 : i32
    return %arg1, %arg0, %c0_i32 : i32, i32, i32
  }
  func.func @transform_1(%arg0: i32, %arg1: i32) -> (i32, i32) {
    %c0_i32 = arith.constant 0 : i32
    %c0_i32_0 = arith.constant 0 : i32
    return %arg0, %c0_i32 : i32, i32
  }
  func.func @transform_2(%arg0: i32, %arg1: i32) -> (i32, i32) {
    %c0_i32 = arith.constant 0 : i32
    %c0_i32_0 = arith.constant 0 : i32
    return %arg0, %c0_i32 : i32, i32
  }
  func.func @transform_3(%arg0: i32, %arg1: i32) -> (i32, i32) {
    %c0_i32 = arith.constant 0 : i32
    %c0_i32_0 = arith.constant 0 : i32
    %c0_i32_1 = arith.constant 0 : i32
    return %c0_i32, %c0_i32_0 : i32, i32
  }
  func.func @transform_4(%arg0: i32, %arg1: i32) -> (i32, i32) {
    %c0_i32 = arith.constant 0 : i32
    %c0_i32_0 = arith.constant 0 : i32
    %c0_i32_1 = arith.constant 0 : i32
    return %c0_i32, %c0_i32_0 : i32, i32
  }
  func.func @transform_5(%arg0: i32, %arg1: i32) -> (i32, i32) {
    %c0_i32 = arith.constant 0 : i32
    %c0_i32_0 = arith.constant 0 : i32
    %c0_i32_1 = arith.constant 0 : i32
    return %c0_i32, %c0_i32_0 : i32, i32
  }
  func.func @transform_6(%arg0: i32, %arg1: i32) -> (i32, i32, i32) {
    %c0_i32 = arith.constant 0 : i32
    %c0_i32_0 = arith.constant 0 : i32
    return %arg1, %arg0, %c0_i32 : i32, i32, i32
  }
  func.func @transform_7(%arg0: i32, %arg1: i32) -> (i32, i32) {
    %c0_i32 = arith.constant 0 : i32
    %c0_i32_0 = arith.constant 0 : i32
    return %arg0, %c0_i32 : i32, i32
  }
  func.func @transform_8(%arg0: i32, %arg1: i32) -> (i32, i32) {
    %c0_i32 = arith.constant 0 : i32
    %c0_i32_0 = arith.constant 0 : i32
    return %arg0, %c0_i32 : i32, i32
  }
}

module attributes {stable_mosaic.version = 11 : i64} {
  func.func @_lstm_rec_kernel(%arg0: i32, %arg1: i32, %arg2: memref<8x8x512xf32, #tpu.memory_space<vmem>>, %arg3: memref<8x128xf32, #tpu.memory_space<vmem>>, %arg4: memref<8x128xf32, #tpu.memory_space<vmem>>, %arg5: memref<128x512xf32, #tpu.memory_space<vmem>>, %arg6: memref<128x128xf32, #tpu.memory_space<vmem>>, %arg7: memref<1x128xf32, #tpu.memory_space<vmem>>, %arg8: memref<8x8x128xf32, #tpu.memory_space<vmem>>, %arg9: memref<8x128xf32, #tpu.memory_space<vmem>>, %arg10: memref<8x128xf32, #tpu.memory_space<vmem>>, %arg11: memref<8x128xf32, #tpu.memory_space<vmem>>, %arg12: memref<8x128xf32, #tpu.memory_space<vmem>>, %arg13: memref<8x8x128xf32, #tpu.memory_space<vmem>>) attributes {dimension_semantics = [#tpu.dimension_semantics<parallel>, #tpu.dimension_semantics<arbitrary>], iteration_bounds = array<i64: 1, 1>, scalar_prefetch = 0 : i64, scratch_operands = 3 : i64, tpu.core_type = #tpu.core_type<tc>, window_params = [{transform_indices = @transform_0, window_bounds = array<i64: 8, 8, 512>}, {transform_indices = @transform_1, window_bounds = array<i64: 8, 128>}, {transform_indices = @transform_2, window_bounds = array<i64: 8, 128>}, {pipeline_mode = #tpu.pipeline_mode<synchronous>, transform_indices = @transform_3, window_bounds = array<i64: 128, 512>}, {pipeline_mode = #tpu.pipeline_mode<synchronous>, transform_indices = @transform_4, window_bounds = array<i64: 128, 128>}, {pipeline_mode = #tpu.pipeline_mode<synchronous>, transform_indices = @transform_5, window_bounds = array<i64: 1, 128>}, {transform_indices = @transform_6, window_bounds = array<i64: 8, 8, 128>}, {transform_indices = @transform_7, window_bounds = array<i64: 8, 128>}, {transform_indices = @transform_8, window_bounds = array<i64: 8, 128>}]} {
    %c0_i32 = arith.constant 0 : i32
    %0 = arith.cmpi eq, %arg1, %c0_i32 : i32
    %1 = arith.extui %0 : i1 to i32
    %c0_i32_0 = arith.constant 0 : i32
    %2 = arith.cmpi ne, %1, %c0_i32_0 : i32
    scf.if %2 {
      %c0_16 = arith.constant 0 : index
      %c0_17 = arith.constant 0 : index
      %17 = vector.load %arg3[%c0_16, %c0_17] : memref<8x128xf32, #tpu.memory_space<vmem>>, vector<8x128xf32>
      %c0_18 = arith.constant 0 : index
      %c0_19 = arith.constant 0 : index
      %18 = vector.load %arg11[%c0_18, %c0_19] : memref<8x128xf32, #tpu.memory_space<vmem>>, vector<8x128xf32>
      tpu.vector_store %arg11[%c0_18, %c0_19], %17 {strides = array<i32>} : memref<8x128xf32, #tpu.memory_space<vmem>>, vector<8x128xf32>,
      %c0_20 = arith.constant 0 : index
      %c0_21 = arith.constant 0 : index
      %19 = vector.load %arg4[%c0_20, %c0_21] : memref<8x128xf32, #tpu.memory_space<vmem>>, vector<8x128xf32>
      %c0_22 = arith.constant 0 : index
      %c0_23 = arith.constant 0 : index
      %20 = vector.load %arg12[%c0_22, %c0_23] : memref<8x128xf32, #tpu.memory_space<vmem>>, vector<8x128xf32>
      tpu.vector_store %arg12[%c0_22, %c0_23], %19 {strides = array<i32>} : memref<8x128xf32, #tpu.memory_space<vmem>>, vector<8x128xf32>,
    } else {
    }
    %c0 = arith.constant 0 : index
    %c0_1 = arith.constant 0 : index
    %3 = vector.load %arg5[%c0, %c0_1] : memref<128x512xf32, #tpu.memory_space<vmem>>, vector<128x512xf32>
    %c0_i32_2 = arith.constant 0 : i32
    %c2_i32 = arith.constant 2 : i32
    %4 = arith.addi %c0_i32_2, %c2_i32 : i32
    %c1_i32 = arith.constant 1 : i32
    scf.for %arg14 = %c0_i32_2 to %4 step %c1_i32  : i32 {
      %c4_i32 = arith.constant 4 : i32
      %17 = arith.muli %arg14, %c4_i32 : i32
      %c0_i32_16 = arith.constant 0 : i32
      %18 = arith.addi %17, %c0_i32_16 : i32
      %c0_17 = arith.constant 0 : index
      %c0_18 = arith.constant 0 : index
      %19 = vector.load %arg11[%c0_17, %c0_18] : memref<8x128xf32, #tpu.memory_space<vmem>>, vector<8x128xf32>
      %c0_19 = arith.constant 0 : index
      %c0_20 = arith.constant 0 : index
      %20 = vector.load %arg12[%c0_19, %c0_20] : memref<8x128xf32, #tpu.memory_space<vmem>>, vector<8x128xf32>
      %21 = arith.index_cast %18 : i32 to index
      %c0_21 = arith.constant 0 : index
      %c0_22 = arith.constant 0 : index
      %22 = vector.load %arg2[%21, %c0_21, %c0_22] : memref<8x8x512xf32, #tpu.memory_space<vmem>>, vector<1x8x512xf32>
      %23 = vector.shape_cast %22 : vector<1x8x512xf32> to vector<8x512xf32>
      %cst_23 = arith.constant dense<0.000000e+00> : vector<8x512xf32>
      %24 = tpu.matmul %19, %3, %cst_23 {dimension_numbers = #tpu.dot_dimension_numbers<[1], [0], [0], [1], [0, 0, 1, 1], [], []>} : vector<8x128xf32>, vector<128x512xf32>, vector<8x512xf32> -> vector<8x512xf32>
      %25 = arith.addf %23, %24 : vector<8x512xf32>
      %26 = math.tanh %25 : vector<8x512xf32>
      %27 = vector.extract_strided_slice %26 {offsets = [0, 0], sizes = [8, 128], strides = [1, 1]} : vector<8x512xf32> to vector<8x128xf32>
      %cst_24 = arith.constant 5.000000e-01 : f32
      %28 = vector.broadcast %cst_24 : f32 to vector<8x128xf32>
      %29 = arith.mulf %28, %27 : vector<8x128xf32>
      %cst_25 = arith.constant 5.000000e-01 : f32
      %30 = vector.broadcast %cst_25 : f32 to vector<8x128xf32>
      %31 = arith.addf %30, %29 : vector<8x128xf32>
      %32 = vector.extract_strided_slice %26 {offsets = [0, 128], sizes = [8, 128], strides = [1, 1]} : vector<8x512xf32> to vector<8x128xf32>
      %cst_26 = arith.constant 5.000000e-01 : f32
      %33 = vector.broadcast %cst_26 : f32 to vector<8x128xf32>
      %34 = arith.mulf %33, %32 : vector<8x128xf32>
      %cst_27 = arith.constant 5.000000e-01 : f32
      %35 = vector.broadcast %cst_27 : f32 to vector<8x128xf32>
      %36 = arith.addf %35, %34 : vector<8x128xf32>
      %37 = vector.extract_strided_slice %26 {offsets = [0, 256], sizes = [8, 128], strides = [1, 1]} : vector<8x512xf32> to vector<8x128xf32>
      %38 = vector.extract_strided_slice %26 {offsets = [0, 384], sizes = [8, 128], strides = [1, 1]} : vector<8x512xf32> to vector<8x128xf32>
      %cst_28 = arith.constant 5.000000e-01 : f32
      %39 = vector.broadcast %cst_28 : f32 to vector<8x128xf32>
      %40 = arith.mulf %39, %38 : vector<8x128xf32>
      %cst_29 = arith.constant 5.000000e-01 : f32
      %41 = vector.broadcast %cst_29 : f32 to vector<8x128xf32>
      %42 = arith.addf %41, %40 : vector<8x128xf32>
      %43 = arith.mulf %36, %20 : vector<8x128xf32>
      %44 = arith.mulf %31, %37 : vector<8x128xf32>
      %45 = arith.addf %43, %44 : vector<8x128xf32>
      %46 = math.tanh %45 : vector<8x128xf32>
      %47 = arith.mulf %42, %46 : vector<8x128xf32>
      %48 = arith.index_cast %18 : i32 to index
      %c0_30 = arith.constant 0 : index
      %c0_31 = arith.constant 0 : index
      %49 = vector.load %arg13[%48, %c0_30, %c0_31] : memref<8x8x128xf32, #tpu.memory_space<vmem>>, vector<1x8x128xf32>
      %50 = vector.shape_cast %49 : vector<1x8x128xf32> to vector<8x128xf32>
      %51 = vector.shape_cast %47 : vector<8x128xf32> to vector<1x8x128xf32>
      tpu.vector_store %arg13[%48, %c0_30, %c0_31], %51 {strides = array<i32>} : memref<8x8x128xf32, #tpu.memory_space<vmem>>, vector<1x8x128xf32>,
      %c0_32 = arith.constant 0 : index
      %c0_33 = arith.constant 0 : index
      %52 = vector.load %arg12[%c0_32, %c0_33] : memref<8x128xf32, #tpu.memory_space<vmem>>, vector<8x128xf32>
      tpu.vector_store %arg12[%c0_32, %c0_33], %45 {strides = array<i32>} : memref<8x128xf32, #tpu.memory_space<vmem>>, vector<8x128xf32>,
      %c0_34 = arith.constant 0 : index
      %c0_35 = arith.constant 0 : index
      %53 = vector.load %arg11[%c0_34, %c0_35] : memref<8x128xf32, #tpu.memory_space<vmem>>, vector<8x128xf32>
      tpu.vector_store %arg11[%c0_34, %c0_35], %47 {strides = array<i32>} : memref<8x128xf32, #tpu.memory_space<vmem>>, vector<8x128xf32>,
      %c4_i32_36 = arith.constant 4 : i32
      %54 = arith.muli %arg14, %c4_i32_36 : i32
      %c1_i32_37 = arith.constant 1 : i32
      %55 = arith.addi %54, %c1_i32_37 : i32
      %c0_38 = arith.constant 0 : index
      %c0_39 = arith.constant 0 : index
      %56 = vector.load %arg11[%c0_38, %c0_39] : memref<8x128xf32, #tpu.memory_space<vmem>>, vector<8x128xf32>
      %c0_40 = arith.constant 0 : index
      %c0_41 = arith.constant 0 : index
      %57 = vector.load %arg12[%c0_40, %c0_41] : memref<8x128xf32, #tpu.memory_space<vmem>>, vector<8x128xf32>
      %58 = arith.index_cast %55 : i32 to index
      %c0_42 = arith.constant 0 : index
      %c0_43 = arith.constant 0 : index
      %59 = vector.load %arg2[%58, %c0_42, %c0_43] : memref<8x8x512xf32, #tpu.memory_space<vmem>>, vector<1x8x512xf32>
      %60 = vector.shape_cast %59 : vector<1x8x512xf32> to vector<8x512xf32>
      %cst_44 = arith.constant dense<0.000000e+00> : vector<8x512xf32>
      %61 = tpu.matmul %56, %3, %cst_44 {dimension_numbers = #tpu.dot_dimension_numbers<[1], [0], [0], [1], [0, 0, 1, 1], [], []>} : vector<8x128xf32>, vector<128x512xf32>, vector<8x512xf32> -> vector<8x512xf32>
      %62 = arith.addf %60, %61 : vector<8x512xf32>
      %63 = math.tanh %62 : vector<8x512xf32>
      %64 = vector.extract_strided_slice %63 {offsets = [0, 0], sizes = [8, 128], strides = [1, 1]} : vector<8x512xf32> to vector<8x128xf32>
      %cst_45 = arith.constant 5.000000e-01 : f32
      %65 = vector.broadcast %cst_45 : f32 to vector<8x128xf32>
      %66 = arith.mulf %65, %64 : vector<8x128xf32>
      %cst_46 = arith.constant 5.000000e-01 : f32
      %67 = vector.broadcast %cst_46 : f32 to vector<8x128xf32>
      %68 = arith.addf %67, %66 : vector<8x128xf32>
      %69 = vector.extract_strided_slice %63 {offsets = [0, 128], sizes = [8, 128], strides = [1, 1]} : vector<8x512xf32> to vector<8x128xf32>
      %cst_47 = arith.constant 5.000000e-01 : f32
      %70 = vector.broadcast %cst_47 : f32 to vector<8x128xf32>
      %71 = arith.mulf %70, %69 : vector<8x128xf32>
      %cst_48 = arith.constant 5.000000e-01 : f32
      %72 = vector.broadcast %cst_48 : f32 to vector<8x128xf32>
      %73 = arith.addf %72, %71 : vector<8x128xf32>
      %74 = vector.extract_strided_slice %63 {offsets = [0, 256], sizes = [8, 128], strides = [1, 1]} : vector<8x512xf32> to vector<8x128xf32>
      %75 = vector.extract_strided_slice %63 {offsets = [0, 384], sizes = [8, 128], strides = [1, 1]} : vector<8x512xf32> to vector<8x128xf32>
      %cst_49 = arith.constant 5.000000e-01 : f32
      %76 = vector.broadcast %cst_49 : f32 to vector<8x128xf32>
      %77 = arith.mulf %76, %75 : vector<8x128xf32>
      %cst_50 = arith.constant 5.000000e-01 : f32
      %78 = vector.broadcast %cst_50 : f32 to vector<8x128xf32>
      %79 = arith.addf %78, %77 : vector<8x128xf32>
      %80 = arith.mulf %73, %57 : vector<8x128xf32>
      %81 = arith.mulf %68, %74 : vector<8x128xf32>
      %82 = arith.addf %80, %81 : vector<8x128xf32>
      %83 = math.tanh %82 : vector<8x128xf32>
      %84 = arith.mulf %79, %83 : vector<8x128xf32>
      %85 = arith.index_cast %55 : i32 to index
      %c0_51 = arith.constant 0 : index
      %c0_52 = arith.constant 0 : index
      %86 = vector.load %arg13[%85, %c0_51, %c0_52] : memref<8x8x128xf32, #tpu.memory_space<vmem>>, vector<1x8x128xf32>
      %87 = vector.shape_cast %86 : vector<1x8x128xf32> to vector<8x128xf32>
      %88 = vector.shape_cast %84 : vector<8x128xf32> to vector<1x8x128xf32>
      tpu.vector_store %arg13[%85, %c0_51, %c0_52], %88 {strides = array<i32>} : memref<8x8x128xf32, #tpu.memory_space<vmem>>, vector<1x8x128xf32>,
      %c0_53 = arith.constant 0 : index
      %c0_54 = arith.constant 0 : index
      %89 = vector.load %arg12[%c0_53, %c0_54] : memref<8x128xf32, #tpu.memory_space<vmem>>, vector<8x128xf32>
      tpu.vector_store %arg12[%c0_53, %c0_54], %82 {strides = array<i32>} : memref<8x128xf32, #tpu.memory_space<vmem>>, vector<8x128xf32>,
      %c0_55 = arith.constant 0 : index
      %c0_56 = arith.constant 0 : index
      %90 = vector.load %arg11[%c0_55, %c0_56] : memref<8x128xf32, #tpu.memory_space<vmem>>, vector<8x128xf32>
      tpu.vector_store %arg11[%c0_55, %c0_56], %84 {strides = array<i32>} : memref<8x128xf32, #tpu.memory_space<vmem>>, vector<8x128xf32>,
      %c4_i32_57 = arith.constant 4 : i32
      %91 = arith.muli %arg14, %c4_i32_57 : i32
      %c2_i32_58 = arith.constant 2 : i32
      %92 = arith.addi %91, %c2_i32_58 : i32
      %c0_59 = arith.constant 0 : index
      %c0_60 = arith.constant 0 : index
      %93 = vector.load %arg11[%c0_59, %c0_60] : memref<8x128xf32, #tpu.memory_space<vmem>>, vector<8x128xf32>
      %c0_61 = arith.constant 0 : index
      %c0_62 = arith.constant 0 : index
      %94 = vector.load %arg12[%c0_61, %c0_62] : memref<8x128xf32, #tpu.memory_space<vmem>>, vector<8x128xf32>
      %95 = arith.index_cast %92 : i32 to index
      %c0_63 = arith.constant 0 : index
      %c0_64 = arith.constant 0 : index
      %96 = vector.load %arg2[%95, %c0_63, %c0_64] : memref<8x8x512xf32, #tpu.memory_space<vmem>>, vector<1x8x512xf32>
      %97 = vector.shape_cast %96 : vector<1x8x512xf32> to vector<8x512xf32>
      %cst_65 = arith.constant dense<0.000000e+00> : vector<8x512xf32>
      %98 = tpu.matmul %93, %3, %cst_65 {dimension_numbers = #tpu.dot_dimension_numbers<[1], [0], [0], [1], [0, 0, 1, 1], [], []>} : vector<8x128xf32>, vector<128x512xf32>, vector<8x512xf32> -> vector<8x512xf32>
      %99 = arith.addf %97, %98 : vector<8x512xf32>
      %100 = math.tanh %99 : vector<8x512xf32>
      %101 = vector.extract_strided_slice %100 {offsets = [0, 0], sizes = [8, 128], strides = [1, 1]} : vector<8x512xf32> to vector<8x128xf32>
      %cst_66 = arith.constant 5.000000e-01 : f32
      %102 = vector.broadcast %cst_66 : f32 to vector<8x128xf32>
      %103 = arith.mulf %102, %101 : vector<8x128xf32>
      %cst_67 = arith.constant 5.000000e-01 : f32
      %104 = vector.broadcast %cst_67 : f32 to vector<8x128xf32>
      %105 = arith.addf %104, %103 : vector<8x128xf32>
      %106 = vector.extract_strided_slice %100 {offsets = [0, 128], sizes = [8, 128], strides = [1, 1]} : vector<8x512xf32> to vector<8x128xf32>
      %cst_68 = arith.constant 5.000000e-01 : f32
      %107 = vector.broadcast %cst_68 : f32 to vector<8x128xf32>
      %108 = arith.mulf %107, %106 : vector<8x128xf32>
      %cst_69 = arith.constant 5.000000e-01 : f32
      %109 = vector.broadcast %cst_69 : f32 to vector<8x128xf32>
      %110 = arith.addf %109, %108 : vector<8x128xf32>
      %111 = vector.extract_strided_slice %100 {offsets = [0, 256], sizes = [8, 128], strides = [1, 1]} : vector<8x512xf32> to vector<8x128xf32>
      %112 = vector.extract_strided_slice %100 {offsets = [0, 384], sizes = [8, 128], strides = [1, 1]} : vector<8x512xf32> to vector<8x128xf32>
      %cst_70 = arith.constant 5.000000e-01 : f32
      %113 = vector.broadcast %cst_70 : f32 to vector<8x128xf32>
      %114 = arith.mulf %113, %112 : vector<8x128xf32>
      %cst_71 = arith.constant 5.000000e-01 : f32
      %115 = vector.broadcast %cst_71 : f32 to vector<8x128xf32>
      %116 = arith.addf %115, %114 : vector<8x128xf32>
      %117 = arith.mulf %110, %94 : vector<8x128xf32>
      %118 = arith.mulf %105, %111 : vector<8x128xf32>
      %119 = arith.addf %117, %118 : vector<8x128xf32>
      %120 = math.tanh %119 : vector<8x128xf32>
      %121 = arith.mulf %116, %120 : vector<8x128xf32>
      %122 = arith.index_cast %92 : i32 to index
      %c0_72 = arith.constant 0 : index
      %c0_73 = arith.constant 0 : index
      %123 = vector.load %arg13[%122, %c0_72, %c0_73] : memref<8x8x128xf32, #tpu.memory_space<vmem>>, vector<1x8x128xf32>
      %124 = vector.shape_cast %123 : vector<1x8x128xf32> to vector<8x128xf32>
      %125 = vector.shape_cast %121 : vector<8x128xf32> to vector<1x8x128xf32>
      tpu.vector_store %arg13[%122, %c0_72, %c0_73], %125 {strides = array<i32>} : memref<8x8x128xf32, #tpu.memory_space<vmem>>, vector<1x8x128xf32>,
      %c0_74 = arith.constant 0 : index
      %c0_75 = arith.constant 0 : index
      %126 = vector.load %arg12[%c0_74, %c0_75] : memref<8x128xf32, #tpu.memory_space<vmem>>, vector<8x128xf32>
      tpu.vector_store %arg12[%c0_74, %c0_75], %119 {strides = array<i32>} : memref<8x128xf32, #tpu.memory_space<vmem>>, vector<8x128xf32>,
      %c0_76 = arith.constant 0 : index
      %c0_77 = arith.constant 0 : index
      %127 = vector.load %arg11[%c0_76, %c0_77] : memref<8x128xf32, #tpu.memory_space<vmem>>, vector<8x128xf32>
      tpu.vector_store %arg11[%c0_76, %c0_77], %121 {strides = array<i32>} : memref<8x128xf32, #tpu.memory_space<vmem>>, vector<8x128xf32>,
      %c4_i32_78 = arith.constant 4 : i32
      %128 = arith.muli %arg14, %c4_i32_78 : i32
      %c3_i32 = arith.constant 3 : i32
      %129 = arith.addi %128, %c3_i32 : i32
      %c0_79 = arith.constant 0 : index
      %c0_80 = arith.constant 0 : index
      %130 = vector.load %arg11[%c0_79, %c0_80] : memref<8x128xf32, #tpu.memory_space<vmem>>, vector<8x128xf32>
      %c0_81 = arith.constant 0 : index
      %c0_82 = arith.constant 0 : index
      %131 = vector.load %arg12[%c0_81, %c0_82] : memref<8x128xf32, #tpu.memory_space<vmem>>, vector<8x128xf32>
      %132 = arith.index_cast %129 : i32 to index
      %c0_83 = arith.constant 0 : index
      %c0_84 = arith.constant 0 : index
      %133 = vector.load %arg2[%132, %c0_83, %c0_84] : memref<8x8x512xf32, #tpu.memory_space<vmem>>, vector<1x8x512xf32>
      %134 = vector.shape_cast %133 : vector<1x8x512xf32> to vector<8x512xf32>
      %cst_85 = arith.constant dense<0.000000e+00> : vector<8x512xf32>
      %135 = tpu.matmul %130, %3, %cst_85 {dimension_numbers = #tpu.dot_dimension_numbers<[1], [0], [0], [1], [0, 0, 1, 1], [], []>} : vector<8x128xf32>, vector<128x512xf32>, vector<8x512xf32> -> vector<8x512xf32>
      %136 = arith.addf %134, %135 : vector<8x512xf32>
      %137 = math.tanh %136 : vector<8x512xf32>
      %138 = vector.extract_strided_slice %137 {offsets = [0, 0], sizes = [8, 128], strides = [1, 1]} : vector<8x512xf32> to vector<8x128xf32>
      %cst_86 = arith.constant 5.000000e-01 : f32
      %139 = vector.broadcast %cst_86 : f32 to vector<8x128xf32>
      %140 = arith.mulf %139, %138 : vector<8x128xf32>
      %cst_87 = arith.constant 5.000000e-01 : f32
      %141 = vector.broadcast %cst_87 : f32 to vector<8x128xf32>
      %142 = arith.addf %141, %140 : vector<8x128xf32>
      %143 = vector.extract_strided_slice %137 {offsets = [0, 128], sizes = [8, 128], strides = [1, 1]} : vector<8x512xf32> to vector<8x128xf32>
      %cst_88 = arith.constant 5.000000e-01 : f32
      %144 = vector.broadcast %cst_88 : f32 to vector<8x128xf32>
      %145 = arith.mulf %144, %143 : vector<8x128xf32>
      %cst_89 = arith.constant 5.000000e-01 : f32
      %146 = vector.broadcast %cst_89 : f32 to vector<8x128xf32>
      %147 = arith.addf %146, %145 : vector<8x128xf32>
      %148 = vector.extract_strided_slice %137 {offsets = [0, 256], sizes = [8, 128], strides = [1, 1]} : vector<8x512xf32> to vector<8x128xf32>
      %149 = vector.extract_strided_slice %137 {offsets = [0, 384], sizes = [8, 128], strides = [1, 1]} : vector<8x512xf32> to vector<8x128xf32>
      %cst_90 = arith.constant 5.000000e-01 : f32
      %150 = vector.broadcast %cst_90 : f32 to vector<8x128xf32>
      %151 = arith.mulf %150, %149 : vector<8x128xf32>
      %cst_91 = arith.constant 5.000000e-01 : f32
      %152 = vector.broadcast %cst_91 : f32 to vector<8x128xf32>
      %153 = arith.addf %152, %151 : vector<8x128xf32>
      %154 = arith.mulf %147, %131 : vector<8x128xf32>
      %155 = arith.mulf %142, %148 : vector<8x128xf32>
      %156 = arith.addf %154, %155 : vector<8x128xf32>
      %157 = math.tanh %156 : vector<8x128xf32>
      %158 = arith.mulf %153, %157 : vector<8x128xf32>
      %159 = arith.index_cast %129 : i32 to index
      %c0_92 = arith.constant 0 : index
      %c0_93 = arith.constant 0 : index
      %160 = vector.load %arg13[%159, %c0_92, %c0_93] : memref<8x8x128xf32, #tpu.memory_space<vmem>>, vector<1x8x128xf32>
      %161 = vector.shape_cast %160 : vector<1x8x128xf32> to vector<8x128xf32>
      %162 = vector.shape_cast %158 : vector<8x128xf32> to vector<1x8x128xf32>
      tpu.vector_store %arg13[%159, %c0_92, %c0_93], %162 {strides = array<i32>} : memref<8x8x128xf32, #tpu.memory_space<vmem>>, vector<1x8x128xf32>,
      %c0_94 = arith.constant 0 : index
      %c0_95 = arith.constant 0 : index
      %163 = vector.load %arg12[%c0_94, %c0_95] : memref<8x128xf32, #tpu.memory_space<vmem>>, vector<8x128xf32>
      tpu.vector_store %arg12[%c0_94, %c0_95], %156 {strides = array<i32>} : memref<8x128xf32, #tpu.memory_space<vmem>>, vector<8x128xf32>,
      %c0_96 = arith.constant 0 : index
      %c0_97 = arith.constant 0 : index
      %164 = vector.load %arg11[%c0_96, %c0_97] : memref<8x128xf32, #tpu.memory_space<vmem>>, vector<8x128xf32>
      tpu.vector_store %arg11[%c0_96, %c0_97], %158 {strides = array<i32>} : memref<8x128xf32, #tpu.memory_space<vmem>>, vector<8x128xf32>,
    }
    %c2_i32_3 = arith.constant 2 : i32
    %c0_4 = arith.constant 0 : index
    %c0_5 = arith.constant 0 : index
    %c0_6 = arith.constant 0 : index
    %5 = vector.load %arg13[%c0_4, %c0_5, %c0_6] : memref<8x8x128xf32, #tpu.memory_space<vmem>>, vector<8x8x128xf32>
    %6 = vector.shape_cast %5 : vector<8x8x128xf32> to vector<64x128xf32>
    %c0_7 = arith.constant 0 : index
    %c0_8 = arith.constant 0 : index
    %7 = vector.load %arg6[%c0_7, %c0_8] : memref<128x128xf32, #tpu.memory_space<vmem>>, vector<128x128xf32>
    %cst = arith.constant dense<0.000000e+00> : vector<64x128xf32>
    %8 = tpu.matmul %6, %7, %cst {dimension_numbers = #tpu.dot_dimension_numbers<[1], [0], [0], [1], [0, 0, 1, 1], [], []>} : vector<64x128xf32>, vector<128x128xf32>, vector<64x128xf32> -> vector<64x128xf32>
    %c0_9 = arith.constant 0 : index
    %c0_10 = arith.constant 0 : index
    %9 = vector.load %arg7[%c0_9, %c0_10] : memref<1x128xf32, #tpu.memory_space<vmem>>, vector<1x128xf32>
    %10 = vector.broadcast %9 : vector<1x128xf32> to vector<64x128xf32>
    %11 = arith.addf %8, %10 : vector<64x128xf32>
    %12 = vector.shape_cast %11 : vector<64x128xf32> to vector<8x8x128xf32>
    %c0_11 = arith.constant 0 : index
    %c0_12 = arith.constant 0 : index
    %c0_13 = arith.constant 0 : index
    %13 = vector.load %arg8[%c0_11, %c0_12, %c0_13] : memref<8x8x128xf32, #tpu.memory_space<vmem>>, vector<8x8x128xf32>
    tpu.vector_store %arg8[%c0_11, %c0_12, %c0_13], %12 {strides = array<i32>} : memref<8x8x128xf32, #tpu.memory_space<vmem>>, vector<8x8x128xf32>,
    %c0_i32_14 = arith.constant 0 : i32
    %14 = arith.cmpi eq, %arg1, %c0_i32_14 : i32
    %15 = arith.extui %14 : i1 to i32
    %c0_i32_15 = arith.constant 0 : i32
    %16 = arith.cmpi ne, %15, %c0_i32_15 : i32
    scf.if %16 {
      %c0_16 = arith.constant 0 : index
      %c0_17 = arith.constant 0 : index
      %17 = vector.load %arg11[%c0_16, %c0_17] : memref<8x128xf32, #tpu.memory_space<vmem>>, vector<8x128xf32>
      %c0_18 = arith.constant 0 : index
      %c0_19 = arith.constant 0 : index
      %18 = vector.load %arg9[%c0_18, %c0_19] : memref<8x128xf32, #tpu.memory_space<vmem>>, vector<8x128xf32>
      tpu.vector_store %arg9[%c0_18, %c0_19], %17 {strides = array<i32>} : memref<8x128xf32, #tpu.memory_space<vmem>>, vector<8x128xf32>,
      %c0_20 = arith.constant 0 : index
      %c0_21 = arith.constant 0 : index
      %19 = vector.load %arg12[%c0_20, %c0_21] : memref<8x128xf32, #tpu.memory_space<vmem>>, vector<8x128xf32>
      %c0_22 = arith.constant 0 : index
      %c0_23 = arith.constant 0 : index
      %20 = vector.load %arg10[%c0_22, %c0_23] : memref<8x128xf32, #tpu.memory_space<vmem>>, vector<8x128xf32>
      tpu.vector_store %arg10[%c0_22, %c0_23], %19 {strides = array<i32>} : memref<8x128xf32, #tpu.memory_space<vmem>>, vector<8x128xf32>,
    } else {
    }
    return
  }
  func.func @transform_0(%arg0: i32, %arg1: i32) -> (i32, i32, i32) {
    %c0_i32 = arith.constant 0 : i32
    %c0_i32_0 = arith.constant 0 : i32
    return %arg1, %arg0, %c0_i32 : i32, i32, i32
  }
  func.func @transform_1(%arg0: i32, %arg1: i32) -> (i32, i32) {
    %c0_i32 = arith.constant 0 : i32
    %c0_i32_0 = arith.constant 0 : i32
    return %arg0, %c0_i32 : i32, i32
  }
  func.func @transform_2(%arg0: i32, %arg1: i32) -> (i32, i32) {
    %c0_i32 = arith.constant 0 : i32
    %c0_i32_0 = arith.constant 0 : i32
    return %arg0, %c0_i32 : i32, i32
  }
  func.func @transform_3(%arg0: i32, %arg1: i32) -> (i32, i32) {
    %c0_i32 = arith.constant 0 : i32
    %c0_i32_0 = arith.constant 0 : i32
    %c0_i32_1 = arith.constant 0 : i32
    return %c0_i32, %c0_i32_0 : i32, i32
  }
  func.func @transform_4(%arg0: i32, %arg1: i32) -> (i32, i32) {
    %c0_i32 = arith.constant 0 : i32
    %c0_i32_0 = arith.constant 0 : i32
    %c0_i32_1 = arith.constant 0 : i32
    return %c0_i32, %c0_i32_0 : i32, i32
  }
  func.func @transform_5(%arg0: i32, %arg1: i32) -> (i32, i32) {
    %c0_i32 = arith.constant 0 : i32
    %c0_i32_0 = arith.constant 0 : i32
    %c0_i32_1 = arith.constant 0 : i32
    return %c0_i32, %c0_i32_0 : i32, i32
  }
  func.func @transform_6(%arg0: i32, %arg1: i32) -> (i32, i32, i32) {
    %c0_i32 = arith.constant 0 : i32
    %c0_i32_0 = arith.constant 0 : i32
    return %arg1, %arg0, %c0_i32 : i32, i32, i32
  }
  func.func @transform_7(%arg0: i32, %arg1: i32) -> (i32, i32) {
    %c0_i32 = arith.constant 0 : i32
    %c0_i32_0 = arith.constant 0 : i32
    return %arg0, %c0_i32 : i32, i32
  }
  func.func @transform_8(%arg0: i32, %arg1: i32) -> (i32, i32) {
    %c0_i32 = arith.constant 0 : i32
    %c0_i32_0 = arith.constant 0 : i32
    return %arg0, %c0_i32 : i32, i32
  }
}

</mosaic_0001>

<bundles_post_ra>
// kernel: generative_lstm_forward.3
= control target key start
LH: loop header
LB: loop body
LE: loop exit
PB: predicated region body
PF: predicated region fallthrough
CT: control target
= control target key end

     0   :  { %v356_v3 = vmov 0.0   ;;  %vm52_vm0 = vcmask 130048   ;;  %v32_v17 = vlaneseq  ;;  %s580_s1 = inlined_call_operand.vmem [shape: f32[16,512], index: 1, kind: input, shape index: {}]   ;;  %s581_s0 = inlined_call_operand.vmem [shape: f32[64,16], index: 0, kind: input, shape index: {}]   ;;  %s582_s2 = inlined_call_operand.vmem [shape: f32[1,512], index: 2, kind: input, shape index: {}]   ;;  %s583_s3 = inlined_call_operand.vmem [shape: f32[64,512], index: 3, kind: output, shape index: {}]  }
   0x1   :  { %v27_v0 = vld [vmem:[%s580_s1 + $0x28] sm:$0xff]  ;;  %v29_v1 = vld [vmem:[%s580_s1 + $0x38] sm:$0xff]  ;;  %v26_v2 = vld [vmem:[%s580_s1 + $0x20] sm:$0xff]  ;;  %141 = vmatprep.mubr.f32.mxu0 %v356_v3  ;;  %254 = vmatprep.mubr.f32.mxu1 %v356_v3 }
   0x2   :  { %105 = vmatprep.subr.mxu0 %v27_v0  ;;  %218 = vmatprep.subr.mxu1 %v29_v1  ;;  %v28_v4 = vld [vmem:[%s580_s1 + $0x30] sm:$0xff]  ;;  %v23_v5 = vld [vmem:[%s580_s1 + $0x8] sm:$0xff]  ;;  %v25_v6 = vld [vmem:[%s580_s1 + $0x18] sm:$0xff]  ;;  %v33_v18 = vshrl.u32 %v32_v17, 7 }
   0x3   :  { %106 = vmatpush1.msra.mxu0 %v26_v2  ;;  %219 = vmatpush1.msra.mxu1 %v28_v4  ;;  %v22_v7 = vld [vmem:[%s580_s1] sm:$0xff]  ;;  %v24_v8 = vld [vmem:[%s580_s1 + $0x10] sm:$0xff]  ;;  %v15_v10 = vld [vmem:[%s581_s0 + $0x8] sm:$0xff] }
   0x4   :  { %v14_v9 = vld [vmem:[%s581_s0] sm:$0xff]  ;;  %107 = vmatprep.subr.mxu0 %v23_v5  ;;  %220 = vmatprep.subr.mxu1 %v25_v6  ;;  %v16_v11 = vld [vmem:[%s581_s0 + $0x10] sm:$0xff]  ;;  %v17_v12 = vld [vmem:[%s581_s0 + $0x18] sm:$0xff]  ;;  %v34_v19 = vsub.s32 0, %v33_v18  ;;  %v42_v20 = vsub.s32 2, %v33_v18  ;;  %v38_v22 = vsub.s32 1, %v33_v18 }
   0x5   :  { %108 = vmatpush1.msra.mxu0 %v22_v7  ;;  %221 = vmatpush1.msra.mxu1 %v24_v8  ;;  %v18_v13 = vld [vmem:[%s581_s0 + $0x20] sm:$0xff]  ;;  %v19_v14 = vld [vmem:[%s581_s0 + $0x28] sm:$0xff]  ;;  %v20_v15 = vld [vmem:[%s581_s0 + $0x30] sm:$0xff]  ;;  %v46_v23 = vsub.s32 3, %v33_v18 }
   0x6   :  { %339 = vmatmul.mubr.msk.f32.vlgmr.msra.gmra.mxu0 %vm52_vm0, %v14_v9  ;;  %347 = vmatmul.mubr.msk.f32.vlgmr.msra.gmra.mxu1 %vm52_vm0, %v14_v9  ;;  %v21_v16 = vld [vmem:[%s581_s0 + $0x38] sm:$0xff]  ;;  %v30_v21 = vld [vmem:[%s582_s2] sm:$0xf] }
   0x7   :  { %147 = vmatprep.mubr.f32.mxu0 %v356_v3  ;;  %260 = vmatprep.mubr.f32.mxu1 %v356_v3  ;;  %v444_v24 = vrot.slane %v30_v21, %v34_v19  ;;  %v446_v25 = vrot.slane %v30_v21, %v42_v20  ;;  %v448_v26 = vrot.slane %v30_v21, %v38_v22 }
   0x8   :  { %v450_v27 = vrot.slane %v30_v21, %v46_v23 }
   0xa   :  { %340 = vmatmul.mubr.msk.f32.gmra.mxu0 %vm52_vm0, %v15_v10  ;;  %348 = vmatmul.mubr.msk.f32.gmra.mxu1 %vm52_vm0, %v15_v10 }
   0xb   :  { %153 = vmatprep.mubr.f32.mxu0 %v356_v3  ;;  %266 = vmatprep.mubr.f32.mxu1 %v356_v3 }
   0xe   :  { %341 = vmatmul.mubr.msk.f32.gmra.mxu0 %vm52_vm0, %v16_v11  ;;  %349 = vmatmul.mubr.msk.f32.gmra.mxu1 %vm52_vm0, %v16_v11 }
   0xf   :  { %159 = vmatprep.mubr.f32.mxu0 %v356_v3  ;;  %272 = vmatprep.mubr.f32.mxu1 %v356_v3 }
  0x12   :  { %342 = vmatmul.mubr.msk.f32.gmra.mxu0 %vm52_vm0, %v17_v12  ;;  %350 = vmatmul.mubr.msk.f32.gmra.mxu1 %vm52_vm0, %v17_v12 }
  0x13   :  { %165 = vmatprep.mubr.f32.mxu0 %v356_v3  ;;  %278 = vmatprep.mubr.f32.mxu1 %v356_v3 }
  0x16   :  { %343 = vmatmul.mubr.msk.f32.gmra.mxu0 %vm52_vm0, %v18_v13  ;;  %351 = vmatmul.mubr.msk.f32.gmra.mxu1 %vm52_vm0, %v18_v13 }
  0x17   :  { %171 = vmatprep.mubr.f32.mxu0 %v356_v3  ;;  %284 = vmatprep.mubr.f32.mxu1 %v356_v3 }
  0x1a   :  { %344 = vmatmul.mubr.msk.f32.gmra.mxu0 %vm52_vm0, %v19_v14  ;;  %352 = vmatmul.mubr.msk.f32.gmra.mxu1 %vm52_vm0, %v19_v14 }
  0x1b   :  { %177 = vmatprep.mubr.f32.mxu0 %v356_v3  ;;  %290 = vmatprep.mubr.f32.mxu1 %v356_v3 }
  0x1e   :  { %345 = vmatmul.mubr.msk.f32.gmra.mxu0 %vm52_vm0, %v20_v15  ;;  %353 = vmatmul.mubr.msk.f32.gmra.mxu1 %vm52_vm0, %v20_v15 }
  0x1f   :  { %183 = vmatprep.mubr.f32.mxu0 %v356_v3  ;;  %296 = vmatprep.mubr.f32.mxu1 %v356_v3 }
  0x22   :  { %346 = vmatmul.mubr.msk.f32.gmra.mxu0 %vm52_vm0, %v21_v16  ;;  %354 = vmatmul.mubr.msk.f32.gmra.mxu1 %vm52_vm0, %v21_v16 }
  0xc6   :  { %v143_v28 = vpop.f32.mrf.mxu0  ;;  %v256_v29 = vpop.f32.mrf.mxu1 }
  0xc7   :  { %v144_v30 = vadd.f32 %v143_v28, %v444_v24  ;;  %v257_v31 = vadd.f32 %v256_v29, %v446_v25 }
  0xc8   :  { %v145_v32 = vpop.f32.mrf.mxu0  ;;  %v258_v33 = vpop.f32.mrf.mxu1 }
  0xc9   :  { %303 = vst [vmem:[%s583_s3] sm:$0xff] %v144_v30  ;;  %305 = vst [vmem:[%s583_s3 + $0x10] sm:$0xff] %v257_v31  ;;  %v146_v34 = vadd.f32 %v145_v32, %v448_v26  ;;  %v259_v35 = vadd.f32 %v258_v33, %v450_v27 }
  0xca   :  { %v149_v36 = vpop.f32.mrf.mxu0  ;;  %v262_v37 = vpop.f32.mrf.mxu1 }
  0xcb   :  { %304 = vst [vmem:[%s583_s3 + $0x8] sm:$0xff] %v146_v34  ;;  %306 = vst [vmem:[%s583_s3 + $0x18] sm:$0xff] %v259_v35  ;;  %v150_v38 = vadd.f32 %v149_v36, %v444_v24  ;;  %v263_v39 = vadd.f32 %v262_v37, %v446_v25 }
  0xcc   :  { %v151_v40 = vpop.f32.mrf.mxu0  ;;  %v264_v41 = vpop.f32.mrf.mxu1 }
  0xcd   :  { %307 = vst [vmem:[%s583_s3 + $0x20] sm:$0xff] %v150_v38  ;;  %309 = vst [vmem:[%s583_s3 + $0x30] sm:$0xff] %v263_v39  ;;  %v152_v42 = vadd.f32 %v151_v40, %v448_v26  ;;  %v265_v43 = vadd.f32 %v264_v41, %v450_v27 }
  0xce   :  { %v155_v44 = vpop.f32.mrf.mxu0  ;;  %v268_v45 = vpop.f32.mrf.mxu1 }
  0xcf   :  { %308 = vst [vmem:[%s583_s3 + $0x28] sm:$0xff] %v152_v42  ;;  %310 = vst [vmem:[%s583_s3 + $0x38] sm:$0xff] %v265_v43  ;;  %v156_v46 = vadd.f32 %v155_v44, %v444_v24  ;;  %v269_v47 = vadd.f32 %v268_v45, %v446_v25 }
  0xd0   :  { %v157_v48 = vpop.f32.mrf.mxu0  ;;  %v270_v49 = vpop.f32.mrf.mxu1 }
  0xd1   :  { %311 = vst [vmem:[%s583_s3 + $0x40] sm:$0xff] %v156_v46  ;;  %313 = vst [vmem:[%s583_s3 + $0x50] sm:$0xff] %v269_v47  ;;  %v158_v50 = vadd.f32 %v157_v48, %v448_v26  ;;  %v271_v51 = vadd.f32 %v270_v49, %v450_v27 }
  0xd2   :  { %v161_v52 = vpop.f32.mrf.mxu0  ;;  %v274_v53 = vpop.f32.mrf.mxu1 }
  0xd3   :  { %312 = vst [vmem:[%s583_s3 + $0x48] sm:$0xff] %v158_v50  ;;  %314 = vst [vmem:[%s583_s3 + $0x58] sm:$0xff] %v271_v51  ;;  %v162_v54 = vadd.f32 %v161_v52, %v444_v24  ;;  %v275_v55 = vadd.f32 %v274_v53, %v446_v25 }
  0xd4   :  { %v163_v56 = vpop.f32.mrf.mxu0  ;;  %v276_v57 = vpop.f32.mrf.mxu1 }
  0xd5   :  { %315 = vst [vmem:[%s583_s3 + $0x60] sm:$0xff] %v162_v54  ;;  %317 = vst [vmem:[%s583_s3 + $0x70] sm:$0xff] %v275_v55  ;;  %v164_v58 = vadd.f32 %v163_v56, %v448_v26  ;;  %v277_v59 = vadd.f32 %v276_v57, %v450_v27 }
  0xd6   :  { %v167_v60 = vpop.f32.mrf.mxu0  ;;  %v280_v61 = vpop.f32.mrf.mxu1 }
  0xd7   :  { %316 = vst [vmem:[%s583_s3 + $0x68] sm:$0xff] %v164_v58  ;;  %318 = vst [vmem:[%s583_s3 + $0x78] sm:$0xff] %v277_v59  ;;  %v168_v62 = vadd.f32 %v167_v60, %v444_v24  ;;  %v281_v63 = vadd.f32 %v280_v61, %v446_v25 }
  0xd8   :  { %v169_v0 = vpop.f32.mrf.mxu0  ;;  %v282_v1 = vpop.f32.mrf.mxu1 }
  0xd9   :  { %319 = vst [vmem:[%s583_s3 + $0x80] sm:$0xff] %v168_v62  ;;  %321 = vst [vmem:[%s583_s3 + $0x90] sm:$0xff] %v281_v63  ;;  %v170_v2 = vadd.f32 %v169_v0, %v448_v26  ;;  %v283_v3 = vadd.f32 %v282_v1, %v450_v27 }
  0xda   :  { %v173_v4 = vpop.f32.mrf.mxu0  ;;  %v286_v5 = vpop.f32.mrf.mxu1 }
  0xdb   :  { %320 = vst [vmem:[%s583_s3 + $0x88] sm:$0xff] %v170_v2  ;;  %322 = vst [vmem:[%s583_s3 + $0x98] sm:$0xff] %v283_v3  ;;  %v174_v6 = vadd.f32 %v173_v4, %v444_v24  ;;  %v287_v7 = vadd.f32 %v286_v5, %v446_v25 }
  0xdc   :  { %v175_v8 = vpop.f32.mrf.mxu0  ;;  %v288_v9 = vpop.f32.mrf.mxu1 }
  0xdd   :  { %323 = vst [vmem:[%s583_s3 + $0xa0] sm:$0xff] %v174_v6  ;;  %325 = vst [vmem:[%s583_s3 + $0xb0] sm:$0xff] %v287_v7  ;;  %v176_v10 = vadd.f32 %v175_v8, %v448_v26  ;;  %v289_v11 = vadd.f32 %v288_v9, %v450_v27 }
  0xde   :  { %v179_v12 = vpop.f32.mrf.mxu0  ;;  %v292_v13 = vpop.f32.mrf.mxu1 }
  0xdf   :  { %324 = vst [vmem:[%s583_s3 + $0xa8] sm:$0xff] %v176_v10  ;;  %326 = vst [vmem:[%s583_s3 + $0xb8] sm:$0xff] %v289_v11  ;;  %v180_v14 = vadd.f32 %v179_v12, %v444_v24  ;;  %v293_v15 = vadd.f32 %v292_v13, %v446_v25 }
  0xe0   :  { %v181_v16 = vpop.f32.mrf.mxu0  ;;  %v294_v17 = vpop.f32.mrf.mxu1 }
  0xe1   :  { %327 = vst [vmem:[%s583_s3 + $0xc0] sm:$0xff] %v180_v14  ;;  %329 = vst [vmem:[%s583_s3 + $0xd0] sm:$0xff] %v293_v15  ;;  %v182_v18 = vadd.f32 %v181_v16, %v448_v26  ;;  %v295_v19 = vadd.f32 %v294_v17, %v450_v27 }
  0xe2   :  { %v185_v20 = vpop.f32.mrf.mxu0  ;;  %v298_v21 = vpop.f32.mrf.mxu1 }
  0xe3   :  { %328 = vst [vmem:[%s583_s3 + $0xc8] sm:$0xff] %v182_v18  ;;  %330 = vst [vmem:[%s583_s3 + $0xd8] sm:$0xff] %v295_v19  ;;  %v186_v22 = vadd.f32 %v185_v20, %v444_v24  ;;  %v299_v23 = vadd.f32 %v298_v21, %v446_v25 }
  0xe4   :  { %v187_v28 = vpop.f32.mrf.mxu0  ;;  %v300_v29 = vpop.f32.mrf.mxu1 }
  0xe5   :  { %331 = vst [vmem:[%s583_s3 + $0xe0] sm:$0xff] %v186_v22  ;;  %333 = vst [vmem:[%s583_s3 + $0xf0] sm:$0xff] %v299_v23  ;;  %v188_v30 = vadd.f32 %v187_v28, %v448_v26  ;;  %v301_v31 = vadd.f32 %v300_v29, %v450_v27 }
  0xe7   :  { %332 = vst [vmem:[%s583_s3 + $0xe8] sm:$0xff] %v188_v30  ;;  %334 = vst [vmem:[%s583_s3 + $0xf8] sm:$0xff] %v301_v31 }

// kernel: generative_lstm_forward.4
= control target key start
LH: loop header
LB: loop body
LE: loop exit
PB: predicated region body
PF: predicated region fallthrough
CT: control target
= control target key end

     0   :  { %s2329_s0 = inlined_call_operand.vmem [shape: f32[8,8,512], index: 0, kind: input, shape index: {}]   ;;  %s2330_s1 = inlined_call_operand.vmem [shape: f32[8,128], index: 1, kind: input, shape index: {}]   ;;  %s2331_s3 = inlined_call_operand.vmem [shape: f32[128,512], index: 3, kind: input, shape index: {}]   ;;  %s2332_s4 = inlined_call_operand.vmem [shape: f32[128,512], index: 4, kind: input, shape index: {}]   ;;  %s2333_s5 = inlined_call_operand.vmem [shape: f32[1,512], index: 5, kind: input, shape index: {}]   ;;  %s2334_s6 = inlined_call_operand.vmem [shape: f32[8,8,512], index: 6, kind: output, shape index: {0}]   ;;  %s2335_s7 = inlined_call_operand.vmem [shape: f32[8,128], index: 7, kind: output, shape index: {1}]   ;;  %s2336_s8 = inlined_call_operand.vmem [shape: f32[8,128], index: 8, kind: output, shape index: {2}]   ;;  %s2337_s2 = inlined_call_operand.vmem [shape: f32[8,128], index: 2, kind: input, shape index: {}]  }
   0x1   :  { %v30_v0 = vld [vmem:[%s2330_s1] sm:$0xff]  ;;  %v1371_v3 = vld [vmem:[%s2331_s3 + $0x8] sm:$0xff]  ;;  %v1376_v4 = vld [vmem:[%s2331_s3 + $0x10] sm:$0xff] }
   0x2   :  { %v32_v1 = vld [vmem:[%s2337_s2] sm:$0xff]  ;;  %31 = vst [vmem:[#allocation2] sm:$0xff] %v30_v0  ;;  %2381 = vst [vmem:[#allocation6_spill] sm:$0xff] %v1371_v3  ;;  %v1381_v5 = vld [vmem:[%s2331_s3 + $0x18] sm:$0xff]  ;;  %s1683_s2 = smov 0  }
   0x3   :  { %v1366_v2 = vld [vmem:[%s2331_s3] sm:$0xff]  ;;  %33 = vst [vmem:[#allocation3] sm:$0xff] %v32_v1  ;;  %2382 = vst [vmem:[#allocation7_spill] sm:$0xff] %v1376_v4  ;;  %v1391_v7 = vld [vmem:[%s2331_s3 + $0x28] sm:$0xff] }
   0x4   :  { %2380 = vst [vmem:[#allocation5_spill] sm:$0xff] %v1366_v2  ;;  %2383 = vst [vmem:[#allocation8_spill] sm:$0xff] %v1381_v5  ;;  %v1386_v6 = vld [vmem:[%s2331_s3 + $0x20] sm:$0xff]  ;;  %v1396_v8 = vld [vmem:[%s2331_s3 + $0x30] sm:$0xff] }
   0x5   :  { %2384 = vst [vmem:[#allocation9_spill] sm:$0xff] %v1386_v6  ;;  %2385 = vst [vmem:[#allocation10_spill] sm:$0xff] %v1391_v7  ;;  %v1401_v9 = vld [vmem:[%s2331_s3 + $0x38] sm:$0xff]  ;;  %v1406_v10 = vld [vmem:[%s2331_s3 + $0x40] sm:$0xff] }
   0x6   :  { %2386 = vst [vmem:[#allocation11_spill] sm:$0xff] %v1396_v8  ;;  %2387 = vst [vmem:[#allocation12_spill] sm:$0xff] %v1401_v9  ;;  %v1411_v11 = vld [vmem:[%s2331_s3 + $0x48] sm:$0xff]  ;;  %v1416_v12 = vld [vmem:[%s2331_s3 + $0x50] sm:$0xff] }
   0x7   :  { %2388 = vst [vmem:[#allocation13_spill] sm:$0xff] %v1406_v10  ;;  %2389 = vst [vmem:[#allocation14_spill] sm:$0xff] %v1411_v11  ;;  %v1421_v13 = vld [vmem:[%s2331_s3 + $0x58] sm:$0xff]  ;;  %v1426_v14 = vld [vmem:[%s2331_s3 + $0x60] sm:$0xff] }
   0x8   :  { %2390 = vst [vmem:[#allocation15_spill] sm:$0xff] %v1416_v12  ;;  %2391 = vst [vmem:[#allocation16_spill] sm:$0xff] %v1421_v13  ;;  %v1431_v15 = vld [vmem:[%s2331_s3 + $0x68] sm:$0xff]  ;;  %v1436_v16 = vld [vmem:[%s2331_s3 + $0x70] sm:$0xff] }
   0x9   :  { %2392 = vst [vmem:[#allocation17_spill] sm:$0xff] %v1426_v14  ;;  %2393 = vst [vmem:[#allocation18_spill] sm:$0xff] %v1431_v15  ;;  %v1441_v17 = vld [vmem:[%s2331_s3 + $0x78] sm:$0xff]  ;;  %v1446_v18 = vld [vmem:[%s2331_s3 + $0x80] sm:$0xff] }
   0xa   :  { %2394 = vst [vmem:[#allocation19_spill] sm:$0xff] %v1436_v16  ;;  %2395 = vst [vmem:[#allocation20_spill] sm:$0xff] %v1441_v17  ;;  %v1451_v19 = vld [vmem:[%s2331_s3 + $0x88] sm:$0xff]  ;;  %v1456_v20 = vld [vmem:[%s2331_s3 + $0x90] sm:$0xff] }
   0xb   :  { %2396 = vst [vmem:[#allocation21_spill] sm:$0xff] %v1446_v18  ;;  %2397 = vst [vmem:[#allocation22_spill] sm:$0xff] %v1451_v19  ;;  %v1461_v21 = vld [vmem:[%s2331_s3 + $0x98] sm:$0xff]  ;;  %v1466_v22 = vld [vmem:[%s2331_s3 + $0xa0] sm:$0xff] }
   0xc   :  { %2398 = vst [vmem:[#allocation23_spill] sm:$0xff] %v1456_v20  ;;  %v1471_v23 = vld [vmem:[%s2331_s3 + $0xa8] sm:$0xff]  ;;  %v1476_v24 = vld [vmem:[%s2331_s3 + $0xb0] sm:$0xff]  ;;  %v1481_v25 = vld [vmem:[%s2331_s3 + $0xb8] sm:$0xff] }
   0xd   :  { %v1486_v26 = vld [vmem:[%s2331_s3 + $0xc0] sm:$0xff]  ;;  %v1491_v27 = vld [vmem:[%s2331_s3 + $0xc8] sm:$0xff]  ;;  %v1496_v28 = vld [vmem:[%s2331_s3 + $0xd0] sm:$0xff] }
   0xe   :  { %v1501_v29 = vld [vmem:[%s2331_s3 + $0xd8] sm:$0xff]  ;;  %v1506_v30 = vld [vmem:[%s2331_s3 + $0xe0] sm:$0xff]  ;;  %v1511_v31 = vld [vmem:[%s2331_s3 + $0xe8] sm:$0xff] }
   0xf   :  { %v1516_v32 = vld [vmem:[%s2331_s3 + $0xf0] sm:$0xff]  ;;  %v1521_v33 = vld [vmem:[%s2331_s3 + $0xf8] sm:$0xff]  ;;  %v1526_v34 = vld [vmem:[%s2331_s3 + $0x100] sm:$0xff] }
  0x10   :  { %v1531_v35 = vld [vmem:[%s2331_s3 + $0x108] sm:$0xff]  ;;  %v1536_v36 = vld [vmem:[%s2331_s3 + $0x110] sm:$0xff]  ;;  %v1541_v37 = vld [vmem:[%s2331_s3 + $0x118] sm:$0xff] }
  0x11   :  { %v1546_v38 = vld [vmem:[%s2331_s3 + $0x120] sm:$0xff]  ;;  %v1551_v39 = vld [vmem:[%s2331_s3 + $0x128] sm:$0xff]  ;;  %v1556_v40 = vld [vmem:[%s2331_s3 + $0x130] sm:$0xff] }
  0x12   :  { %v1561_v41 = vld [vmem:[%s2331_s3 + $0x138] sm:$0xff]  ;;  %v1566_v42 = vld [vmem:[%s2331_s3 + $0x140] sm:$0xff]  ;;  %v1571_v43 = vld [vmem:[%s2331_s3 + $0x148] sm:$0xff] }
  0x13   :  { %v1576_v44 = vld [vmem:[%s2331_s3 + $0x150] sm:$0xff]  ;;  %v1581_v45 = vld [vmem:[%s2331_s3 + $0x158] sm:$0xff]  ;;  %v1586_v46 = vld [vmem:[%s2331_s3 + $0x160] sm:$0xff] }
  0x14   :  { %v1591_v47 = vld [vmem:[%s2331_s3 + $0x168] sm:$0xff]  ;;  %v1596_v48 = vld [vmem:[%s2331_s3 + $0x170] sm:$0xff]  ;;  %v1601_v49 = vld [vmem:[%s2331_s3 + $0x178] sm:$0xff] }
  0x15   :  { %v1606_v50 = vld [vmem:[%s2331_s3 + $0x180] sm:$0xff]  ;;  %v1611_v51 = vld [vmem:[%s2331_s3 + $0x188] sm:$0xff]  ;;  %v1616_v52 = vld [vmem:[%s2331_s3 + $0x190] sm:$0xff] }
  0x16   :  { %v1621_v53 = vld [vmem:[%s2331_s3 + $0x198] sm:$0xff]  ;;  %v1626_v54 = vld [vmem:[%s2331_s3 + $0x1a0] sm:$0xff]  ;;  %v1631_v55 = vld [vmem:[%s2331_s3 + $0x1a8] sm:$0xff] }
  0x17   :  { %v1636_v56 = vld [vmem:[%s2331_s3 + $0x1b0] sm:$0xff]  ;;  %v1641_v57 = vld [vmem:[%s2331_s3 + $0x1b8] sm:$0xff]  ;;  %v1646_v58 = vld [vmem:[%s2331_s3 + $0x1c0] sm:$0xff] }
  0x18   :  { %v1651_v59 = vld [vmem:[%s2331_s3 + $0x1c8] sm:$0xff]  ;;  %v1656_v60 = vld [vmem:[%s2331_s3 + $0x1d0] sm:$0xff]  ;;  %v1661_v61 = vld [vmem:[%s2331_s3 + $0x1d8] sm:$0xff] }
  0x19   :  { %v1666_v62 = vld [vmem:[%s2331_s3 + $0x1e0] sm:$0xff]  ;;  %v1671_v63 = vld [vmem:[%s2331_s3 + $0x1e8] sm:$0xff]  ;;  %v1676_v0 = vld [vmem:[%s2331_s3 + $0x1f0] sm:$0xff] }
  0x1a   :  { %2399 = vst [vmem:[#allocation24_spill] sm:$0xff] %v1671_v63  ;;  %v1681_v1 = vld [vmem:[%s2331_s3 + $0x1f8] sm:$0xff] }
  0x1b   :  { %2400 = vst [vmem:[#allocation25_spill] sm:$0xff] %v1681_v1 }
  0x1c LB: > { %v2401_v18 = vld [vmem:[#allocation21_spill] sm:$0xff]  ;;  %v2402_v20 = vld [vmem:[#allocation23_spill] sm:$0xff]  ;;  %v2403_v15 = vld [vmem:[#allocation18_spill] sm:$0xff]  ;;  %s1244_s3 = sshll.u32 %s1308_s2, 7  ;;  %s1245_s19 = sshll.u32 %s1308_s2, 5  ;;  %s1308_s2 = sphi %s1683_s2, %s103_s2  }
  0x1d   : > { %v2404_v14 = vld [vmem:[#allocation17_spill] sm:$0xff]  ;;  %v2405_v16 = vld [vmem:[#allocation19_spill] sm:$0xff]  ;;  %v2406_v13 = vld [vmem:[#allocation16_spill] sm:$0xff]  ;;  %s1826_s18 = scalar_lea.vmem %s2329_s0, %s1244_s3  ;;  %s1836_s20 = scalar_lea.vmem [#allocation4], %s1245_s19 }
  0x1e   : > { %v2407_v10 = vld [vmem:[#allocation13_spill] sm:$0xff]  ;;  %v2408_v12 = vld [vmem:[#allocation15_spill] sm:$0xff]  ;;  %v2409_v7 = vld [vmem:[#allocation10_spill] sm:$0xff]  ;;  %s103_s2 = sadd.s32 1, %s1308_s2  }
  0x1f   : > { %v2410_v9 = vld [vmem:[#allocation12_spill] sm:$0xff]  ;;  %v2413_v6 = vld [vmem:[#allocation9_spill] sm:$0xff]  ;;  %v2414_v8 = vld [vmem:[#allocation11_spill] sm:$0xff]  ;;  %p100_p0 = scmp.ge.s32.totalorder %s103_s2, 2  }
  0x20   : > { %v2415_v4 = vld [vmem:[#allocation7_spill] sm:$0xff]  ;;  %v2416_v3 = vld [vmem:[#allocation6_spill] sm:$0xff]  ;;  %v2417_v5 = vld [vmem:[#allocation8_spill] sm:$0xff] }
  0x21   : > { %v2412_v63 = vld [vmem:[#allocation24_spill] sm:$0xff]  ;;  %v2418_v2 = vld [vmem:[#allocation5_spill] sm:$0xff]  ;;  %v2419_v11 = vld [vmem:[#allocation14_spill] sm:$0xff] }
  0x22   : > { %v2411_v1 = vld [vmem:[#allocation25_spill] sm:$0xff]  ;;  %114 = vmatprep.subr.mxu0 %v2412_v63  ;;  %v2420_v19 = vld [vmem:[#allocation22_spill] sm:$0xff]  ;;  %v2421_v17 = vld [vmem:[#allocation20_spill] sm:$0xff] }
  0x23   : > { %185 = vmatprep.subr.mxu1 %v2411_v1  ;;  %115 = vmatpush1.msra.mxu0 %v1666_v62 }
  0x24   : > { %186 = vmatpush1.msra.mxu1 %v1676_v0  ;;  %116 = vmatprep.subr.mxu0 %v1651_v59 }
  0x25   : > { %187 = vmatprep.subr.mxu1 %v1661_v61  ;;  %117 = vmatpush1.msra.mxu0 %v1646_v58 }
  0x26   : > { %188 = vmatpush1.msra.mxu1 %v1656_v60  ;;  %118 = vmatprep.subr.mxu0 %v1631_v55 }
  0x27   : > { %189 = vmatprep.subr.mxu1 %v1641_v57  ;;  %119 = vmatpush1.msra.mxu0 %v1626_v54 }
  0x28   : > { %190 = vmatpush1.msra.mxu1 %v1636_v56  ;;  %120 = vmatprep.subr.mxu0 %v1611_v51 }
  0x29   : > { %191 = vmatprep.subr.mxu1 %v1621_v53  ;;  %121 = vmatpush1.msra.mxu0 %v1606_v50 }
  0x2a   : > { %192 = vmatpush1.msra.mxu1 %v1616_v52  ;;  %122 = vmatprep.subr.mxu0 %v1591_v47 }
  0x2b   : > { %193 = vmatprep.subr.mxu1 %v1601_v49  ;;  %123 = vmatpush1.msra.mxu0 %v1586_v46 }
  0x2c   : > { %194 = vmatpush1.msra.mxu1 %v1596_v48  ;;  %124 = vmatprep.subr.mxu0 %v1571_v43 }
  0x2d   : > { %195 = vmatprep.subr.mxu1 %v1581_v45  ;;  %125 = vmatpush1.msra.mxu0 %v1566_v42 }
  0x2e   : > { %196 = vmatpush1.msra.mxu1 %v1576_v44  ;;  %126 = vmatprep.subr.mxu0 %v1551_v39 }
  0x2f   : > { %197 = vmatprep.subr.mxu1 %v1561_v41  ;;  %127 = vmatpush1.msra.mxu0 %v1546_v38 }
  0x30   : > { %198 = vmatpush1.msra.mxu1 %v1556_v40  ;;  %128 = vmatprep.subr.mxu0 %v1531_v35 }
  0x31   : > { %199 = vmatprep.subr.mxu1 %v1541_v37  ;;  %129 = vmatpush1.msra.mxu0 %v1526_v34 }
  0x32   : > { %200 = vmatpush1.msra.mxu1 %v1536_v36  ;;  %130 = vmatprep.subr.mxu0 %v1511_v31 }
  0x33   : > { %201 = vmatprep.subr.mxu1 %v1521_v33  ;;  %131 = vmatpush1.msra.mxu0 %v1506_v30 }
  0x34   : > { %202 = vmatpush1.msra.mxu1 %v1516_v32  ;;  %132 = vmatprep.subr.mxu0 %v1491_v27 }
  0x35   : > { %203 = vmatprep.subr.mxu1 %v1501_v29  ;;  %133 = vmatpush1.msra.mxu0 %v1486_v26 }
  0x36   : > { %204 = vmatpush1.msra.mxu1 %v1496_v28  ;;  %134 = vmatprep.subr.mxu0 %v1471_v23 }
  0x37   : > { %205 = vmatprep.subr.mxu1 %v1481_v25  ;;  %135 = vmatpush1.msra.mxu0 %v1466_v22 }
  0x38   : > { %206 = vmatpush1.msra.mxu1 %v1476_v24  ;;  %136 = vmatprep.subr.mxu0 %v2420_v19  ;;  %v2340_v19 = vmov 0.0  }
  0x39   : > { %207 = vmatprep.subr.mxu1 %v1461_v21  ;;  %137 = vmatpush1.msra.mxu0 %v2401_v18 }
  0x3a   : > { %208 = vmatpush1.msra.mxu1 %v2402_v20  ;;  %138 = vmatprep.subr.mxu0 %v2403_v15 }
  0x3b   : > { %209 = vmatprep.subr.mxu1 %v2421_v17  ;;  %139 = vmatpush1.msra.mxu0 %v2404_v14  ;;  %v105_v17 = vld [vmem:[#allocation2] sm:$0xff] }
  0x3c   : > { %210 = vmatpush1.msra.mxu1 %v2405_v16  ;;  %140 = vmatprep.subr.mxu0 %v2419_v11 }
  0x3d   : > { %211 = vmatprep.subr.mxu1 %v2406_v13  ;;  %141 = vmatpush1.msra.mxu0 %v2407_v10 }
  0x3e   : > { %178 = vmatprep.mubr.f32.mxu0 %v2340_v19  ;;  %142 = vmatprep.subr.mxu0 %v2409_v7 }
  0x3f   : > { %212 = vmatpush1.msra.mxu1 %v2408_v12  ;;  %143 = vmatpush1.msra.mxu0 %v2413_v6 }
  0x40   : > { %213 = vmatprep.subr.mxu1 %v2410_v9  ;;  %144 = vmatprep.subr.mxu0 %v2416_v3 }
  0x41   : > { %214 = vmatpush1.msra.mxu1 %v2414_v8  ;;  %145 = vmatpush1.msra.mxu0 %v2418_v2 }
  0x42   : > { %215 = vmatprep.subr.mxu1 %v2417_v5  ;;  %179 = vmatmul.mubr.f32.vlgmr.msra.gmra.mxu0 %v105_v17 }
  0x43   : > { %216 = vmatpush1.msra.mxu1 %v2415_v4  ;;  %249 = vmatprep.mubr.f32.mxu1 %v2340_v19  ;;  %v2423_v19 = vld [vmem:[#allocation20_spill] sm:$0xff] }
  0x44   : > { %290 = vmatprep.subr.mxu0 %v2412_v63  ;;  %250 = vmatmul.mubr.f32.vlgmr.msra.gmra.mxu1 %v105_v17  ;;  %v2422_v17 = vld [vmem:[#allocation22_spill] sm:$0xff] }
  0x45   : > { %361 = vmatprep.subr.mxu1 %v2411_v1  ;;  %291 = vmatpush1.msra.mxu0 %v1666_v62 }
  0x46   : > { %362 = vmatpush1.msra.mxu1 %v1676_v0  ;;  %292 = vmatprep.subr.mxu0 %v1651_v59 }
  0x47   : > { %363 = vmatprep.subr.mxu1 %v1661_v61  ;;  %293 = vmatpush1.msra.mxu0 %v1646_v58 }
  0x48   : > { %364 = vmatpush1.msra.mxu1 %v1656_v60  ;;  %294 = vmatprep.subr.mxu0 %v1631_v55 }
  0x49   : > { %365 = vmatprep.subr.mxu1 %v1641_v57  ;;  %295 = vmatpush1.msra.mxu0 %v1626_v54 }
  0x4a   : > { %366 = vmatpush1.msra.mxu1 %v1636_v56  ;;  %296 = vmatprep.subr.mxu0 %v1611_v51 }
  0x4b   : > { %367 = vmatprep.subr.mxu1 %v1621_v53  ;;  %297 = vmatpush1.msra.mxu0 %v1606_v50 }
  0x4c   : > { %368 = vmatpush1.msra.mxu1 %v1616_v52  ;;  %298 = vmatprep.subr.mxu0 %v1591_v47 }
  0x4d   : > { %369 = vmatprep.subr.mxu1 %v1601_v49  ;;  %299 = vmatpush1.msra.mxu0 %v1586_v46 }
  0x4e   : > { %370 = vmatpush1.msra.mxu1 %v1596_v48  ;;  %300 = vmatprep.subr.mxu0 %v1571_v43 }
  0x4f   : > { %371 = vmatprep.subr.mxu1 %v1581_v45  ;;  %301 = vmatpush1.msra.mxu0 %v1566_v42 }
  0x50   : > { %372 = vmatpush1.msra.mxu1 %v1576_v44  ;;  %302 = vmatprep.subr.mxu0 %v1551_v39 }
  0x51   : > { %373 = vmatprep.subr.mxu1 %v1561_v41  ;;  %303 = vmatpush1.msra.mxu0 %v1546_v38 }
  0x52   : > { %374 = vmatpush1.msra.mxu1 %v1556_v40  ;;  %304 = vmatprep.subr.mxu0 %v1531_v35 }
  0x53   : > { %375 = vmatprep.subr.mxu1 %v1541_v37  ;;  %305 = vmatpush1.msra.mxu0 %v1526_v34 }
  0x54   : > { %376 = vmatpush1.msra.mxu1 %v1536_v36  ;;  %306 = vmatprep.subr.mxu0 %v1511_v31 }
  0x55   : > { %377 = vmatprep.subr.mxu1 %v1521_v33  ;;  %307 = vmatpush1.msra.mxu0 %v1506_v30 }
  0x56   : > { %378 = vmatpush1.msra.mxu1 %v1516_v32  ;;  %308 = vmatprep.subr.mxu0 %v1491_v27 }
  0x57   : > { %379 = vmatprep.subr.mxu1 %v1501_v29  ;;  %309 = vmatpush1.msra.mxu0 %v1486_v26 }
  0x58   : > { %380 = vmatpush1.msra.mxu1 %v1496_v28  ;;  %310 = vmatprep.subr.mxu0 %v1471_v23 }
  0x59   : > { %381 = vmatprep.subr.mxu1 %v1481_v25  ;;  %311 = vmatpush1.msra.mxu0 %v1466_v22 }
  0x5a   : > { %382 = vmatpush1.msra.mxu1 %v1476_v24  ;;  %312 = vmatprep.subr.mxu0 %v2422_v17 }
  0x5b   : > { %383 = vmatprep.subr.mxu1 %v1461_v21  ;;  %313 = vmatpush1.msra.mxu0 %v2401_v18 }
  0x5c   : > { %384 = vmatpush1.msra.mxu1 %v2402_v20  ;;  %314 = vmatprep.subr.mxu0 %v2403_v15  ;;  %v106_v20 = vld [vmem:[#allocation3] sm:$0xff] }
  0x5d   : > { %385 = vmatprep.subr.mxu1 %v2423_v19  ;;  %315 = vmatpush1.msra.mxu0 %v2404_v14 }
  0x5e   : > { %386 = vmatpush1.msra.mxu1 %v2405_v16  ;;  %316 = vmatprep.subr.mxu0 %v2419_v11  ;;  %v2424_v11 = vmov 0.0  }
  0x5f   : > { %387 = vmatprep.subr.mxu1 %v2406_v13  ;;  %317 = vmatpush1.msra.mxu0 %v2407_v10 }
  0x60   : > { %388 = vmatpush1.msra.mxu1 %v2408_v12  ;;  %318 = vmatprep.subr.mxu0 %v2409_v7 }
  0x61   : > { %389 = vmatprep.subr.mxu1 %v2410_v9  ;;  %319 = vmatpush1.msra.mxu0 %v2413_v6  ;;  %v113_v9 = vld [vmem:[%s1826_s18 + $0x18] sm:$0xff] }
  0x62   : > { %390 = vmatpush1.msra.mxu1 %v2414_v8  ;;  %320 = vmatprep.subr.mxu0 %v2416_v3  ;;  %v111_v3 = vld [vmem:[%s1826_s18 + $0x8] sm:$0xff] }
  0x63   : > { %391 = vmatprep.subr.mxu1 %v2417_v5  ;;  %321 = vmatpush1.msra.mxu0 %v2418_v2  ;;  %v110_v2 = vld [vmem:[%s1826_s18] sm:$0xff] }
  0x64   : > { %354 = vmatprep.mubr.f32.mxu0 %v2424_v11  ;;  %392 = vmatpush1.msra.mxu1 %v2415_v4  ;;  %v112_v4 = vld [vmem:[%s1826_s18 + $0x10] sm:$0xff] }
  0x65   : > { %425 = vmatprep.mubr.f32.mxu1 %v2424_v11  ;;  %466 = vmatprep.subr.mxu0 %v2412_v63 }
  0x66   : > { %537 = vmatprep.subr.mxu1 %v2411_v1 }
 0x102   : > { %v180_v5 = vpop.f32.mrf.mxu0 }
 0x103   : > { %v256_v8 = vadd.f32 %v180_v5, %v110_v2 }
 0x104   : > { %v182_v11 = vpop.f32.mrf.mxu0  ;;  %v251_v6 = vpop.f32.mrf.mxu1 }
 0x105   : > { %1262 = vtanh.f32 %v256_v8  ;;  %v257_v63 = vadd.f32 %v182_v11, %v111_v3  ;;  %v258_v1 = vadd.f32 %v251_v6, %v112_v4  ;;  %v2426_v11 = vld [vmem:[#allocation23_spill] sm:$0xff] }
 0x106   : > { %v253_v7 = vpop.f32.mrf.mxu1 }
 0x107   : > { %1264 = vtanh.f32 %v257_v63  ;;  %v259_v12 = vadd.f32 %v253_v7, %v113_v9  ;;  %v2435_v63 = vld [vmem:[#allocation10_spill] sm:$0xff] }
 0x108   : > { %1266 = vtanh.f32 %v258_v1  ;;  %v2436_v1 = vld [vmem:[#allocation12_spill] sm:$0xff] }
 0x109   : > { %1268 = vtanh.f32 %v259_v12  ;;  %v2427_v12 = vld [vmem:[#allocation18_spill] sm:$0xff] }
 0x112   : > { %v1263_v10 = vpop.eup %1262 }
 0x113   : > { %v264_v13 = vmul.f32 0.5, %v1263_v10  ;;  %v2425_v10 = vld [vmem:[#allocation21_spill] sm:$0xff] }
 0x114   : > { %v1265_v16 = vpop.eup %1264 }
 0x115   : > { %v265_v14 = vadd.f32 0.5, %v264_v13  ;;  %v266_v19 = vmul.f32 0.5, %v1265_v16  ;;  %v1267_v15 = vpop.eup %1266  ;;  %v2428_v13 = vld [vmem:[#allocation20_spill] sm:$0xff]  ;;  %v2431_v16 = vld [vmem:[#allocation14_spill] sm:$0xff] }
 0x116   : > { %v1269_v3 = vpop.eup %1268 }
 0x117   : > { %v267_v2 = vadd.f32 0.5, %v266_v19  ;;  %v271_v18 = vmul.f32 %v1267_v15, %v265_v14  ;;  %v268_v4 = vmul.f32 0.5, %v1269_v3  ;;  %v2429_v14 = vld [vmem:[#allocation17_spill] sm:$0xff]  ;;  %v2430_v15 = vld [vmem:[#allocation19_spill] sm:$0xff]  ;;  %v2439_v3 = vld [vmem:[#allocation6_spill] sm:$0xff] }
 0x118   : > { %v2433_v19 = vld [vmem:[#allocation13_spill] sm:$0xff] }
 0x119   : > { %v270_v5 = vmul.f32 %v267_v2, %v106_v20  ;;  %v269_v6 = vadd.f32 0.5, %v268_v4  ;;  %v2434_v20 = vld [vmem:[#allocation15_spill] sm:$0xff]  ;;  %v2437_v2 = vld [vmem:[#allocation9_spill] sm:$0xff]  ;;  %v2440_v4 = vld [vmem:[#allocation8_spill] sm:$0xff] }
 0x11b   : > { %v1832_v8 = vadd.f32 %v271_v18, %v270_v5  ;;  %v2432_v18 = vld [vmem:[#allocation16_spill] sm:$0xff]  ;;  %v2438_v5 = vld [vmem:[#allocation11_spill] sm:$0xff] }
 0x11d   : > { %1270 = vtanh.f32 %v1832_v8 }
 0x12a   : > { %v1271_v7 = vpop.eup %1270 }
 0x12b   : > { %v274_v9 = vmul.f32 %v1271_v7, %v269_v6  ;;  %v2441_v6 = vld [vmem:[#allocation5_spill] sm:$0xff]  ;;  %v2442_v7 = vmov 0.0  }
 0x12d   : > { %277 = vst [vmem:[%s1836_s20] sm:$0xff] %v274_v9  ;;  %355 = vmatmul.mubr.f32.vlgmr.msra.gmra.mxu0 %v274_v9  ;;  %426 = vmatmul.mubr.f32.vlgmr.msra.gmra.mxu1 %v274_v9  ;;  %v2443_v9 = vld [vmem:[#allocation7_spill] sm:$0xff] }
 0x12e   : > { %467 = vmatpush1.msra.mxu0 %v1666_v62  ;;  %538 = vmatpush1.msra.mxu1 %v1676_v0 }
 0x12f   : > { %468 = vmatprep.subr.mxu0 %v1651_v59  ;;  %539 = vmatprep.subr.mxu1 %v1661_v61 }
 0x130   : > { %469 = vmatpush1.msra.mxu0 %v1646_v58  ;;  %540 = vmatpush1.msra.mxu1 %v1656_v60 }
 0x131   : > { %470 = vmatprep.subr.mxu0 %v1631_v55  ;;  %541 = vmatprep.subr.mxu1 %v1641_v57 }
 0x132   : > { %471 = vmatpush1.msra.mxu0 %v1626_v54  ;;  %542 = vmatpush1.msra.mxu1 %v1636_v56 }
 0x133   : > { %472 = vmatprep.subr.mxu0 %v1611_v51  ;;  %543 = vmatprep.subr.mxu1 %v1621_v53 }
 0x134   : > { %473 = vmatpush1.msra.mxu0 %v1606_v50  ;;  %544 = vmatpush1.msra.mxu1 %v1616_v52 }
 0x135   : > { %474 = vmatprep.subr.mxu0 %v1591_v47  ;;  %545 = vmatprep.subr.mxu1 %v1601_v49 }
 0x136   : > { %475 = vmatpush1.msra.mxu0 %v1586_v46  ;;  %546 = vmatpush1.msra.mxu1 %v1596_v48 }
 0x137   : > { %476 = vmatprep.subr.mxu0 %v1571_v43  ;;  %547 = vmatprep.subr.mxu1 %v1581_v45 }
 0x138   : > { %477 = vmatpush1.msra.mxu0 %v1566_v42  ;;  %548 = vmatpush1.msra.mxu1 %v1576_v44 }
 0x139   : > { %478 = vmatprep.subr.mxu0 %v1551_v39  ;;  %549 = vmatprep.subr.mxu1 %v1561_v41 }
 0x13a   : > { %479 = vmatpush1.msra.mxu0 %v1546_v38  ;;  %550 = vmatpush1.msra.mxu1 %v1556_v40 }
 0x13b   : > { %480 = vmatprep.subr.mxu0 %v1531_v35  ;;  %551 = vmatprep.subr.mxu1 %v1541_v37 }
 0x13c   : > { %481 = vmatpush1.msra.mxu0 %v1526_v34  ;;  %552 = vmatpush1.msra.mxu1 %v1536_v36 }
 0x13d   : > { %482 = vmatprep.subr.mxu0 %v1511_v31  ;;  %553 = vmatprep.subr.mxu1 %v1521_v33 }
 0x13e   : > { %483 = vmatpush1.msra.mxu0 %v1506_v30  ;;  %554 = vmatpush1.msra.mxu1 %v1516_v32 }
 0x13f   : > { %484 = vmatprep.subr.mxu0 %v1491_v27  ;;  %555 = vmatprep.subr.mxu1 %v1501_v29 }
 0x140   : > { %485 = vmatpush1.msra.mxu0 %v1486_v26  ;;  %556 = vmatpush1.msra.mxu1 %v1496_v28 }
 0x141   : > { %486 = vmatprep.subr.mxu0 %v1471_v23  ;;  %557 = vmatprep.subr.mxu1 %v1481_v25 }
 0x142   : > { %487 = vmatpush1.msra.mxu0 %v1466_v22  ;;  %558 = vmatpush1.msra.mxu1 %v1476_v24 }
 0x143   : > { %488 = vmatprep.subr.mxu0 %v2422_v17  ;;  %559 = vmatprep.subr.mxu1 %v1461_v21 }
 0x144   : > { %489 = vmatpush1.msra.mxu0 %v2425_v10  ;;  %560 = vmatpush1.msra.mxu1 %v2426_v11 }
 0x145   : > { %490 = vmatprep.subr.mxu0 %v2427_v12  ;;  %561 = vmatprep.subr.mxu1 %v2428_v13 }
 0x146   : > { %491 = vmatpush1.msra.mxu0 %v2429_v14  ;;  %562 = vmatpush1.msra.mxu1 %v2430_v15 }
 0x147   : > { %492 = vmatprep.subr.mxu0 %v2431_v16  ;;  %563 = vmatprep.subr.mxu1 %v2432_v18 }
 0x148   : > { %493 = vmatpush1.msra.mxu0 %v2433_v19  ;;  %564 = vmatpush1.msra.mxu1 %v2434_v20 }
 0x149   : > { %494 = vmatprep.subr.mxu0 %v2435_v63  ;;  %565 = vmatprep.subr.mxu1 %v2436_v1  ;;  %v2444_v63 = vld [vmem:[#allocation24_spill] sm:$0xff]  ;;  %v2445_v1 = vld [vmem:[#allocation25_spill] sm:$0xff] }
 0x14a   : > { %495 = vmatpush1.msra.mxu0 %v2437_v2  ;;  %566 = vmatpush1.msra.mxu1 %v2438_v5  ;;  %v1218_v2 = vld [vmem:[%s1826_s18 + $0x20] sm:$0xff]  ;;  %v1219_v5 = vld [vmem:[%s1826_s18 + $0x28] sm:$0xff] }
 0x14b   : > { %496 = vmatprep.subr.mxu0 %v2439_v3  ;;  %567 = vmatprep.subr.mxu1 %v2440_v4  ;;  %v1220_v3 = vld [vmem:[%s1826_s18 + $0x30] sm:$0xff] }
 0x14c   : > { %497 = vmatpush1.msra.mxu0 %v2441_v6  ;;  %530 = vmatprep.mubr.f32.mxu0 %v2442_v7 }
 0x14d   : > { %568 = vmatpush1.msra.mxu1 %v2443_v9  ;;  %601 = vmatprep.mubr.f32.mxu1 %v2442_v7  ;;  %v1221_v9 = vld [vmem:[%s1826_s18 + $0x38] sm:$0xff] }
 0x14e   : > { %642 = vmatprep.subr.mxu0 %v2444_v63  ;;  %713 = vmatprep.subr.mxu1 %v2445_v1 }
 0x1ed   : > { %v356_v20 = vpop.f32.mrf.mxu0  ;;  %v427_v18 = vpop.f32.mrf.mxu1 }
 0x1ee   : > { %v432_v19 = vadd.f32 %v1218_v2, %v356_v20  ;;  %v434_v16 = vadd.f32 %v1220_v3, %v427_v18 }
 0x1ef   : > { %v358_v4 = vpop.f32.mrf.mxu0  ;;  %v429_v15 = vpop.f32.mrf.mxu1 }
 0x1f0   : > { %1272 = vtanh.f32 %v432_v19  ;;  %v433_v6 = vadd.f32 %v1219_v5, %v358_v4  ;;  %v435_v14 = vadd.f32 %v1221_v9, %v429_v15  ;;  %v2452_v4 = vld [vmem:[#allocation14_spill] sm:$0xff] }
 0x1f1   : > { %v2456_v9 = vld [vmem:[#allocation10_spill] sm:$0xff] }
 0x1f2   : > { %1274 = vtanh.f32 %v433_v6  ;;  %v2453_v6 = vld [vmem:[#allocation16_spill] sm:$0xff] }
 0x1f3   : > { %1276 = vtanh.f32 %v434_v16 }
 0x1f4   : > { %1278 = vtanh.f32 %v435_v14  ;;  %v2451_v14 = vld [vmem:[#allocation19_spill] sm:$0xff] }
 0x1fd   : > { %v1273_v7 = vpop.eup %1272 }
 0x1fe   : > { %v440_v13 = vmul.f32 0.5, %v1273_v7  ;;  %v2455_v7 = vld [vmem:[#allocation15_spill] sm:$0xff] }
 0x1ff   : > { %v1275_v63 = vpop.eup %1274 }
 0x200   : > { %v441_v1 = vadd.f32 0.5, %v440_v13  ;;  %v442_v12 = vmul.f32 0.5, %v1275_v63  ;;  %v1277_v20 = vpop.eup %1276  ;;  %v2450_v13 = vld [vmem:[#allocation17_spill] sm:$0xff]  ;;  %v2457_v63 = vld [vmem:[#allocation12_spill] sm:$0xff] }
 0x201   : > { %v1279_v16 = vpop.eup %1278 }
 0x202   : > { %v443_v11 = vadd.f32 0.5, %v442_v12  ;;  %v447_v10 = vmul.f32 %v1277_v20, %v441_v1  ;;  %v444_v18 = vmul.f32 0.5, %v1279_v16  ;;  %v2449_v12 = vld [vmem:[#allocation20_spill] sm:$0xff]  ;;  %v2458_v1 = vld [vmem:[#allocation9_spill] sm:$0xff]  ;;  %v2459_v20 = vld [vmem:[#allocation11_spill] sm:$0xff] }
 0x203   : > { %v2461_v16 = vld [vmem:[#allocation8_spill] sm:$0xff] }
 0x204   : > { %v446_v2 = vmul.f32 %v443_v11, %v1832_v8  ;;  %v445_v5 = vadd.f32 0.5, %v444_v18  ;;  %v2446_v8 = vld [vmem:[#allocation21_spill] sm:$0xff]  ;;  %v2448_v11 = vld [vmem:[#allocation18_spill] sm:$0xff] }
 0x205   : > { %v2462_v18 = vld [vmem:[#allocation5_spill] sm:$0xff] }
 0x206   : > { %v1910_v19 = vadd.f32 %v447_v10, %v446_v2  ;;  %v2447_v10 = vld [vmem:[#allocation23_spill] sm:$0xff]  ;;  %v2460_v2 = vld [vmem:[#allocation6_spill] sm:$0xff] }
 0x208   : > { %1280 = vtanh.f32 %v1910_v19 }
 0x215   : > { %v1281_v15 = vpop.eup %1280 }
 0x216   : > { %v450_v3 = vmul.f32 %v1281_v15, %v445_v5  ;;  %v2463_v5 = vmov 0.0   ;;  %v2464_v15 = vld [vmem:[#allocation7_spill] sm:$0xff] }
 0x218   : > { %1224 = vst [vmem:[%s1836_s20 + $0x8] sm:$0xff] %v450_v3  ;;  %531 = vmatmul.mubr.f32.vlgmr.msra.gmra.mxu0 %v450_v3  ;;  %602 = vmatmul.mubr.f32.vlgmr.msra.gmra.mxu1 %v450_v3  ;;  %v1227_v3 = vld [vmem:[%s1826_s18 + $0x40] sm:$0xff] }
 0x219   : > { %643 = vmatpush1.msra.mxu0 %v1666_v62  ;;  %714 = vmatpush1.msra.mxu1 %v1676_v0  ;;  %v835_v62 = vld [vmem:[%s2332_s4 + $0x98] sm:$0xff] (%p100_p0)  ;;  %v832_v0 = vld [vmem:[%s2332_s4 + $0x80] sm:$0xff] (%p100_p0) }
 0x21a   : > { %644 = vmatprep.subr.mxu0 %v1651_v59  ;;  %715 = vmatprep.subr.mxu1 %v1661_v61  ;;  %v836_v59 = vld [vmem:[%s2332_s4 + $0xa0] sm:$0xff] (%p100_p0)  ;;  %v833_v61 = vld [vmem:[%s2332_s4 + $0x88] sm:$0xff] (%p100_p0) }
 0x21b   : > { %645 = vmatpush1.msra.mxu0 %v1646_v58  ;;  %716 = vmatpush1.msra.mxu1 %v1656_v60  ;;  %v839_v58 = vld [vmem:[%s2332_s4 + $0xb8] sm:$0xff] (%p100_p0)  ;;  %v838_v60 = vld [vmem:[%s2332_s4 + $0xb0] sm:$0xff] (%p100_p0) }
 0x21c   : > { %646 = vmatprep.subr.mxu0 %v1631_v55  ;;  %717 = vmatprep.subr.mxu1 %v1641_v57  ;;  %v840_v55 = vld [vmem:[%s2332_s4 + $0xc0] sm:$0xff] (%p100_p0)  ;;  %v837_v57 = vld [vmem:[%s2332_s4 + $0xa8] sm:$0xff] (%p100_p0) }
 0x21d   : > { %647 = vmatpush1.msra.mxu0 %v1626_v54  ;;  %718 = vmatpush1.msra.mxu1 %v1636_v56  ;;  %v843_v54 = vld [vmem:[%s2332_s4 + $0xd8] sm:$0xff] (%p100_p0)  ;;  %v842_v56 = vld [vmem:[%s2332_s4 + $0xd0] sm:$0xff] (%p100_p0) }
 0x21e   : > { %648 = vmatprep.subr.mxu0 %v1611_v51  ;;  %719 = vmatprep.subr.mxu1 %v1621_v53  ;;  %v844_v51 = vld [vmem:[%s2332_s4 + $0xe0] sm:$0xff] (%p100_p0)  ;;  %v841_v53 = vld [vmem:[%s2332_s4 + $0xc8] sm:$0xff] (%p100_p0) }
 0x21f   : > { %649 = vmatpush1.msra.mxu0 %v1606_v50  ;;  %720 = vmatpush1.msra.mxu1 %v1616_v52  ;;  %v847_v50 = vld [vmem:[%s2332_s4 + $0xf8] sm:$0xff] (%p100_p0)  ;;  %v846_v52 = vld [vmem:[%s2332_s4 + $0xf0] sm:$0xff] (%p100_p0) }
 0x220   : > { %650 = vmatprep.subr.mxu0 %v1591_v47  ;;  %721 = vmatprep.subr.mxu1 %v1601_v49  ;;  %v848_v47 = vld [vmem:[%s2332_s4 + $0x100] sm:$0xff] (%p100_p0)  ;;  %v845_v49 = vld [vmem:[%s2332_s4 + $0xe8] sm:$0xff] (%p100_p0) }
 0x221   : > { %651 = vmatpush1.msra.mxu0 %v1586_v46  ;;  %722 = vmatpush1.msra.mxu1 %v1596_v48  ;;  %v851_v46 = vld [vmem:[%s2332_s4 + $0x118] sm:$0xff] (%p100_p0)  ;;  %v850_v48 = vld [vmem:[%s2332_s4 + $0x110] sm:$0xff] (%p100_p0) }
 0x222   : > { %652 = vmatprep.subr.mxu0 %v1571_v43  ;;  %723 = vmatprep.subr.mxu1 %v1581_v45  ;;  %v852_v43 = vld [vmem:[%s2332_s4 + $0x120] sm:$0xff] (%p100_p0)  ;;  %v849_v45 = vld [vmem:[%s2332_s4 + $0x108] sm:$0xff] (%p100_p0) }
 0x223   : > { %653 = vmatpush1.msra.mxu0 %v1566_v42  ;;  %724 = vmatpush1.msra.mxu1 %v1576_v44  ;;  %v855_v42 = vld [vmem:[%s2332_s4 + $0x138] sm:$0xff] (%p100_p0)  ;;  %v854_v44 = vld [vmem:[%s2332_s4 + $0x130] sm:$0xff] (%p100_p0) }
 0x224   : > { %654 = vmatprep.subr.mxu0 %v1551_v39  ;;  %725 = vmatprep.subr.mxu1 %v1561_v41  ;;  %v856_v39 = vld [vmem:[%s2332_s4 + $0x140] sm:$0xff] (%p100_p0)  ;;  %v853_v41 = vld [vmem:[%s2332_s4 + $0x128] sm:$0xff] (%p100_p0) }
 0x225   : > { %655 = vmatpush1.msra.mxu0 %v1546_v38  ;;  %726 = vmatpush1.msra.mxu1 %v1556_v40  ;;  %v859_v38 = vld [vmem:[%s2332_s4 + $0x158] sm:$0xff] (%p100_p0)  ;;  %v858_v40 = vld [vmem:[%s2332_s4 + $0x150] sm:$0xff] (%p100_p0) }
 0x226   : > { %656 = vmatprep.subr.mxu0 %v1531_v35  ;;  %727 = vmatprep.subr.mxu1 %v1541_v37  ;;  %v860_v35 = vld [vmem:[%s2332_s4 + $0x160] sm:$0xff] (%p100_p0)  ;;  %v857_v37 = vld [vmem:[%s2332_s4 + $0x148] sm:$0xff] (%p100_p0) }
 0x227   : > { %657 = vmatpush1.msra.mxu0 %v1526_v34  ;;  %728 = vmatpush1.msra.mxu1 %v1536_v36  ;;  %v863_v34 = vld [vmem:[%s2332_s4 + $0x178] sm:$0xff] (%p100_p0)  ;;  %v862_v36 = vld [vmem:[%s2332_s4 + $0x170] sm:$0xff] (%p100_p0) }
 0x228   : > { %658 = vmatprep.subr.mxu0 %v1511_v31  ;;  %729 = vmatprep.subr.mxu1 %v1521_v33  ;;  %v864_v31 = vld [vmem:[%s2332_s4 + $0x180] sm:$0xff] (%p100_p0)  ;;  %v861_v33 = vld [vmem:[%s2332_s4 + $0x168] sm:$0xff] (%p100_p0) }
 0x229   : > { %659 = vmatpush1.msra.mxu0 %v1506_v30  ;;  %730 = vmatpush1.msra.mxu1 %v1516_v32  ;;  %v867_v30 = vld [vmem:[%s2332_s4 + $0x198] sm:$0xff] (%p100_p0)  ;;  %v866_v32 = vld [vmem:[%s2332_s4 + $0x190] sm:$0xff] (%p100_p0) }
 0x22a   : > { %660 = vmatprep.subr.mxu0 %v1491_v27  ;;  %731 = vmatprep.subr.mxu1 %v1501_v29  ;;  %v868_v27 = vld [vmem:[%s2332_s4 + $0x1a0] sm:$0xff] (%p100_p0)  ;;  %v865_v29 = vld [vmem:[%s2332_s4 + $0x188] sm:$0xff] (%p100_p0) }
 0x22b   : > { %661 = vmatpush1.msra.mxu0 %v1486_v26  ;;  %732 = vmatpush1.msra.mxu1 %v1496_v28  ;;  %v871_v26 = vld [vmem:[%s2332_s4 + $0x1b8] sm:$0xff] (%p100_p0)  ;;  %v870_v28 = vld [vmem:[%s2332_s4 + $0x1b0] sm:$0xff] (%p100_p0) }
 0x22c   : > { %662 = vmatprep.subr.mxu0 %v1471_v23  ;;  %733 = vmatprep.subr.mxu1 %v1481_v25  ;;  %v872_v23 = vld [vmem:[%s2332_s4 + $0x1c0] sm:$0xff] (%p100_p0)  ;;  %v869_v25 = vld [vmem:[%s2332_s4 + $0x1a8] sm:$0xff] (%p100_p0) }
 0x22d   : > { %663 = vmatpush1.msra.mxu0 %v1466_v22  ;;  %734 = vmatpush1.msra.mxu1 %v1476_v24  ;;  %v875_v22 = vld [vmem:[%s2332_s4 + $0x1d8] sm:$0xff] (%p100_p0)  ;;  %v874_v24 = vld [vmem:[%s2332_s4 + $0x1d0] sm:$0xff] (%p100_p0) }
 0x22e   : > { %664 = vmatprep.subr.mxu0 %v2422_v17  ;;  %735 = vmatprep.subr.mxu1 %v1461_v21  ;;  %v2454_v17 = vld [vmem:[#allocation13_spill] sm:$0xff]  ;;  %v873_v21 = vld [vmem:[%s2332_s4 + $0x1c8] sm:$0xff] (%p100_p0) }
 0x22f   : > { %665 = vmatpush1.msra.mxu0 %v2446_v8  ;;  %736 = vmatpush1.msra.mxu1 %v2447_v10  ;;  %v1228_v10 = vld [vmem:[%s1826_s18 + $0x48] sm:$0xff] }
 0x230   : > { %666 = vmatprep.subr.mxu0 %v2448_v11  ;;  %737 = vmatprep.subr.mxu1 %v2449_v12  ;;  %v1229_v12 = vld [vmem:[%s1826_s18 + $0x50] sm:$0xff] }
 0x231   : > { %667 = vmatpush1.msra.mxu0 %v2450_v13  ;;  %738 = vmatpush1.msra.mxu1 %v2451_v14 }
 0x232   : > { %668 = vmatprep.subr.mxu0 %v2452_v4  ;;  %739 = vmatprep.subr.mxu1 %v2453_v6 }
 0x233   : > { %669 = vmatpush1.msra.mxu0 %v2454_v17  ;;  %740 = vmatpush1.msra.mxu1 %v2455_v7  ;;  %v1230_v17 = vld [vmem:[%s1826_s18 + $0x58] sm:$0xff] }
 0x234   : > { %670 = vmatprep.subr.mxu0 %v2456_v9  ;;  %741 = vmatprep.subr.mxu1 %v2457_v63 }
 0x235   : > { %671 = vmatpush1.msra.mxu0 %v2458_v1  ;;  %742 = vmatpush1.msra.mxu1 %v2459_v20 }
 0x236   : > { %672 = vmatprep.subr.mxu0 %v2460_v2  ;;  %743 = vmatprep.subr.mxu1 %v2461_v16 }
 0x237   : > { %673 = vmatpush1.msra.mxu0 %v2462_v18  ;;  %706 = vmatprep.mubr.f32.mxu0 %v2463_v5 }
 0x238   : > { %744 = vmatpush1.msra.mxu1 %v2464_v15  ;;  %777 = vmatprep.mubr.f32.mxu1 %v2463_v5 }
 0x2d8   : > { %v532_v8 = vpop.f32.mrf.mxu0  ;;  %v603_v13 = vpop.f32.mrf.mxu1 }
 0x2d9   : > { %v608_v11 = vadd.f32 %v1227_v3, %v532_v8  ;;  %v610_v6 = vadd.f32 %v1229_v12, %v603_v13 }
 0x2da   : > { %v534_v14 = vpop.f32.mrf.mxu0  ;;  %v605_v7 = vpop.f32.mrf.mxu1 }
 0x2db   : > { %1282 = vtanh.f32 %v608_v11  ;;  %v609_v4 = vadd.f32 %v1228_v10, %v534_v14  ;;  %v611_v9 = vadd.f32 %v1230_v17, %v605_v7  ;;  %v1237_v17 = vld [vmem:[%s1826_s18 + $0x68] sm:$0xff] }
 0x2dd   : > { %1284 = vtanh.f32 %v609_v4  ;;  %v1236_v4 = vld [vmem:[%s1826_s18 + $0x60] sm:$0xff] }
 0x2de   : > { %1286 = vtanh.f32 %v610_v6 }
 0x2df   : > { %1288 = vtanh.f32 %v611_v9  ;;  %v1238_v9 = vld [vmem:[%s1826_s18 + $0x70] sm:$0xff] }
 0x2e8   : > { %v1283_v63 = vpop.eup %1282 }
 0x2e9   : > { %v616_v1 = vmul.f32 0.5, %v1283_v63 }
 0x2ea   : > { %v1285_v20 = vpop.eup %1284 }
 0x2eb   : > { %v617_v2 = vadd.f32 0.5, %v616_v1  ;;  %v618_v16 = vmul.f32 0.5, %v1285_v20  ;;  %v1287_v5 = vpop.eup %1286 }
 0x2ec   : > { %v1289_v10 = vpop.eup %1288 }
 0x2ed   : > { %v619_v18 = vadd.f32 0.5, %v618_v16  ;;  %v623_v3 = vmul.f32 %v1287_v5, %v617_v2  ;;  %v620_v11 = vmul.f32 0.5, %v1289_v10  ;;  %v1239_v2 = vld [vmem:[%s1826_s18 + $0x78] sm:$0xff] }
 0x2ef   : > { %v622_v15 = vmul.f32 %v619_v18, %v1910_v19  ;;  %v621_v12 = vadd.f32 0.5, %v620_v11 }
 0x2f1   : > { %v624_v8 = vadd.f32 %v623_v3, %v622_v15 }
 0x2f3   : > { %1290 = vtanh.f32 %v624_v8 }
 0x300   : > { %v1291_v13 = vpop.eup %1290 }
 0x301   : > { %v626_v14 = vmul.f32 %v1291_v13, %v621_v12 }
 0x303   : > { %1233 = vst [vmem:[%s1836_s20 + $0x10] sm:$0xff] %v626_v14  ;;  %707 = vmatmul.mubr.f32.vlgmr.msra.gmra.mxu0 %v626_v14  ;;  %778 = vmatmul.mubr.f32.vlgmr.msra.gmra.mxu1 %v626_v14 }
 0x3c3   : > { %v708_v6 = vpop.f32.mrf.mxu0  ;;  %v779_v63 = vpop.f32.mrf.mxu1 }
 0x3c4   : > { %v784_v7 = vadd.f32 %v1236_v4, %v708_v6  ;;  %v786_v20 = vadd.f32 %v1238_v9, %v779_v63 }
 0x3c5   : > { %v710_v19 = vpop.f32.mrf.mxu0  ;;  %v781_v16 = vpop.f32.mrf.mxu1 }
 0x3c6   : > { %1292 = vtanh.f32 %v784_v7  ;;  %v785_v1 = vadd.f32 %v1237_v17, %v710_v19  ;;  %v787_v18 = vadd.f32 %v1239_v2, %v781_v16  ;;  %v878_v2 = vld [vmem:[%s2332_s4 + $0x1f0] sm:$0xff] (%p100_p0) }
 0x3c7   :  { %v834_v16 = vld [vmem:[%s2332_s4 + $0x90] sm:$0xff] (%p100_p0) }
 0x3c8   : > { %1294 = vtanh.f32 %v785_v1  ;;  %v879_v1 = vld [vmem:[%s2332_s4 + $0x1f8] sm:$0xff] (%p100_p0) }
 0x3c9   : > { %1296 = vtanh.f32 %v786_v20  ;;  %v876_v20 = vld [vmem:[%s2332_s4 + $0x1e0] sm:$0xff] (%p100_p0)  ;;  %1015 = vmatprep.subr.mxu1 (%p100_p0), %v879_v1  ;;  %v1311_v1 = vmov (%p100_p0), 0.0  }
 0x3ca   : > { %1298 = vtanh.f32 %v787_v18  ;;  %1016 = vmatpush1.msra.mxu1 (%p100_p0), %v878_v2  ;;  %v829_v18 = vld [vmem:[%s2332_s4 + $0x68] sm:$0xff] (%p100_p0)  ;;  %966 = vmatprep.mubr.f32.mxu0 (%p100_p0), %v1311_v1 }
 0x3cb   :  { %1017 = vmatprep.subr.mxu1 (%p100_p0), %v875_v22  ;;  %1079 = vmatprep.mubr.f32.mxu1 (%p100_p0), %v1311_v1 }
 0x3cc   :  { %1018 = vmatpush1.msra.mxu1 (%p100_p0), %v874_v24 }
 0x3cd   :  { %1019 = vmatprep.subr.mxu1 (%p100_p0), %v871_v26 }
 0x3ce   :  { %1020 = vmatpush1.msra.mxu1 (%p100_p0), %v870_v28  ;;  %v882_v28 = vlaneseq (%p100_p0) }
 0x3cf   :  { %1021 = vmatprep.subr.mxu1 (%p100_p0), %v867_v30 }
 0x3d0   :  { %1022 = vmatpush1.msra.mxu1 (%p100_p0), %v866_v32  ;;  %v880_v32 = vld [vmem:[%s2333_s5] sm:$0xf] (%p100_p0) }
 0x3d1   :  { %1023 = vmatprep.subr.mxu1 (%p100_p0), %v863_v34 }
 0x3d2   :  { %1024 = vmatpush1.msra.mxu1 (%p100_p0), %v862_v36 }
 0x3d3   : > { %v1293_v5 = vpop.eup %1292  ;;  %1025 = vmatprep.subr.mxu1 (%p100_p0), %v859_v38 }
 0x3d4   : > { %v792_v15 = vmul.f32 0.5, %v1293_v5  ;;  %1026 = vmatpush1.msra.mxu1 (%p100_p0), %v858_v40  ;;  %v831_v5 = vld [vmem:[%s2332_s4 + $0x78] sm:$0xff] (%p100_p0) }
 0x3d5   : > { %v1295_v3 = vpop.eup %1294  ;;  %1027 = vmatprep.subr.mxu1 (%p100_p0), %v855_v42 }
 0x3d6   : > { %v793_v10 = vadd.f32 0.5, %v792_v15  ;;  %v794_v11 = vmul.f32 0.5, %v1295_v3  ;;  %v1297_v13 = vpop.eup %1296  ;;  %1028 = vmatpush1.msra.mxu1 (%p100_p0), %v854_v44  ;;  %v828_v15 = vld [vmem:[%s2332_s4 + $0x60] sm:$0xff] (%p100_p0)  ;;  %v830_v3 = vld [vmem:[%s2332_s4 + $0x70] sm:$0xff] (%p100_p0) }
 0x3d7   : > { %v1299_v17 = vpop.eup %1298  ;;  %1029 = vmatprep.subr.mxu1 (%p100_p0), %v851_v46 }
 0x3d8   : > { %v795_v12 = vadd.f32 0.5, %v794_v11  ;;  %v799_v4 = vmul.f32 %v1297_v13, %v793_v10  ;;  %v796_v7 = vmul.f32 0.5, %v1299_v17  ;;  %1030 = vmatpush1.msra.mxu1 (%p100_p0), %v850_v48  ;;  %v825_v10 = vld [vmem:[%s2332_s4 + $0x48] sm:$0xff] (%p100_p0)  ;;  %v827_v11 = vld [vmem:[%s2332_s4 + $0x58] sm:$0xff] (%p100_p0)  ;;  %v826_v13 = vld [vmem:[%s2332_s4 + $0x50] sm:$0xff] (%p100_p0) }
 0x3d9   :  { %1031 = vmatprep.subr.mxu1 (%p100_p0), %v847_v50  ;;  %v822_v17 = vld [vmem:[%s2332_s4 + $0x30] sm:$0xff] (%p100_p0) }
 0x3da   : > { %v798_v14 = vmul.f32 %v795_v12, %v624_v8  ;;  %v797_v9 = vadd.f32 0.5, %v796_v7  ;;  %v877_v8 = vld [vmem:[%s2332_s4 + $0x1e8] sm:$0xff] (%p100_p0)  ;;  %1032 = vmatpush1.msra.mxu1 (%p100_p0), %v846_v52  ;;  %v824_v12 = vld [vmem:[%s2332_s4 + $0x40] sm:$0xff] (%p100_p0) }
 0x3db   :  { %902 = vmatprep.subr.mxu0 (%p100_p0), %v877_v8  ;;  %1033 = vmatprep.subr.mxu1 (%p100_p0), %v843_v54  ;;  %v817_v7 = vld [vmem:[%s2332_s4 + $0x8] sm:$0xff] (%p100_p0) }
 0x3dc   : > { %v800_v6 = vadd.f32 %v799_v4, %v798_v14  ;;  %903 = vmatpush1.msra.mxu0 (%p100_p0), %v876_v20  ;;  %1034 = vmatpush1.msra.mxu1 (%p100_p0), %v842_v56  ;;  %v821_v14 = vld [vmem:[%s2332_s4 + $0x28] sm:$0xff] (%p100_p0)  ;;  %v823_v4 = vld [vmem:[%s2332_s4 + $0x38] sm:$0xff] (%p100_p0) }
 0x3dd   :  { %904 = vmatprep.subr.mxu0 (%p100_p0), %v873_v21  ;;  %1035 = vmatprep.subr.mxu1 (%p100_p0), %v839_v58 }
 0x3de   : > { %1300 = vtanh.f32 %v800_v6  ;;  %806 = vst [vmem:[#allocation3] sm:$0xff] %v800_v6  ;;  %905 = vmatpush1.msra.mxu0 (%p100_p0), %v872_v23  ;;  %1036 = vmatpush1.msra.mxu1 (%p100_p0), %v838_v60  ;;  %v820_v6 = vld [vmem:[%s2332_s4 + $0x20] sm:$0xff] (%p100_p0) }
 0x3df   :  { %906 = vmatprep.subr.mxu0 (%p100_p0), %v869_v25  ;;  %1037 = vmatprep.subr.mxu1 (%p100_p0), %v835_v62 }
 0x3e0   :  { %907 = vmatpush1.msra.mxu0 (%p100_p0), %v868_v27  ;;  %1038 = vmatpush1.msra.mxu1 (%p100_p0), %v834_v16 }
 0x3e1   :  { %908 = vmatprep.subr.mxu0 (%p100_p0), %v865_v29  ;;  %1039 = vmatprep.subr.mxu1 (%p100_p0), %v831_v5  ;;  %v883_v29 = vshrl.u32 (%p100_p0), %v882_v28, 7 }
 0x3e2   :  { %909 = vmatpush1.msra.mxu0 (%p100_p0), %v864_v31  ;;  %1040 = vmatpush1.msra.mxu1 (%p100_p0), %v830_v3 }
 0x3e3   :  { %910 = vmatprep.subr.mxu0 (%p100_p0), %v861_v33  ;;  %1041 = vmatprep.subr.mxu1 (%p100_p0), %v827_v11  ;;  %v884_v30 = vsub.s32 (%p100_p0), 0, %v883_v29  ;;  %v892_v31 = vsub.s32 (%p100_p0), 2, %v883_v29  ;;  %v888_v33 = vsub.s32 (%p100_p0), 1, %v883_v29  ;;  %v896_v34 = vsub.s32 (%p100_p0), 3, %v883_v29 }
 0x3e4   :  { %911 = vmatpush1.msra.mxu0 (%p100_p0), %v860_v35  ;;  %1042 = vmatpush1.msra.mxu1 (%p100_p0), %v826_v13 }
 0x3e5   :  { %912 = vmatprep.subr.mxu0 (%p100_p0), %v857_v37  ;;  %1043 = vmatprep.subr.mxu1 (%p100_p0), %v823_v4  ;;  %v1165_v27 = vld [vmem:[#allocation3] sm:$0xff] (%p100_p0)  ;;  %v2193_v35 = vrot.slane (%p100_p0), %v880_v32, %v884_v30  ;;  %v2195_v36 = vrot.slane (%p100_p0), %v880_v32, %v892_v31  ;;  %v2197_v37 = vrot.slane (%p100_p0), %v880_v32, %v888_v33 }
 0x3e6   :  { %913 = vmatpush1.msra.mxu0 (%p100_p0), %v856_v39  ;;  %1044 = vmatpush1.msra.mxu1 (%p100_p0), %v822_v17  ;;  %1166 = vst [vmem:[%s2336_s8] sm:$0xff] (%p100_p0), %v1165_v27  ;;  %v2199_v38 = vrot.slane (%p100_p0), %v880_v32, %v896_v34 }
 0x3e7   :  { %914 = vmatprep.subr.mxu0 (%p100_p0), %v853_v41 }
 0x3e8   :  { %915 = vmatpush1.msra.mxu0 (%p100_p0), %v852_v43 }
 0x3e9   :  { %916 = vmatprep.subr.mxu0 (%p100_p0), %v849_v45 }
 0x3ea   :  { %102 = sbr.rel (!%p100_p0) target bundleno = 28 (0x1c), region = 83  ;;  %917 = vmatpush1.msra.mxu0 (%p100_p0), %v848_v47 }
 0x3eb   : > { %v1301_v63 = vpop.eup %1300  ;;  %918 = vmatprep.subr.mxu0 (%p100_p0), %v845_v49 }
 0x3ec   : > { %v802_v19 = vmul.f32 %v1301_v63, %v797_v9  ;;  %919 = vmatpush1.msra.mxu0 (%p100_p0), %v844_v51  ;;  %v819_v9 = vld [vmem:[%s2332_s4 + $0x18] sm:$0xff] (%p100_p0)  ;;  %v816_v63 = vld [vmem:[%s2332_s4] sm:$0xff] (%p100_p0) }
 0x3ed   :  { %920 = vmatprep.subr.mxu0 (%p100_p0), %v841_v53  ;;  %1045 = vmatprep.subr.mxu1 (%p100_p0), %v819_v9 }
 0x3ee   : > { %1242 = vst [vmem:[%s1836_s20 + $0x18] sm:$0xff] %v802_v19  ;;  %807 = vst [vmem:[#allocation2] sm:$0xff] %v802_v19  ;;  %921 = vmatpush1.msra.mxu0 (%p100_p0), %v840_v55  ;;  %v818_v19 = vld [vmem:[%s2332_s4 + $0x10] sm:$0xff] (%p100_p0) }
 0x3ef   :  { %922 = vmatprep.subr.mxu0 %v837_v57  ;;  %1046 = vmatpush1.msra.mxu1 %v818_v19 }
 0x3f0   :  { %923 = vmatpush1.msra.mxu0 %v836_v59 }
 0x3f1   :  { %924 = vmatprep.subr.mxu0 %v833_v61 }
 0x3f2   :  { %925 = vmatpush1.msra.mxu0 %v832_v0 }
 0x3f3   :  { %926 = vmatprep.subr.mxu0 %v829_v18 }
 0x3f4   :  { %927 = vmatpush1.msra.mxu0 %v828_v15 }
 0x3f5   :  { %928 = vmatprep.subr.mxu0 %v825_v10  ;;  %v808_v8 = vld [vmem:[#allocation4] sm:$0xff]  ;;  %v809_v20 = vld [vmem:[#allocation4 + $0x8] sm:$0xff]  ;;  %v810_v2 = vld [vmem:[#allocation4 + $0x10] sm:$0xff] }
 0x3f6   :  { %929 = vmatpush1.msra.mxu0 %v824_v12  ;;  %1080 = vmatmul.mubr.f32.vlgmr.msra.gmra.mxu1 %v808_v8  ;;  %v811_v21 = vld [vmem:[#allocation4 + $0x18] sm:$0xff]  ;;  %v812_v22 = vld [vmem:[#allocation4 + $0x20] sm:$0xff]  ;;  %v813_v23 = vld [vmem:[#allocation4 + $0x28] sm:$0xff] }
 0x3f7   :  { %930 = vmatprep.subr.mxu0 %v821_v14  ;;  %1085 = vmatprep.mubr.f32.mxu1 %v1311_v1  ;;  %v814_v24 = vld [vmem:[#allocation4 + $0x30] sm:$0xff]  ;;  %v815_v25 = vld [vmem:[#allocation4 + $0x38] sm:$0xff] }
 0x3f8   :  { %931 = vmatpush1.msra.mxu0 %v820_v6  ;;  %v1163_v26 = vld [vmem:[#allocation2] sm:$0xff] }
 0x3f9   :  { %932 = vmatprep.subr.mxu0 %v817_v7  ;;  %1164 = vst [vmem:[%s2335_s7] sm:$0xff] %v1163_v26 }
 0x3fa   :  { %933 = vmatpush1.msra.mxu0 %v816_v63  ;;  %1086 = vmatmul.mubr.f32.gmra.mxu1 %v809_v20 }
 0x3fb   :  { %967 = vmatmul.mubr.f32.vlgmr.msra.gmra.mxu0 %v808_v8  ;;  %1091 = vmatprep.mubr.f32.mxu1 %v1311_v1 }
 0x3fc   :  { %972 = vmatprep.mubr.f32.mxu0 %v1311_v1 }
 0x3fe   :  { %1092 = vmatmul.mubr.f32.gmra.mxu1 %v810_v2 }
 0x3ff   :  { %973 = vmatmul.mubr.f32.gmra.mxu0 %v809_v20  ;;  %1097 = vmatprep.mubr.f32.mxu1 %v1311_v1 }
 0x400   :  { %978 = vmatprep.mubr.f32.mxu0 %v1311_v1 }
 0x402   :  { %1098 = vmatmul.mubr.f32.gmra.mxu1 %v811_v21 }
 0x403   :  { %979 = vmatmul.mubr.f32.gmra.mxu0 %v810_v2  ;;  %1103 = vmatprep.mubr.f32.mxu1 %v1311_v1 }
 0x404   :  { %984 = vmatprep.mubr.f32.mxu0 %v1311_v1 }
 0x406   :  { %1104 = vmatmul.mubr.f32.gmra.mxu1 %v812_v22 }
 0x407   :  { %985 = vmatmul.mubr.f32.gmra.mxu0 %v811_v21  ;;  %1109 = vmatprep.mubr.f32.mxu1 %v1311_v1 }
 0x408   :  { %990 = vmatprep.mubr.f32.mxu0 %v1311_v1 }
 0x40a   :  { %1110 = vmatmul.mubr.f32.gmra.mxu1 %v813_v23 }
 0x40b   :  { %991 = vmatmul.mubr.f32.gmra.mxu0 %v812_v22  ;;  %1115 = vmatprep.mubr.f32.mxu1 %v1311_v1 }
 0x40c   :  { %996 = vmatprep.mubr.f32.mxu0 %v1311_v1 }
 0x40e   :  { %1116 = vmatmul.mubr.f32.gmra.mxu1 %v814_v24 }
 0x40f   :  { %997 = vmatmul.mubr.f32.gmra.mxu0 %v813_v23  ;;  %1121 = vmatprep.mubr.f32.mxu1 %v1311_v1 }
 0x410   :  { %1002 = vmatprep.mubr.f32.mxu0 %v1311_v1 }
 0x412   :  { %1122 = vmatmul.mubr.f32.gmra.mxu1 %v815_v25 }
 0x413   :  { %1003 = vmatmul.mubr.f32.gmra.mxu0 %v814_v24 }
 0x414   :  { %1008 = vmatprep.mubr.f32.mxu0 %v1311_v1 }
 0x417   :  { %1009 = vmatmul.mubr.f32.gmra.mxu0 %v815_v25 }
 0x4b6   :  { %v1081_v40 = vpop.f32.mrf.mxu1 }
 0x4b7   :  { %v1082_v42 = vadd.f32 %v1081_v40, %v2195_v36 }
 0x4b8   :  { %v1083_v44 = vpop.f32.mrf.mxu1 }
 0x4b9   :  { %1130 = vst [vmem:[%s2334_s6 + $0x10] sm:$0xff] %v1082_v42  ;;  %v1084_v46 = vadd.f32 %v1083_v44, %v2199_v38 }
 0x4ba   :  { %v1087_v48 = vpop.f32.mrf.mxu1 }
 0x4bb   :  { %v968_v39 = vpop.f32.mrf.mxu0  ;;  %1131 = vst [vmem:[%s2334_s6 + $0x18] sm:$0xff] %v1084_v46  ;;  %v1088_v50 = vadd.f32 %v1087_v48, %v2195_v36 }
 0x4bc   :  { %v969_v41 = vadd.f32 %v968_v39, %v2193_v35  ;;  %v1089_v52 = vpop.f32.mrf.mxu1 }
 0x4bd   :  { %v970_v43 = vpop.f32.mrf.mxu0  ;;  %1134 = vst [vmem:[%s2334_s6 + $0x30] sm:$0xff] %v1088_v50  ;;  %v1090_v54 = vadd.f32 %v1089_v52, %v2199_v38 }
 0x4be   :  { %1128 = vst [vmem:[%s2334_s6] sm:$0xff] %v969_v41  ;;  %v971_v45 = vadd.f32 %v970_v43, %v2197_v37  ;;  %v1093_v56 = vpop.f32.mrf.mxu1 }
 0x4bf   :  { %v974_v47 = vpop.f32.mrf.mxu0  ;;  %1135 = vst [vmem:[%s2334_s6 + $0x38] sm:$0xff] %v1090_v54  ;;  %v1094_v58 = vadd.f32 %v1093_v56, %v2195_v36 }
 0x4c0   :  { %1129 = vst [vmem:[%s2334_s6 + $0x8] sm:$0xff] %v971_v45  ;;  %v975_v49 = vadd.f32 %v974_v47, %v2193_v35  ;;  %v1095_v60 = vpop.f32.mrf.mxu1 }
 0x4c1   :  { %v976_v51 = vpop.f32.mrf.mxu0  ;;  %1138 = vst [vmem:[%s2334_s6 + $0x50] sm:$0xff] %v1094_v58  ;;  %v1096_v62 = vadd.f32 %v1095_v60, %v2199_v38 }
 0x4c2   :  { %1132 = vst [vmem:[%s2334_s6 + $0x20] sm:$0xff] %v975_v49  ;;  %v977_v53 = vadd.f32 %v976_v51, %v2197_v37  ;;  %v1099_v16 = vpop.f32.mrf.mxu1 }
 0x4c3   :  { %v980_v55 = vpop.f32.mrf.mxu0  ;;  %1139 = vst [vmem:[%s2334_s6 + $0x58] sm:$0xff] %v1096_v62  ;;  %v1100_v5 = vadd.f32 %v1099_v16, %v2195_v36 }
 0x4c4   :  { %1133 = vst [vmem:[%s2334_s6 + $0x28] sm:$0xff] %v977_v53  ;;  %v981_v57 = vadd.f32 %v980_v55, %v2193_v35  ;;  %v1101_v3 = vpop.f32.mrf.mxu1 }
 0x4c5   :  { %v982_v59 = vpop.f32.mrf.mxu0  ;;  %1142 = vst [vmem:[%s2334_s6 + $0x70] sm:$0xff] %v1100_v5  ;;  %v1102_v11 = vadd.f32 %v1101_v3, %v2199_v38 }
 0x4c6   :  { %1136 = vst [vmem:[%s2334_s6 + $0x40] sm:$0xff] %v981_v57  ;;  %v983_v61 = vadd.f32 %v982_v59, %v2197_v37  ;;  %v1105_v13 = vpop.f32.mrf.mxu1 }
 0x4c7   :  { %v986_v0 = vpop.f32.mrf.mxu0  ;;  %1143 = vst [vmem:[%s2334_s6 + $0x78] sm:$0xff] %v1102_v11  ;;  %v1106_v4 = vadd.f32 %v1105_v13, %v2195_v36 }
 0x4c8   :  { %1137 = vst [vmem:[%s2334_s6 + $0x48] sm:$0xff] %v983_v61  ;;  %v987_v18 = vadd.f32 %v986_v0, %v2193_v35  ;;  %v1107_v17 = vpop.f32.mrf.mxu1 }
 0x4c9   :  { %v988_v15 = vpop.f32.mrf.mxu0  ;;  %1146 = vst [vmem:[%s2334_s6 + $0x90] sm:$0xff] %v1106_v4  ;;  %v1108_v9 = vadd.f32 %v1107_v17, %v2199_v38 }
 0x4ca   :  { %1140 = vst [vmem:[%s2334_s6 + $0x60] sm:$0xff] %v987_v18  ;;  %v989_v10 = vadd.f32 %v988_v15, %v2197_v37  ;;  %v1111_v19 = vpop.f32.mrf.mxu1 }
 0x4cb   :  { %v992_v12 = vpop.f32.mrf.mxu0  ;;  %1147 = vst [vmem:[%s2334_s6 + $0x98] sm:$0xff] %v1108_v9  ;;  %v1112_v1 = vadd.f32 %v1111_v19, %v2195_v36 }
 0x4cc   :  { %1141 = vst [vmem:[%s2334_s6 + $0x68] sm:$0xff] %v989_v10  ;;  %v993_v14 = vadd.f32 %v992_v12, %v2193_v35  ;;  %v1113_v2 = vpop.f32.mrf.mxu1 }
 0x4cd   :  { %v994_v6 = vpop.f32.mrf.mxu0  ;;  %1150 = vst [vmem:[%s2334_s6 + $0xb0] sm:$0xff] %v1112_v1  ;;  %v1114_v22 = vadd.f32 %v1113_v2, %v2199_v38 }
 0x4ce   :  { %1144 = vst [vmem:[%s2334_s6 + $0x80] sm:$0xff] %v993_v14  ;;  %v995_v7 = vadd.f32 %v994_v6, %v2197_v37  ;;  %v1117_v24 = vpop.f32.mrf.mxu1 }
 0x4cf   :  { %v998_v63 = vpop.f32.mrf.mxu0  ;;  %1151 = vst [vmem:[%s2334_s6 + $0xb8] sm:$0xff] %v1114_v22  ;;  %v1118_v26 = vadd.f32 %v1117_v24, %v2195_v36 }
 0x4d0   :  { %1145 = vst [vmem:[%s2334_s6 + $0x88] sm:$0xff] %v995_v7  ;;  %v999_v8 = vadd.f32 %v998_v63, %v2193_v35  ;;  %v1119_v28 = vpop.f32.mrf.mxu1 }
 0x4d1   :  { %v1000_v20 = vpop.f32.mrf.mxu0  ;;  %1154 = vst [vmem:[%s2334_s6 + $0xd0] sm:$0xff] %v1118_v26  ;;  %v1120_v30 = vadd.f32 %v1119_v28, %v2199_v38 }
 0x4d2   :  { %1148 = vst [vmem:[%s2334_s6 + $0xa0] sm:$0xff] %v999_v8  ;;  %v1001_v21 = vadd.f32 %v1000_v20, %v2197_v37  ;;  %v1123_v32 = vpop.f32.mrf.mxu1 }
 0x4d3   :  { %v1004_v23 = vpop.f32.mrf.mxu0  ;;  %1155 = vst [vmem:[%s2334_s6 + $0xd8] sm:$0xff] %v1120_v30  ;;  %v1124_v34 = vadd.f32 %v1123_v32, %v2195_v36 }
 0x4d4   :  { %1149 = vst [vmem:[%s2334_s6 + $0xa8] sm:$0xff] %v1001_v21  ;;  %v1005_v25 = vadd.f32 %v1004_v23, %v2193_v35  ;;  %v1125_v40 = vpop.f32.mrf.mxu1 }
 0x4d5   :  { %v1006_v27 = vpop.f32.mrf.mxu0  ;;  %1158 = vst [vmem:[%s2334_s6 + $0xf0] sm:$0xff] %v1124_v34  ;;  %v1126_v42 = vadd.f32 %v1125_v40, %v2199_v38 }
 0x4d6   :  { %1152 = vst [vmem:[%s2334_s6 + $0xc0] sm:$0xff] %v1005_v25  ;;  %v1007_v29 = vadd.f32 %v1006_v27, %v2197_v37 }
 0x4d7   :  { %v1010_v31 = vpop.f32.mrf.mxu0  ;;  %1159 = vst [vmem:[%s2334_s6 + $0xf8] sm:$0xff] %v1126_v42 }
 0x4d8   :  { %1153 = vst [vmem:[%s2334_s6 + $0xc8] sm:$0xff] %v1007_v29  ;;  %v1011_v33 = vadd.f32 %v1010_v31, %v2193_v35 }
 0x4d9   :  { %v1012_v39 = vpop.f32.mrf.mxu0 }
 0x4da   :  { %1156 = vst [vmem:[%s2334_s6 + $0xe0] sm:$0xff] %v1011_v33  ;;  %v1013_v41 = vadd.f32 %v1012_v39, %v2197_v37 }
 0x4dc   :  { %1157 = vst [vmem:[%s2334_s6 + $0xe8] sm:$0xff] %v1013_v41 }

// kernel: generative_lstm_forward.5
= control target key start
LH: loop header
LB: loop body
LE: loop exit
PB: predicated region body
PF: predicated region fallthrough
CT: control target
= control target key end

     0   :  { %s1964_s0 = inlined_call_operand.vmem [shape: f32[8,8,512], index: 0, kind: input, shape index: {}]   ;;  %s1965_s1 = inlined_call_operand.vmem [shape: f32[8,128], index: 1, kind: input, shape index: {}]   ;;  %s1966_s3 = inlined_call_operand.vmem [shape: f32[128,512], index: 3, kind: input, shape index: {}]   ;;  %s1967_s4 = inlined_call_operand.vmem [shape: f32[128,128], index: 4, kind: input, shape index: {}]   ;;  %s1968_s5 = inlined_call_operand.vmem [shape: f32[1,128], index: 5, kind: input, shape index: {}]   ;;  %s1969_s6 = inlined_call_operand.vmem [shape: f32[8,8,128], index: 6, kind: output, shape index: {0}]   ;;  %s1970_s7 = inlined_call_operand.vmem [shape: f32[8,128], index: 7, kind: output, shape index: {1}]   ;;  %s1971_s8 = inlined_call_operand.vmem [shape: f32[8,128], index: 8, kind: output, shape index: {2}]   ;;  %s1972_s2 = inlined_call_operand.vmem [shape: f32[8,128], index: 2, kind: input, shape index: {}]  }
   0x1   :  { %v30_v0 = vld [vmem:[%s1965_s1] sm:$0xff]  ;;  %v1262_v3 = vld [vmem:[%s1966_s3 + $0x8] sm:$0xff]  ;;  %v1267_v4 = vld [vmem:[%s1966_s3 + $0x10] sm:$0xff] }
   0x2   :  { %v32_v1 = vld [vmem:[%s1972_s2] sm:$0xff]  ;;  %31 = vst [vmem:[#allocation2] sm:$0xff] %v30_v0  ;;  %2016 = vst [vmem:[#allocation6_spill] sm:$0xff] %v1262_v3  ;;  %v1272_v5 = vld [vmem:[%s1966_s3 + $0x18] sm:$0xff]  ;;  %s1574_s2 = smov 0  }
   0x3   :  { %v1257_v2 = vld [vmem:[%s1966_s3] sm:$0xff]  ;;  %33 = vst [vmem:[#allocation3] sm:$0xff] %v32_v1  ;;  %2017 = vst [vmem:[#allocation7_spill] sm:$0xff] %v1267_v4  ;;  %v1282_v7 = vld [vmem:[%s1966_s3 + $0x28] sm:$0xff] }
   0x4   :  { %2015 = vst [vmem:[#allocation5_spill] sm:$0xff] %v1257_v2  ;;  %2018 = vst [vmem:[#allocation8_spill] sm:$0xff] %v1272_v5  ;;  %v1277_v6 = vld [vmem:[%s1966_s3 + $0x20] sm:$0xff]  ;;  %v1287_v8 = vld [vmem:[%s1966_s3 + $0x30] sm:$0xff] }
   0x5   :  { %2019 = vst [vmem:[#allocation9_spill] sm:$0xff] %v1277_v6  ;;  %2020 = vst [vmem:[#allocation10_spill] sm:$0xff] %v1282_v7  ;;  %v1292_v9 = vld [vmem:[%s1966_s3 + $0x38] sm:$0xff]  ;;  %v1297_v10 = vld [vmem:[%s1966_s3 + $0x40] sm:$0xff] }
   0x6   :  { %2021 = vst [vmem:[#allocation11_spill] sm:$0xff] %v1287_v8  ;;  %2022 = vst [vmem:[#allocation12_spill] sm:$0xff] %v1292_v9  ;;  %v1302_v11 = vld [vmem:[%s1966_s3 + $0x48] sm:$0xff]  ;;  %v1307_v12 = vld [vmem:[%s1966_s3 + $0x50] sm:$0xff] }
   0x7   :  { %2023 = vst [vmem:[#allocation13_spill] sm:$0xff] %v1297_v10  ;;  %2024 = vst [vmem:[#allocation14_spill] sm:$0xff] %v1302_v11  ;;  %v1312_v13 = vld [vmem:[%s1966_s3 + $0x58] sm:$0xff]  ;;  %v1317_v14 = vld [vmem:[%s1966_s3 + $0x60] sm:$0xff] }
   0x8   :  { %2025 = vst [vmem:[#allocation15_spill] sm:$0xff] %v1307_v12  ;;  %2026 = vst [vmem:[#allocation16_spill] sm:$0xff] %v1312_v13  ;;  %v1322_v15 = vld [vmem:[%s1966_s3 + $0x68] sm:$0xff]  ;;  %v1327_v16 = vld [vmem:[%s1966_s3 + $0x70] sm:$0xff] }
   0x9   :  { %2027 = vst [vmem:[#allocation17_spill] sm:$0xff] %v1317_v14  ;;  %2028 = vst [vmem:[#allocation18_spill] sm:$0xff] %v1322_v15  ;;  %v1332_v17 = vld [vmem:[%s1966_s3 + $0x78] sm:$0xff]  ;;  %v1337_v18 = vld [vmem:[%s1966_s3 + $0x80] sm:$0xff] }
   0xa   :  { %2029 = vst [vmem:[#allocation19_spill] sm:$0xff] %v1327_v16  ;;  %2030 = vst [vmem:[#allocation20_spill] sm:$0xff] %v1332_v17  ;;  %v1342_v19 = vld [vmem:[%s1966_s3 + $0x88] sm:$0xff]  ;;  %v1347_v20 = vld [vmem:[%s1966_s3 + $0x90] sm:$0xff] }
   0xb   :  { %2031 = vst [vmem:[#allocation21_spill] sm:$0xff] %v1337_v18  ;;  %2032 = vst [vmem:[#allocation22_spill] sm:$0xff] %v1342_v19  ;;  %v1352_v21 = vld [vmem:[%s1966_s3 + $0x98] sm:$0xff]  ;;  %v1357_v22 = vld [vmem:[%s1966_s3 + $0xa0] sm:$0xff] }
   0xc   :  { %2033 = vst [vmem:[#allocation23_spill] sm:$0xff] %v1347_v20  ;;  %v1362_v23 = vld [vmem:[%s1966_s3 + $0xa8] sm:$0xff]  ;;  %v1367_v24 = vld [vmem:[%s1966_s3 + $0xb0] sm:$0xff]  ;;  %v1372_v25 = vld [vmem:[%s1966_s3 + $0xb8] sm:$0xff] }
   0xd   :  { %v1377_v26 = vld [vmem:[%s1966_s3 + $0xc0] sm:$0xff]  ;;  %v1382_v27 = vld [vmem:[%s1966_s3 + $0xc8] sm:$0xff]  ;;  %v1387_v28 = vld [vmem:[%s1966_s3 + $0xd0] sm:$0xff] }
   0xe   :  { %v1392_v29 = vld [vmem:[%s1966_s3 + $0xd8] sm:$0xff]  ;;  %v1397_v30 = vld [vmem:[%s1966_s3 + $0xe0] sm:$0xff]  ;;  %v1402_v31 = vld [vmem:[%s1966_s3 + $0xe8] sm:$0xff] }
   0xf   :  { %v1407_v32 = vld [vmem:[%s1966_s3 + $0xf0] sm:$0xff]  ;;  %v1412_v33 = vld [vmem:[%s1966_s3 + $0xf8] sm:$0xff]  ;;  %v1417_v34 = vld [vmem:[%s1966_s3 + $0x100] sm:$0xff] }
  0x10   :  { %v1422_v35 = vld [vmem:[%s1966_s3 + $0x108] sm:$0xff]  ;;  %v1427_v36 = vld [vmem:[%s1966_s3 + $0x110] sm:$0xff]  ;;  %v1432_v37 = vld [vmem:[%s1966_s3 + $0x118] sm:$0xff] }
  0x11   :  { %v1437_v38 = vld [vmem:[%s1966_s3 + $0x120] sm:$0xff]  ;;  %v1442_v39 = vld [vmem:[%s1966_s3 + $0x128] sm:$0xff]  ;;  %v1447_v40 = vld [vmem:[%s1966_s3 + $0x130] sm:$0xff] }
  0x12   :  { %v1452_v41 = vld [vmem:[%s1966_s3 + $0x138] sm:$0xff]  ;;  %v1457_v42 = vld [vmem:[%s1966_s3 + $0x140] sm:$0xff]  ;;  %v1462_v43 = vld [vmem:[%s1966_s3 + $0x148] sm:$0xff] }
  0x13   :  { %v1467_v44 = vld [vmem:[%s1966_s3 + $0x150] sm:$0xff]  ;;  %v1472_v45 = vld [vmem:[%s1966_s3 + $0x158] sm:$0xff]  ;;  %v1477_v46 = vld [vmem:[%s1966_s3 + $0x160] sm:$0xff] }
  0x14   :  { %v1482_v47 = vld [vmem:[%s1966_s3 + $0x168] sm:$0xff]  ;;  %v1487_v48 = vld [vmem:[%s1966_s3 + $0x170] sm:$0xff]  ;;  %v1492_v49 = vld [vmem:[%s1966_s3 + $0x178] sm:$0xff] }
  0x15   :  { %v1497_v50 = vld [vmem:[%s1966_s3 + $0x180] sm:$0xff]  ;;  %v1502_v51 = vld [vmem:[%s1966_s3 + $0x188] sm:$0xff]  ;;  %v1507_v52 = vld [vmem:[%s1966_s3 + $0x190] sm:$0xff] }
  0x16   :  { %v1512_v53 = vld [vmem:[%s1966_s3 + $0x198] sm:$0xff]  ;;  %v1517_v54 = vld [vmem:[%s1966_s3 + $0x1a0] sm:$0xff]  ;;  %v1522_v55 = vld [vmem:[%s1966_s3 + $0x1a8] sm:$0xff] }
  0x17   :  { %v1527_v56 = vld [vmem:[%s1966_s3 + $0x1b0] sm:$0xff]  ;;  %v1532_v57 = vld [vmem:[%s1966_s3 + $0x1b8] sm:$0xff]  ;;  %v1537_v58 = vld [vmem:[%s1966_s3 + $0x1c0] sm:$0xff] }
  0x18   :  { %v1542_v59 = vld [vmem:[%s1966_s3 + $0x1c8] sm:$0xff]  ;;  %v1547_v60 = vld [vmem:[%s1966_s3 + $0x1d0] sm:$0xff]  ;;  %v1552_v61 = vld [vmem:[%s1966_s3 + $0x1d8] sm:$0xff] }
  0x19   :  { %v1557_v62 = vld [vmem:[%s1966_s3 + $0x1e0] sm:$0xff]  ;;  %v1562_v63 = vld [vmem:[%s1966_s3 + $0x1e8] sm:$0xff]  ;;  %v1567_v0 = vld [vmem:[%s1966_s3 + $0x1f0] sm:$0xff] }
  0x1a   :  { %2034 = vst [vmem:[#allocation24_spill] sm:$0xff] %v1562_v63  ;;  %v1572_v1 = vld [vmem:[%s1966_s3 + $0x1f8] sm:$0xff] }
  0x1b   :  { %2035 = vst [vmem:[#allocation25_spill] sm:$0xff] %v1572_v1 }
  0x1c LB: > { %v2036_v18 = vld [vmem:[#allocation21_spill] sm:$0xff]  ;;  %v2037_v20 = vld [vmem:[#allocation23_spill] sm:$0xff]  ;;  %v2038_v15 = vld [vmem:[#allocation18_spill] sm:$0xff]  ;;  %s1037_s3 = sshll.u32 %s1200_s2, 7  ;;  %s1038_s19 = sshll.u32 %s1200_s2, 5  ;;  %s1200_s2 = sphi %s1574_s2, %s103_s2  }
  0x1d   : > { %v2039_v14 = vld [vmem:[#allocation17_spill] sm:$0xff]  ;;  %v2040_v16 = vld [vmem:[#allocation19_spill] sm:$0xff]  ;;  %v2041_v13 = vld [vmem:[#allocation16_spill] sm:$0xff]  ;;  %s1717_s18 = scalar_lea.vmem %s1964_s0, %s1037_s3  ;;  %s1727_s20 = scalar_lea.vmem [#allocation4], %s1038_s19 }
  0x1e   : > { %v2042_v10 = vld [vmem:[#allocation13_spill] sm:$0xff]  ;;  %v2043_v12 = vld [vmem:[#allocation15_spill] sm:$0xff]  ;;  %v2044_v7 = vld [vmem:[#allocation10_spill] sm:$0xff]  ;;  %s103_s2 = sadd.s32 1, %s1200_s2  }
  0x1f   : > { %v2045_v9 = vld [vmem:[#allocation12_spill] sm:$0xff]  ;;  %v2048_v6 = vld [vmem:[#allocation9_spill] sm:$0xff]  ;;  %v2049_v8 = vld [vmem:[#allocation11_spill] sm:$0xff]  ;;  %p100_p0 = scmp.ge.s32.totalorder %s103_s2, 2  }
  0x20   : > { %v2050_v4 = vld [vmem:[#allocation7_spill] sm:$0xff]  ;;  %v2051_v3 = vld [vmem:[#allocation6_spill] sm:$0xff]  ;;  %v2052_v5 = vld [vmem:[#allocation8_spill] sm:$0xff] }
  0x21   : > { %v2047_v63 = vld [vmem:[#allocation24_spill] sm:$0xff]  ;;  %v2053_v2 = vld [vmem:[#allocation5_spill] sm:$0xff]  ;;  %v2054_v11 = vld [vmem:[#allocation14_spill] sm:$0xff] }
  0x22   : > { %v2046_v1 = vld [vmem:[#allocation25_spill] sm:$0xff]  ;;  %114 = vmatprep.subr.mxu0 %v2047_v63  ;;  %v2055_v19 = vld [vmem:[#allocation22_spill] sm:$0xff]  ;;  %v2056_v17 = vld [vmem:[#allocation20_spill] sm:$0xff] }
  0x23   : > { %185 = vmatprep.subr.mxu1 %v2046_v1  ;;  %115 = vmatpush1.msra.mxu0 %v1557_v62 }
  0x24   : > { %186 = vmatpush1.msra.mxu1 %v1567_v0  ;;  %116 = vmatprep.subr.mxu0 %v1542_v59 }
  0x25   : > { %187 = vmatprep.subr.mxu1 %v1552_v61  ;;  %117 = vmatpush1.msra.mxu0 %v1537_v58 }
  0x26   : > { %188 = vmatpush1.msra.mxu1 %v1547_v60  ;;  %118 = vmatprep.subr.mxu0 %v1522_v55 }
  0x27   : > { %189 = vmatprep.subr.mxu1 %v1532_v57  ;;  %119 = vmatpush1.msra.mxu0 %v1517_v54 }
  0x28   : > { %190 = vmatpush1.msra.mxu1 %v1527_v56  ;;  %120 = vmatprep.subr.mxu0 %v1502_v51 }
  0x29   : > { %191 = vmatprep.subr.mxu1 %v1512_v53  ;;  %121 = vmatpush1.msra.mxu0 %v1497_v50 }
  0x2a   : > { %192 = vmatpush1.msra.mxu1 %v1507_v52  ;;  %122 = vmatprep.subr.mxu0 %v1482_v47 }
  0x2b   : > { %193 = vmatprep.subr.mxu1 %v1492_v49  ;;  %123 = vmatpush1.msra.mxu0 %v1477_v46 }
  0x2c   : > { %194 = vmatpush1.msra.mxu1 %v1487_v48  ;;  %124 = vmatprep.subr.mxu0 %v1462_v43 }
  0x2d   : > { %195 = vmatprep.subr.mxu1 %v1472_v45  ;;  %125 = vmatpush1.msra.mxu0 %v1457_v42 }
  0x2e   : > { %196 = vmatpush1.msra.mxu1 %v1467_v44  ;;  %126 = vmatprep.subr.mxu0 %v1442_v39 }
  0x2f   : > { %197 = vmatprep.subr.mxu1 %v1452_v41  ;;  %127 = vmatpush1.msra.mxu0 %v1437_v38 }
  0x30   : > { %198 = vmatpush1.msra.mxu1 %v1447_v40  ;;  %128 = vmatprep.subr.mxu0 %v1422_v35 }
  0x31   : > { %199 = vmatprep.subr.mxu1 %v1432_v37  ;;  %129 = vmatpush1.msra.mxu0 %v1417_v34 }
  0x32   : > { %200 = vmatpush1.msra.mxu1 %v1427_v36  ;;  %130 = vmatprep.subr.mxu0 %v1402_v31 }
  0x33   : > { %201 = vmatprep.subr.mxu1 %v1412_v33  ;;  %131 = vmatpush1.msra.mxu0 %v1397_v30 }
  0x34   : > { %202 = vmatpush1.msra.mxu1 %v1407_v32  ;;  %132 = vmatprep.subr.mxu0 %v1382_v27 }
  0x35   : > { %203 = vmatprep.subr.mxu1 %v1392_v29  ;;  %133 = vmatpush1.msra.mxu0 %v1377_v26 }
  0x36   : > { %204 = vmatpush1.msra.mxu1 %v1387_v28  ;;  %134 = vmatprep.subr.mxu0 %v1362_v23 }
  0x37   : > { %205 = vmatprep.subr.mxu1 %v1372_v25  ;;  %135 = vmatpush1.msra.mxu0 %v1357_v22 }
  0x38   : > { %206 = vmatpush1.msra.mxu1 %v1367_v24  ;;  %136 = vmatprep.subr.mxu0 %v2055_v19  ;;  %v1975_v19 = vmov 0.0  }
  0x39   : > { %207 = vmatprep.subr.mxu1 %v1352_v21  ;;  %137 = vmatpush1.msra.mxu0 %v2036_v18 }
  0x3a   : > { %208 = vmatpush1.msra.mxu1 %v2037_v20  ;;  %138 = vmatprep.subr.mxu0 %v2038_v15 }
  0x3b   : > { %209 = vmatprep.subr.mxu1 %v2056_v17  ;;  %139 = vmatpush1.msra.mxu0 %v2039_v14  ;;  %v105_v17 = vld [vmem:[#allocation2] sm:$0xff] }
  0x3c   : > { %210 = vmatpush1.msra.mxu1 %v2040_v16  ;;  %140 = vmatprep.subr.mxu0 %v2054_v11 }
  0x3d   : > { %211 = vmatprep.subr.mxu1 %v2041_v13  ;;  %141 = vmatpush1.msra.mxu0 %v2042_v10 }
  0x3e   : > { %178 = vmatprep.mubr.f32.mxu0 %v1975_v19  ;;  %142 = vmatprep.subr.mxu0 %v2044_v7 }
  0x3f   : > { %212 = vmatpush1.msra.mxu1 %v2043_v12  ;;  %143 = vmatpush1.msra.mxu0 %v2048_v6 }
  0x40   : > { %213 = vmatprep.subr.mxu1 %v2045_v9  ;;  %144 = vmatprep.subr.mxu0 %v2051_v3 }
  0x41   : > { %214 = vmatpush1.msra.mxu1 %v2049_v8  ;;  %145 = vmatpush1.msra.mxu0 %v2053_v2 }
  0x42   : > { %215 = vmatprep.subr.mxu1 %v2052_v5  ;;  %179 = vmatmul.mubr.f32.vlgmr.msra.gmra.mxu0 %v105_v17 }
  0x43   : > { %216 = vmatpush1.msra.mxu1 %v2050_v4  ;;  %249 = vmatprep.mubr.f32.mxu1 %v1975_v19  ;;  %v2058_v19 = vld [vmem:[#allocation20_spill] sm:$0xff] }
  0x44   : > { %290 = vmatprep.subr.mxu0 %v2047_v63  ;;  %250 = vmatmul.mubr.f32.vlgmr.msra.gmra.mxu1 %v105_v17  ;;  %v2057_v17 = vld [vmem:[#allocation22_spill] sm:$0xff] }
  0x45   : > { %361 = vmatprep.subr.mxu1 %v2046_v1  ;;  %291 = vmatpush1.msra.mxu0 %v1557_v62 }
  0x46   : > { %362 = vmatpush1.msra.mxu1 %v1567_v0  ;;  %292 = vmatprep.subr.mxu0 %v1542_v59 }
  0x47   : > { %363 = vmatprep.subr.mxu1 %v1552_v61  ;;  %293 = vmatpush1.msra.mxu0 %v1537_v58 }
  0x48   : > { %364 = vmatpush1.msra.mxu1 %v1547_v60  ;;  %294 = vmatprep.subr.mxu0 %v1522_v55 }
  0x49   : > { %365 = vmatprep.subr.mxu1 %v1532_v57  ;;  %295 = vmatpush1.msra.mxu0 %v1517_v54 }
  0x4a   : > { %366 = vmatpush1.msra.mxu1 %v1527_v56  ;;  %296 = vmatprep.subr.mxu0 %v1502_v51 }
  0x4b   : > { %367 = vmatprep.subr.mxu1 %v1512_v53  ;;  %297 = vmatpush1.msra.mxu0 %v1497_v50 }
  0x4c   : > { %368 = vmatpush1.msra.mxu1 %v1507_v52  ;;  %298 = vmatprep.subr.mxu0 %v1482_v47 }
  0x4d   : > { %369 = vmatprep.subr.mxu1 %v1492_v49  ;;  %299 = vmatpush1.msra.mxu0 %v1477_v46 }
  0x4e   : > { %370 = vmatpush1.msra.mxu1 %v1487_v48  ;;  %300 = vmatprep.subr.mxu0 %v1462_v43 }
  0x4f   : > { %371 = vmatprep.subr.mxu1 %v1472_v45  ;;  %301 = vmatpush1.msra.mxu0 %v1457_v42 }
  0x50   : > { %372 = vmatpush1.msra.mxu1 %v1467_v44  ;;  %302 = vmatprep.subr.mxu0 %v1442_v39 }
  0x51   : > { %373 = vmatprep.subr.mxu1 %v1452_v41  ;;  %303 = vmatpush1.msra.mxu0 %v1437_v38 }
  0x52   : > { %374 = vmatpush1.msra.mxu1 %v1447_v40  ;;  %304 = vmatprep.subr.mxu0 %v1422_v35 }
  0x53   : > { %375 = vmatprep.subr.mxu1 %v1432_v37  ;;  %305 = vmatpush1.msra.mxu0 %v1417_v34 }
  0x54   : > { %376 = vmatpush1.msra.mxu1 %v1427_v36  ;;  %306 = vmatprep.subr.mxu0 %v1402_v31 }
  0x55   : > { %377 = vmatprep.subr.mxu1 %v1412_v33  ;;  %307 = vmatpush1.msra.mxu0 %v1397_v30 }
  0x56   : > { %378 = vmatpush1.msra.mxu1 %v1407_v32  ;;  %308 = vmatprep.subr.mxu0 %v1382_v27 }
  0x57   : > { %379 = vmatprep.subr.mxu1 %v1392_v29  ;;  %309 = vmatpush1.msra.mxu0 %v1377_v26 }
  0x58   : > { %380 = vmatpush1.msra.mxu1 %v1387_v28  ;;  %310 = vmatprep.subr.mxu0 %v1362_v23 }
  0x59   : > { %381 = vmatprep.subr.mxu1 %v1372_v25  ;;  %311 = vmatpush1.msra.mxu0 %v1357_v22 }
  0x5a   : > { %382 = vmatpush1.msra.mxu1 %v1367_v24  ;;  %312 = vmatprep.subr.mxu0 %v2057_v17 }
  0x5b   : > { %383 = vmatprep.subr.mxu1 %v1352_v21  ;;  %313 = vmatpush1.msra.mxu0 %v2036_v18 }
  0x5c   : > { %384 = vmatpush1.msra.mxu1 %v2037_v20  ;;  %314 = vmatprep.subr.mxu0 %v2038_v15  ;;  %v106_v20 = vld [vmem:[#allocation3] sm:$0xff] }
  0x5d   : > { %385 = vmatprep.subr.mxu1 %v2058_v19  ;;  %315 = vmatpush1.msra.mxu0 %v2039_v14 }
  0x5e   : > { %386 = vmatpush1.msra.mxu1 %v2040_v16  ;;  %316 = vmatprep.subr.mxu0 %v2054_v11  ;;  %v2059_v11 = vmov 0.0  }
  0x5f   : > { %387 = vmatprep.subr.mxu1 %v2041_v13  ;;  %317 = vmatpush1.msra.mxu0 %v2042_v10 }
  0x60   : > { %388 = vmatpush1.msra.mxu1 %v2043_v12  ;;  %318 = vmatprep.subr.mxu0 %v2044_v7 }
  0x61   : > { %389 = vmatprep.subr.mxu1 %v2045_v9  ;;  %319 = vmatpush1.msra.mxu0 %v2048_v6  ;;  %v113_v9 = vld [vmem:[%s1717_s18 + $0x18] sm:$0xff] }
  0x62   : > { %390 = vmatpush1.msra.mxu1 %v2049_v8  ;;  %320 = vmatprep.subr.mxu0 %v2051_v3  ;;  %v111_v3 = vld [vmem:[%s1717_s18 + $0x8] sm:$0xff] }
  0x63   : > { %391 = vmatprep.subr.mxu1 %v2052_v5  ;;  %321 = vmatpush1.msra.mxu0 %v2053_v2  ;;  %v110_v2 = vld [vmem:[%s1717_s18] sm:$0xff] }
  0x64   : > { %354 = vmatprep.mubr.f32.mxu0 %v2059_v11  ;;  %392 = vmatpush1.msra.mxu1 %v2050_v4  ;;  %v112_v4 = vld [vmem:[%s1717_s18 + $0x10] sm:$0xff] }
  0x65   : > { %425 = vmatprep.mubr.f32.mxu1 %v2059_v11  ;;  %466 = vmatprep.subr.mxu0 %v2047_v63 }
  0x66   : > { %537 = vmatprep.subr.mxu1 %v2046_v1 }
 0x102   : > { %v180_v5 = vpop.f32.mrf.mxu0 }
 0x103   : > { %v256_v8 = vadd.f32 %v180_v5, %v110_v2 }
 0x104   : > { %v182_v11 = vpop.f32.mrf.mxu0  ;;  %v251_v6 = vpop.f32.mrf.mxu1 }
 0x105   : > { %1154 = vtanh.f32 %v256_v8  ;;  %v257_v63 = vadd.f32 %v182_v11, %v111_v3  ;;  %v258_v1 = vadd.f32 %v251_v6, %v112_v4  ;;  %v2061_v11 = vld [vmem:[#allocation23_spill] sm:$0xff] }
 0x106   : > { %v253_v7 = vpop.f32.mrf.mxu1 }
 0x107   : > { %1156 = vtanh.f32 %v257_v63  ;;  %v259_v12 = vadd.f32 %v253_v7, %v113_v9  ;;  %v2070_v63 = vld [vmem:[#allocation10_spill] sm:$0xff] }
 0x108   : > { %1158 = vtanh.f32 %v258_v1  ;;  %v2071_v1 = vld [vmem:[#allocation12_spill] sm:$0xff] }
 0x109   : > { %1160 = vtanh.f32 %v259_v12  ;;  %v2062_v12 = vld [vmem:[#allocation18_spill] sm:$0xff] }
 0x112   : > { %v1155_v10 = vpop.eup %1154 }
 0x113   : > { %v264_v13 = vmul.f32 0.5, %v1155_v10  ;;  %v2060_v10 = vld [vmem:[#allocation21_spill] sm:$0xff] }
 0x114   : > { %v1157_v16 = vpop.eup %1156 }
 0x115   : > { %v265_v14 = vadd.f32 0.5, %v264_v13  ;;  %v266_v19 = vmul.f32 0.5, %v1157_v16  ;;  %v1159_v15 = vpop.eup %1158  ;;  %v2063_v13 = vld [vmem:[#allocation20_spill] sm:$0xff]  ;;  %v2066_v16 = vld [vmem:[#allocation14_spill] sm:$0xff] }
 0x116   : > { %v1161_v3 = vpop.eup %1160 }
 0x117   : > { %v267_v2 = vadd.f32 0.5, %v266_v19  ;;  %v271_v18 = vmul.f32 %v1159_v15, %v265_v14  ;;  %v268_v4 = vmul.f32 0.5, %v1161_v3  ;;  %v2064_v14 = vld [vmem:[#allocation17_spill] sm:$0xff]  ;;  %v2065_v15 = vld [vmem:[#allocation19_spill] sm:$0xff]  ;;  %v2074_v3 = vld [vmem:[#allocation6_spill] sm:$0xff] }
 0x118   : > { %v2068_v19 = vld [vmem:[#allocation13_spill] sm:$0xff] }
 0x119   : > { %v270_v5 = vmul.f32 %v267_v2, %v106_v20  ;;  %v269_v6 = vadd.f32 0.5, %v268_v4  ;;  %v2069_v20 = vld [vmem:[#allocation15_spill] sm:$0xff]  ;;  %v2072_v2 = vld [vmem:[#allocation9_spill] sm:$0xff]  ;;  %v2075_v4 = vld [vmem:[#allocation8_spill] sm:$0xff] }
 0x11b   : > { %v1723_v8 = vadd.f32 %v271_v18, %v270_v5  ;;  %v2067_v18 = vld [vmem:[#allocation16_spill] sm:$0xff]  ;;  %v2073_v5 = vld [vmem:[#allocation11_spill] sm:$0xff] }
 0x11d   : > { %1162 = vtanh.f32 %v1723_v8 }
 0x12a   : > { %v1163_v7 = vpop.eup %1162 }
 0x12b   : > { %v274_v9 = vmul.f32 %v1163_v7, %v269_v6  ;;  %v2076_v6 = vld [vmem:[#allocation5_spill] sm:$0xff]  ;;  %v2077_v7 = vmov 0.0  }
 0x12d   : > { %277 = vst [vmem:[%s1727_s20] sm:$0xff] %v274_v9  ;;  %355 = vmatmul.mubr.f32.vlgmr.msra.gmra.mxu0 %v274_v9  ;;  %426 = vmatmul.mubr.f32.vlgmr.msra.gmra.mxu1 %v274_v9  ;;  %v2078_v9 = vld [vmem:[#allocation7_spill] sm:$0xff] }
 0x12e   : > { %467 = vmatpush1.msra.mxu0 %v1557_v62  ;;  %538 = vmatpush1.msra.mxu1 %v1567_v0 }
 0x12f   : > { %468 = vmatprep.subr.mxu0 %v1542_v59  ;;  %539 = vmatprep.subr.mxu1 %v1552_v61 }
 0x130   : > { %469 = vmatpush1.msra.mxu0 %v1537_v58  ;;  %540 = vmatpush1.msra.mxu1 %v1547_v60 }
 0x131   : > { %470 = vmatprep.subr.mxu0 %v1522_v55  ;;  %541 = vmatprep.subr.mxu1 %v1532_v57 }
 0x132   : > { %471 = vmatpush1.msra.mxu0 %v1517_v54  ;;  %542 = vmatpush1.msra.mxu1 %v1527_v56 }
 0x133   : > { %472 = vmatprep.subr.mxu0 %v1502_v51  ;;  %543 = vmatprep.subr.mxu1 %v1512_v53 }
 0x134   : > { %473 = vmatpush1.msra.mxu0 %v1497_v50  ;;  %544 = vmatpush1.msra.mxu1 %v1507_v52 }
 0x135   : > { %474 = vmatprep.subr.mxu0 %v1482_v47  ;;  %545 = vmatprep.subr.mxu1 %v1492_v49 }
 0x136   : > { %475 = vmatpush1.msra.mxu0 %v1477_v46  ;;  %546 = vmatpush1.msra.mxu1 %v1487_v48 }
 0x137   : > { %476 = vmatprep.subr.mxu0 %v1462_v43  ;;  %547 = vmatprep.subr.mxu1 %v1472_v45 }
 0x138   : > { %477 = vmatpush1.msra.mxu0 %v1457_v42  ;;  %548 = vmatpush1.msra.mxu1 %v1467_v44 }
 0x139   : > { %478 = vmatprep.subr.mxu0 %v1442_v39  ;;  %549 = vmatprep.subr.mxu1 %v1452_v41 }
 0x13a   : > { %479 = vmatpush1.msra.mxu0 %v1437_v38  ;;  %550 = vmatpush1.msra.mxu1 %v1447_v40 }
 0x13b   : > { %480 = vmatprep.subr.mxu0 %v1422_v35  ;;  %551 = vmatprep.subr.mxu1 %v1432_v37 }
 0x13c   : > { %481 = vmatpush1.msra.mxu0 %v1417_v34  ;;  %552 = vmatpush1.msra.mxu1 %v1427_v36 }
 0x13d   : > { %482 = vmatprep.subr.mxu0 %v1402_v31  ;;  %553 = vmatprep.subr.mxu1 %v1412_v33 }
 0x13e   : > { %483 = vmatpush1.msra.mxu0 %v1397_v30  ;;  %554 = vmatpush1.msra.mxu1 %v1407_v32 }
 0x13f   : > { %484 = vmatprep.subr.mxu0 %v1382_v27  ;;  %555 = vmatprep.subr.mxu1 %v1392_v29 }
 0x140   : > { %485 = vmatpush1.msra.mxu0 %v1377_v26  ;;  %556 = vmatpush1.msra.mxu1 %v1387_v28 }
 0x141   : > { %486 = vmatprep.subr.mxu0 %v1362_v23  ;;  %557 = vmatprep.subr.mxu1 %v1372_v25 }
 0x142   : > { %487 = vmatpush1.msra.mxu0 %v1357_v22  ;;  %558 = vmatpush1.msra.mxu1 %v1367_v24 }
 0x143   : > { %488 = vmatprep.subr.mxu0 %v2057_v17  ;;  %559 = vmatprep.subr.mxu1 %v1352_v21 }
 0x144   : > { %489 = vmatpush1.msra.mxu0 %v2060_v10  ;;  %560 = vmatpush1.msra.mxu1 %v2061_v11 }
 0x145   : > { %490 = vmatprep.subr.mxu0 %v2062_v12  ;;  %561 = vmatprep.subr.mxu1 %v2063_v13 }
 0x146   : > { %491 = vmatpush1.msra.mxu0 %v2064_v14  ;;  %562 = vmatpush1.msra.mxu1 %v2065_v15 }
 0x147   : > { %492 = vmatprep.subr.mxu0 %v2066_v16  ;;  %563 = vmatprep.subr.mxu1 %v2067_v18 }
 0x148   : > { %493 = vmatpush1.msra.mxu0 %v2068_v19  ;;  %564 = vmatpush1.msra.mxu1 %v2069_v20 }
 0x149   : > { %494 = vmatprep.subr.mxu0 %v2070_v63  ;;  %565 = vmatprep.subr.mxu1 %v2071_v1  ;;  %v2079_v63 = vld [vmem:[#allocation24_spill] sm:$0xff]  ;;  %v2080_v1 = vld [vmem:[#allocation25_spill] sm:$0xff] }
 0x14a   : > { %495 = vmatpush1.msra.mxu0 %v2072_v2  ;;  %566 = vmatpush1.msra.mxu1 %v2073_v5  ;;  %v1010_v2 = vld [vmem:[%s1717_s18 + $0x20] sm:$0xff]  ;;  %v1011_v5 = vld [vmem:[%s1717_s18 + $0x28] sm:$0xff] }
 0x14b   : > { %496 = vmatprep.subr.mxu0 %v2074_v3  ;;  %567 = vmatprep.subr.mxu1 %v2075_v4  ;;  %v1012_v3 = vld [vmem:[%s1717_s18 + $0x30] sm:$0xff] }
 0x14c   : > { %497 = vmatpush1.msra.mxu0 %v2076_v6  ;;  %530 = vmatprep.mubr.f32.mxu0 %v2077_v7 }
 0x14d   : > { %568 = vmatpush1.msra.mxu1 %v2078_v9  ;;  %601 = vmatprep.mubr.f32.mxu1 %v2077_v7  ;;  %v1013_v9 = vld [vmem:[%s1717_s18 + $0x38] sm:$0xff] }
 0x14e   : > { %642 = vmatprep.subr.mxu0 %v2079_v63  ;;  %713 = vmatprep.subr.mxu1 %v2080_v1 }
 0x1ed   : > { %v356_v20 = vpop.f32.mrf.mxu0  ;;  %v427_v18 = vpop.f32.mrf.mxu1 }
 0x1ee   : > { %v432_v19 = vadd.f32 %v1010_v2, %v356_v20  ;;  %v434_v16 = vadd.f32 %v1012_v3, %v427_v18 }
 0x1ef   : > { %v358_v4 = vpop.f32.mrf.mxu0  ;;  %v429_v15 = vpop.f32.mrf.mxu1 }
 0x1f0   : > { %1164 = vtanh.f32 %v432_v19  ;;  %v433_v6 = vadd.f32 %v1011_v5, %v358_v4  ;;  %v435_v14 = vadd.f32 %v1013_v9, %v429_v15  ;;  %v2087_v4 = vld [vmem:[#allocation14_spill] sm:$0xff] }
 0x1f1   : > { %v2091_v9 = vld [vmem:[#allocation10_spill] sm:$0xff] }
 0x1f2   : > { %1166 = vtanh.f32 %v433_v6  ;;  %v2088_v6 = vld [vmem:[#allocation16_spill] sm:$0xff] }
 0x1f3   : > { %1168 = vtanh.f32 %v434_v16 }
 0x1f4   : > { %1170 = vtanh.f32 %v435_v14  ;;  %v2086_v14 = vld [vmem:[#allocation19_spill] sm:$0xff] }
 0x1fd   : > { %v1165_v7 = vpop.eup %1164 }
 0x1fe   : > { %v440_v13 = vmul.f32 0.5, %v1165_v7  ;;  %v2090_v7 = vld [vmem:[#allocation15_spill] sm:$0xff] }
 0x1ff   : > { %v1167_v63 = vpop.eup %1166 }
 0x200   : > { %v441_v1 = vadd.f32 0.5, %v440_v13  ;;  %v442_v12 = vmul.f32 0.5, %v1167_v63  ;;  %v1169_v20 = vpop.eup %1168  ;;  %v2085_v13 = vld [vmem:[#allocation17_spill] sm:$0xff]  ;;  %v2092_v63 = vld [vmem:[#allocation12_spill] sm:$0xff] }
 0x201   : > { %v1171_v16 = vpop.eup %1170 }
 0x202   : > { %v443_v11 = vadd.f32 0.5, %v442_v12  ;;  %v447_v10 = vmul.f32 %v1169_v20, %v441_v1  ;;  %v444_v18 = vmul.f32 0.5, %v1171_v16  ;;  %v2084_v12 = vld [vmem:[#allocation20_spill] sm:$0xff]  ;;  %v2093_v1 = vld [vmem:[#allocation9_spill] sm:$0xff]  ;;  %v2094_v20 = vld [vmem:[#allocation11_spill] sm:$0xff] }
 0x203   : > { %v2096_v16 = vld [vmem:[#allocation8_spill] sm:$0xff] }
 0x204   : > { %v446_v2 = vmul.f32 %v443_v11, %v1723_v8  ;;  %v445_v5 = vadd.f32 0.5, %v444_v18  ;;  %v2081_v8 = vld [vmem:[#allocation21_spill] sm:$0xff]  ;;  %v2083_v11 = vld [vmem:[#allocation18_spill] sm:$0xff] }
 0x205   : > { %v2097_v18 = vld [vmem:[#allocation5_spill] sm:$0xff] }
 0x206   : > { %v1801_v19 = vadd.f32 %v447_v10, %v446_v2  ;;  %v2082_v10 = vld [vmem:[#allocation23_spill] sm:$0xff]  ;;  %v2095_v2 = vld [vmem:[#allocation6_spill] sm:$0xff] }
 0x208   : > { %1172 = vtanh.f32 %v1801_v19 }
 0x215   : > { %v1173_v15 = vpop.eup %1172 }
 0x216   : > { %v450_v3 = vmul.f32 %v1173_v15, %v445_v5  ;;  %v2098_v5 = vmov 0.0   ;;  %v2099_v15 = vld [vmem:[#allocation7_spill] sm:$0xff] }
 0x218   : > { %1016 = vst [vmem:[%s1727_s20 + $0x8] sm:$0xff] %v450_v3  ;;  %531 = vmatmul.mubr.f32.vlgmr.msra.gmra.mxu0 %v450_v3  ;;  %602 = vmatmul.mubr.f32.vlgmr.msra.gmra.mxu1 %v450_v3  ;;  %v1019_v3 = vld [vmem:[%s1717_s18 + $0x40] sm:$0xff] }
 0x219   : > { %643 = vmatpush1.msra.mxu0 %v1557_v62  ;;  %714 = vmatpush1.msra.mxu1 %v1567_v0 }
 0x21a   : > { %644 = vmatprep.subr.mxu0 %v1542_v59  ;;  %715 = vmatprep.subr.mxu1 %v1552_v61 }
 0x21b   : > { %645 = vmatpush1.msra.mxu0 %v1537_v58  ;;  %716 = vmatpush1.msra.mxu1 %v1547_v60 }
 0x21c   : > { %646 = vmatprep.subr.mxu0 %v1522_v55  ;;  %717 = vmatprep.subr.mxu1 %v1532_v57 }
 0x21d   : > { %647 = vmatpush1.msra.mxu0 %v1517_v54  ;;  %718 = vmatpush1.msra.mxu1 %v1527_v56 }
 0x21e   : > { %648 = vmatprep.subr.mxu0 %v1502_v51  ;;  %719 = vmatprep.subr.mxu1 %v1512_v53 }
 0x21f   : > { %649 = vmatpush1.msra.mxu0 %v1497_v50  ;;  %720 = vmatpush1.msra.mxu1 %v1507_v52 }
 0x220   : > { %650 = vmatprep.subr.mxu0 %v1482_v47  ;;  %721 = vmatprep.subr.mxu1 %v1492_v49 }
 0x221   : > { %651 = vmatpush1.msra.mxu0 %v1477_v46  ;;  %722 = vmatpush1.msra.mxu1 %v1487_v48 }
 0x222   : > { %652 = vmatprep.subr.mxu0 %v1462_v43  ;;  %723 = vmatprep.subr.mxu1 %v1472_v45 }
 0x223   : > { %653 = vmatpush1.msra.mxu0 %v1457_v42  ;;  %724 = vmatpush1.msra.mxu1 %v1467_v44  ;;  %v1035_v44 = vld [vmem:[%s1968_s5] ss:$0 sm:$0xff] (%p100_p0) }
 0x224   : > { %654 = vmatprep.subr.mxu0 %v1442_v39  ;;  %725 = vmatprep.subr.mxu1 %v1452_v41 }
 0x225   : > { %655 = vmatpush1.msra.mxu0 %v1437_v38  ;;  %726 = vmatpush1.msra.mxu1 %v1447_v40 }
 0x226   : > { %656 = vmatprep.subr.mxu0 %v1422_v35  ;;  %727 = vmatprep.subr.mxu1 %v1432_v37 }
 0x227   : > { %657 = vmatpush1.msra.mxu0 %v1417_v34  ;;  %728 = vmatpush1.msra.mxu1 %v1427_v36 }
 0x228   : > { %658 = vmatprep.subr.mxu0 %v1402_v31  ;;  %729 = vmatprep.subr.mxu1 %v1412_v33  ;;  %v818_v31 = vld [vmem:[%s1967_s4 + $0x10] sm:$0xff] (%p100_p0)  ;;  %v816_v33 = vld [vmem:[%s1967_s4] sm:$0xff] (%p100_p0) }
 0x229   : > { %659 = vmatpush1.msra.mxu0 %v1397_v30  ;;  %730 = vmatpush1.msra.mxu1 %v1407_v32  ;;  %v819_v30 = vld [vmem:[%s1967_s4 + $0x18] sm:$0xff] (%p100_p0)  ;;  %v817_v32 = vld [vmem:[%s1967_s4 + $0x8] sm:$0xff] (%p100_p0) }
 0x22a   : > { %660 = vmatprep.subr.mxu0 %v1382_v27  ;;  %731 = vmatprep.subr.mxu1 %v1392_v29  ;;  %v822_v27 = vld [vmem:[%s1967_s4 + $0x30] sm:$0xff] (%p100_p0)  ;;  %v820_v29 = vld [vmem:[%s1967_s4 + $0x20] sm:$0xff] (%p100_p0) }
 0x22b   : > { %661 = vmatpush1.msra.mxu0 %v1377_v26  ;;  %732 = vmatpush1.msra.mxu1 %v1387_v28  ;;  %v823_v26 = vld [vmem:[%s1967_s4 + $0x38] sm:$0xff] (%p100_p0)  ;;  %v821_v28 = vld [vmem:[%s1967_s4 + $0x28] sm:$0xff] (%p100_p0) }
 0x22c   : > { %662 = vmatprep.subr.mxu0 %v1362_v23  ;;  %733 = vmatprep.subr.mxu1 %v1372_v25  ;;  %v826_v23 = vld [vmem:[%s1967_s4 + $0x50] sm:$0xff] (%p100_p0)  ;;  %v824_v25 = vld [vmem:[%s1967_s4 + $0x40] sm:$0xff] (%p100_p0) }
 0x22d   : > { %663 = vmatpush1.msra.mxu0 %v1357_v22  ;;  %734 = vmatpush1.msra.mxu1 %v1367_v24  ;;  %v827_v22 = vld [vmem:[%s1967_s4 + $0x58] sm:$0xff] (%p100_p0)  ;;  %v825_v24 = vld [vmem:[%s1967_s4 + $0x48] sm:$0xff] (%p100_p0) }
 0x22e   : > { %664 = vmatprep.subr.mxu0 %v2057_v17  ;;  %735 = vmatprep.subr.mxu1 %v1352_v21  ;;  %v2089_v17 = vld [vmem:[#allocation13_spill] sm:$0xff]  ;;  %v828_v21 = vld [vmem:[%s1967_s4 + $0x60] sm:$0xff] (%p100_p0) }
 0x22f   : > { %665 = vmatpush1.msra.mxu0 %v2081_v8  ;;  %736 = vmatpush1.msra.mxu1 %v2082_v10  ;;  %v1020_v10 = vld [vmem:[%s1717_s18 + $0x48] sm:$0xff] }
 0x230   : > { %666 = vmatprep.subr.mxu0 %v2083_v11  ;;  %737 = vmatprep.subr.mxu1 %v2084_v12  ;;  %v1021_v12 = vld [vmem:[%s1717_s18 + $0x50] sm:$0xff] }
 0x231   : > { %667 = vmatpush1.msra.mxu0 %v2085_v13  ;;  %738 = vmatpush1.msra.mxu1 %v2086_v14 }
 0x232   : > { %668 = vmatprep.subr.mxu0 %v2087_v4  ;;  %739 = vmatprep.subr.mxu1 %v2088_v6 }
 0x233   : > { %669 = vmatpush1.msra.mxu0 %v2089_v17  ;;  %740 = vmatpush1.msra.mxu1 %v2090_v7  ;;  %v1022_v17 = vld [vmem:[%s1717_s18 + $0x58] sm:$0xff] }
 0x234   : > { %670 = vmatprep.subr.mxu0 %v2091_v9  ;;  %741 = vmatprep.subr.mxu1 %v2092_v63 }
 0x235   : > { %671 = vmatpush1.msra.mxu0 %v2093_v1  ;;  %742 = vmatpush1.msra.mxu1 %v2094_v20 }
 0x236   : > { %672 = vmatprep.subr.mxu0 %v2095_v2  ;;  %743 = vmatprep.subr.mxu1 %v2096_v16 }
 0x237   : > { %673 = vmatpush1.msra.mxu0 %v2097_v18  ;;  %706 = vmatprep.mubr.f32.mxu0 %v2098_v5 }
 0x238   : > { %744 = vmatpush1.msra.mxu1 %v2099_v15  ;;  %777 = vmatprep.mubr.f32.mxu1 %v2098_v5 }
 0x2d8   : > { %v532_v8 = vpop.f32.mrf.mxu0  ;;  %v603_v13 = vpop.f32.mrf.mxu1 }
 0x2d9   : > { %v608_v11 = vadd.f32 %v1019_v3, %v532_v8  ;;  %v610_v6 = vadd.f32 %v1021_v12, %v603_v13 }
 0x2da   : > { %v534_v14 = vpop.f32.mrf.mxu0  ;;  %v605_v7 = vpop.f32.mrf.mxu1 }
 0x2db   : > { %1174 = vtanh.f32 %v608_v11  ;;  %v609_v4 = vadd.f32 %v1020_v10, %v534_v14  ;;  %v611_v9 = vadd.f32 %v1022_v17, %v605_v7  ;;  %v1029_v17 = vld [vmem:[%s1717_s18 + $0x68] sm:$0xff] }
 0x2dd   : > { %1176 = vtanh.f32 %v609_v4  ;;  %v1028_v4 = vld [vmem:[%s1717_s18 + $0x60] sm:$0xff] }
 0x2de   : > { %1178 = vtanh.f32 %v610_v6 }
 0x2df   : > { %1180 = vtanh.f32 %v611_v9  ;;  %v1030_v9 = vld [vmem:[%s1717_s18 + $0x70] sm:$0xff] }
 0x2e8   : > { %v1175_v63 = vpop.eup %1174 }
 0x2e9   : > { %v616_v1 = vmul.f32 0.5, %v1175_v63 }
 0x2ea   : > { %v1177_v20 = vpop.eup %1176 }
 0x2eb   : > { %v617_v2 = vadd.f32 0.5, %v616_v1  ;;  %v618_v16 = vmul.f32 0.5, %v1177_v20  ;;  %v1179_v5 = vpop.eup %1178 }
 0x2ec   : > { %v1181_v10 = vpop.eup %1180 }
 0x2ed   : > { %v619_v18 = vadd.f32 0.5, %v618_v16  ;;  %v623_v3 = vmul.f32 %v1179_v5, %v617_v2  ;;  %v620_v11 = vmul.f32 0.5, %v1181_v10  ;;  %v1031_v2 = vld [vmem:[%s1717_s18 + $0x78] sm:$0xff] }
 0x2ef   : > { %v622_v15 = vmul.f32 %v619_v18, %v1801_v19  ;;  %v621_v12 = vadd.f32 0.5, %v620_v11 }
 0x2f1   : > { %v624_v8 = vadd.f32 %v623_v3, %v622_v15 }
 0x2f3   : > { %1182 = vtanh.f32 %v624_v8 }
 0x300   : > { %v1183_v13 = vpop.eup %1182 }
 0x301   : > { %v626_v14 = vmul.f32 %v1183_v13, %v621_v12 }
 0x303   : > { %1025 = vst [vmem:[%s1727_s20 + $0x10] sm:$0xff] %v626_v14  ;;  %707 = vmatmul.mubr.f32.vlgmr.msra.gmra.mxu0 %v626_v14  ;;  %778 = vmatmul.mubr.f32.vlgmr.msra.gmra.mxu1 %v626_v14 }
 0x3c3   : > { %v708_v6 = vpop.f32.mrf.mxu0  ;;  %v779_v63 = vpop.f32.mrf.mxu1 }
 0x3c4   : > { %v784_v7 = vadd.f32 %v1028_v4, %v708_v6  ;;  %v786_v20 = vadd.f32 %v1030_v9, %v779_v63 }
 0x3c5   : > { %v710_v19 = vpop.f32.mrf.mxu0  ;;  %v781_v16 = vpop.f32.mrf.mxu1 }
 0x3c6   : > { %1184 = vtanh.f32 %v784_v7  ;;  %v785_v1 = vadd.f32 %v1029_v17, %v710_v19  ;;  %v787_v18 = vadd.f32 %v1031_v2, %v781_v16 }
 0x3c8   : > { %1186 = vtanh.f32 %v785_v1  ;;  %v830_v1 = vld [vmem:[%s1967_s4 + $0x70] sm:$0xff] (%p100_p0) }
 0x3c9   : > { %1188 = vtanh.f32 %v786_v20  ;;  %v829_v20 = vld [vmem:[%s1967_s4 + $0x68] sm:$0xff] (%p100_p0) }
 0x3ca   : > { %1190 = vtanh.f32 %v787_v18 }
 0x3d3   : > { %v1185_v5 = vpop.eup %1184 }
 0x3d4   : > { %v792_v15 = vmul.f32 0.5, %v1185_v5 }
 0x3d5   : > { %v1187_v3 = vpop.eup %1186 }
 0x3d6   : > { %v793_v10 = vadd.f32 0.5, %v792_v15  ;;  %v794_v11 = vmul.f32 0.5, %v1187_v3  ;;  %v1189_v13 = vpop.eup %1188 }
 0x3d7   : > { %v1191_v17 = vpop.eup %1190 }
 0x3d8   : > { %v795_v12 = vadd.f32 0.5, %v794_v11  ;;  %v799_v4 = vmul.f32 %v1189_v13, %v793_v10  ;;  %v796_v7 = vmul.f32 0.5, %v1191_v17 }
 0x3da   : > { %v798_v14 = vmul.f32 %v795_v12, %v624_v8  ;;  %v797_v9 = vadd.f32 0.5, %v796_v7  ;;  %v831_v8 = vld [vmem:[%s1967_s4 + $0x78] sm:$0xff] (%p100_p0) }
 0x3db   :  { %1069 = vmatprep.subr.mxu0 (%p100_p0), %v831_v8  ;;  %1113 = vmatprep.subr.mxu1 (%p100_p0), %v831_v8 }
 0x3dc   : > { %v800_v6 = vadd.f32 %v799_v4, %v798_v14  ;;  %1070 = vmatpush3.msra.mxu0 (%p100_p0), %v831_v8  ;;  %1129 = vmatpush3.msra.mxu1 (%p100_p0), %v831_v8 }
 0x3dd   :  { %1071 = vmatprep.subr.mxu0 (%p100_p0), %v830_v1  ;;  %1114 = vmatprep.subr.mxu1 (%p100_p0), %v830_v1 }
 0x3de   : > { %1192 = vtanh.f32 %v800_v6  ;;  %806 = vst [vmem:[#allocation3] sm:$0xff] %v800_v6  ;;  %1072 = vmatpush3.msra.mxu0 (%p100_p0), %v830_v1  ;;  %1130 = vmatpush3.msra.mxu1 (%p100_p0), %v830_v1 }
 0x3df   :  { %1073 = vmatprep.subr.mxu0 (%p100_p0), %v829_v20  ;;  %1115 = vmatprep.subr.mxu1 (%p100_p0), %v829_v20 }
 0x3e0   :  { %1074 = vmatpush3.msra.mxu0 (%p100_p0), %v829_v20  ;;  %1131 = vmatpush3.msra.mxu1 (%p100_p0), %v829_v20 }
 0x3e1   :  { %1075 = vmatprep.subr.mxu0 (%p100_p0), %v828_v21  ;;  %1116 = vmatprep.subr.mxu1 (%p100_p0), %v828_v21 }
 0x3e2   :  { %1076 = vmatpush3.msra.mxu0 (%p100_p0), %v828_v21  ;;  %1132 = vmatpush3.msra.mxu1 (%p100_p0), %v828_v21 }
 0x3e3   :  { %1077 = vmatprep.subr.mxu0 (%p100_p0), %v827_v22  ;;  %1117 = vmatprep.subr.mxu1 (%p100_p0), %v827_v22 }
 0x3e4   :  { %1078 = vmatpush3.msra.mxu0 (%p100_p0), %v827_v22  ;;  %1133 = vmatpush3.msra.mxu1 (%p100_p0), %v827_v22 }
 0x3e5   :  { %1079 = vmatprep.subr.mxu0 (%p100_p0), %v826_v23  ;;  %1118 = vmatprep.subr.mxu1 (%p100_p0), %v826_v23  ;;  %v957_v43 = vld [vmem:[#allocation3] sm:$0xff] (%p100_p0) }
 0x3e6   :  { %1080 = vmatpush3.msra.mxu0 (%p100_p0), %v826_v23  ;;  %1134 = vmatpush3.msra.mxu1 (%p100_p0), %v826_v23  ;;  %958 = vst [vmem:[%s1971_s8] sm:$0xff] (%p100_p0), %v957_v43 }
 0x3e7   :  { %1081 = vmatprep.subr.mxu0 (%p100_p0), %v825_v24  ;;  %1119 = vmatprep.subr.mxu1 (%p100_p0), %v825_v24 }
 0x3e8   :  { %1082 = vmatpush3.msra.mxu0 (%p100_p0), %v825_v24  ;;  %1135 = vmatpush3.msra.mxu1 (%p100_p0), %v825_v24 }
 0x3e9   :  { %1083 = vmatprep.subr.mxu0 (%p100_p0), %v824_v25  ;;  %1120 = vmatprep.subr.mxu1 (%p100_p0), %v824_v25 }
 0x3ea   :  { %102 = sbr.rel (!%p100_p0) target bundleno = 28 (0x1c), region = 83  ;;  %1084 = vmatpush3.msra.mxu0 (%p100_p0), %v824_v25  ;;  %1136 = vmatpush3.msra.mxu1 (%p100_p0), %v824_v25 }
 0x3eb   : > { %v1193_v63 = vpop.eup %1192  ;;  %1085 = vmatprep.subr.mxu0 (%p100_p0), %v823_v26  ;;  %1121 = vmatprep.subr.mxu1 (%p100_p0), %v823_v26 }
 0x3ec   : > { %v802_v19 = vmul.f32 %v1193_v63, %v797_v9  ;;  %1086 = vmatpush3.msra.mxu0 (%p100_p0), %v823_v26  ;;  %1137 = vmatpush3.msra.mxu1 (%p100_p0), %v823_v26 }
 0x3ed   :  { %1087 = vmatprep.subr.mxu0 (%p100_p0), %v822_v27  ;;  %1122 = vmatprep.subr.mxu1 (%p100_p0), %v822_v27 }
 0x3ee   : > { %1034 = vst [vmem:[%s1727_s20 + $0x18] sm:$0xff] %v802_v19  ;;  %807 = vst [vmem:[#allocation2] sm:$0xff] %v802_v19  ;;  %1088 = vmatpush3.msra.mxu0 (%p100_p0), %v822_v27  ;;  %1138 = vmatpush3.msra.mxu1 (%p100_p0), %v822_v27 }
 0x3ef   :  { %1089 = vmatprep.subr.mxu0 %v821_v28  ;;  %1123 = vmatprep.subr.mxu1 %v821_v28 }
 0x3f0   :  { %1090 = vmatpush3.msra.mxu0 %v821_v28  ;;  %1139 = vmatpush3.msra.mxu1 %v821_v28 }
 0x3f1   :  { %1091 = vmatprep.subr.mxu0 %v820_v29  ;;  %1124 = vmatprep.subr.mxu1 %v820_v29 }
 0x3f2   :  { %1092 = vmatpush3.msra.mxu0 %v820_v29  ;;  %1140 = vmatpush3.msra.mxu1 %v820_v29 }
 0x3f3   :  { %1093 = vmatprep.subr.mxu0 %v819_v30  ;;  %1125 = vmatprep.subr.mxu1 %v819_v30 }
 0x3f4   :  { %1094 = vmatpush3.msra.mxu0 %v819_v30  ;;  %1141 = vmatpush3.msra.mxu1 %v819_v30 }
 0x3f5   :  { %1095 = vmatprep.subr.mxu0 %v818_v31  ;;  %1126 = vmatprep.subr.mxu1 %v818_v31  ;;  %v808_v34 = vld [vmem:[#allocation4] sm:$0xff]  ;;  %v809_v36 = vld [vmem:[#allocation4 + $0x8] sm:$0xff]  ;;  %v810_v38 = vld [vmem:[#allocation4 + $0x10] sm:$0xff] }
 0x3f6   :  { %1096 = vmatpush3.msra.mxu0 %v818_v31  ;;  %1142 = vmatpush3.msra.mxu1 %v818_v31  ;;  %v812_v35 = vld [vmem:[#allocation4 + $0x20] sm:$0xff]  ;;  %v813_v37 = vld [vmem:[#allocation4 + $0x28] sm:$0xff]  ;;  %v814_v39 = vld [vmem:[#allocation4 + $0x30] sm:$0xff] }
 0x3f7   :  { %1097 = vmatprep.subr.mxu0 %v817_v32  ;;  %1127 = vmatprep.subr.mxu1 %v817_v32  ;;  %v811_v40 = vld [vmem:[#allocation4 + $0x18] sm:$0xff]  ;;  %v955_v42 = vld [vmem:[#allocation2] sm:$0xff] }
 0x3f8   :  { %1098 = vmatpush3.msra.mxu0 %v817_v32  ;;  %1143 = vmatpush3.msra.mxu1 %v817_v32  ;;  %v815_v41 = vld [vmem:[#allocation4 + $0x38] sm:$0xff]  ;;  %956 = vst [vmem:[%s1970_s7] sm:$0xff] %v955_v42 }
 0x3f9   :  { %1099 = vmatprep.subr.mxu0 %v816_v33  ;;  %1128 = vmatprep.subr.mxu1 %v816_v33 }
 0x3fa   :  { %1100 = vmatpush3.msra.mxu0 %v816_v33  ;;  %1144 = vmatpush3.msra.mxu1 %v816_v33 }
 0x3fb   :  { %1101 = vmatprep.mubr.f32.mxu0 %v808_v34  ;;  %1107 = vmatprep.mubr.f32.mxu1 %v812_v35 }
 0x3fc   :  { %1102 = vmatmul.mubr.f32.vlgmr.msra.gmra.mxu0 %v809_v36  ;;  %1108 = vmatmul.mubr.f32.vlgmr.msra.gmra.mxu1 %v813_v37 }
 0x3fd   :  { %1104 = vmatprep.mubr.f32.mxu0 %v810_v38  ;;  %1110 = vmatprep.mubr.f32.mxu1 %v814_v39 }
 0x400   :  { %1105 = vmatmul.mubr.f32.gmra.mxu0 %v811_v40  ;;  %1111 = vmatmul.mubr.f32.gmra.mxu1 %v815_v41 }
 0x4bc   :  { %v1103_v45 = vpop.f32.mrf.mxu0  ;;  %v1109_v46 = vpop.f32.mrf.mxu1 }
 0x4bd   :  { %v911_v47 = vadd.f32 %v1103_v45, %v1035_v44  ;;  %v931_v48 = vadd.f32 %v1109_v46, %v1035_v44 }
 0x4be   :  { %v905_v49 = vpop.f32.mrf.mxu0  ;;  %v925_v50 = vpop.f32.mrf.mxu1 }
 0x4bf   :  { %945 = vst [vmem:[%s1969_s6 + $0x8] sm:$0xff] %v911_v47  ;;  %949 = vst [vmem:[%s1969_s6 + $0x28] sm:$0xff] %v931_v48  ;;  %v906_v51 = vadd.f32 %v1035_v44, %v905_v49  ;;  %v926_v52 = vadd.f32 %v1035_v44, %v925_v50 }
 0x4c0   :  { %v1106_v53 = vpop.f32.mrf.mxu0  ;;  %v1112_v54 = vpop.f32.mrf.mxu1 }
 0x4c1   :  { %944 = vst [vmem:[%s1969_s6] sm:$0xff] %v906_v51  ;;  %948 = vst [vmem:[%s1969_s6 + $0x20] sm:$0xff] %v926_v52  ;;  %v921_v55 = vadd.f32 %v1106_v53, %v1035_v44  ;;  %v941_v56 = vadd.f32 %v1112_v54, %v1035_v44 }
 0x4c2   :  { %v915_v57 = vpop.f32.mrf.mxu0  ;;  %v935_v58 = vpop.f32.mrf.mxu1 }
 0x4c3   :  { %947 = vst [vmem:[%s1969_s6 + $0x18] sm:$0xff] %v921_v55  ;;  %951 = vst [vmem:[%s1969_s6 + $0x38] sm:$0xff] %v941_v56  ;;  %v916_v59 = vadd.f32 %v1035_v44, %v915_v57  ;;  %v936_v60 = vadd.f32 %v1035_v44, %v935_v58 }
 0x4c5   :  { %946 = vst [vmem:[%s1969_s6 + $0x10] sm:$0xff] %v916_v59  ;;  %950 = vst [vmem:[%s1969_s6 + $0x30] sm:$0xff] %v936_v60 }

</bundles_post_ra>
